<compile_context>
chip_gen: v5e
topology: v5e:2x2
jax: 0.10.0
libtpu: 0.0.40
codegen_flags: <defaults>
</compile_context>

<pallas_src>
import functools

import jax
import jax.numpy as jnp
from jax.experimental import pallas as pl
from jax.experimental.pallas import tpu as pltpu

EPS = 1e-5
_LANES = 128


def _round_up(x, m):
    return (x + m - 1) // m * m


# ---------------------------------------------------------------------------
# Kernel A: fused (im2col-free) 3x3 conv + masked partial BatchNorm statistics
# ---------------------------------------------------------------------------
def _conv3x3_stats_kernel(x_ref, w_ref, m_ref, y_ref, s_ref):
    """One TQ-row tile: 3x3 conv as 9 shifted MXU dots + masked partial stats.

    x_ref : (1, TQ + 2*WP + 2, Cin)  f32   flattened, padded input tile (+halo)
    w_ref : (9, Cin, Coutp)          bf16  per-tap weights (grid-resident)
    m_ref : (1, TQ, 1)               f32   1.0 for rows that are real pixels
    y_ref : (1, TQ, Coutp)           f32   conv output tile
    s_ref : (1, 2, Coutp)            f32   [sum, sum-of-squares] over valid rows
    """
    tq = y_ref.shape[1]
    coutp = y_ref.shape[2]
    wp = (x_ref.shape[1] - tq - 2) // 2          # padded image width (static)

    # Accumulate directly into the f32 output block (keeps live vregs small).
    y_ref[0] = jnp.zeros((tq, coutp), jnp.float32)
    for tap in range(9):
        dy, dx = divmod(tap, 3)
        off = dy * wp + dx                       # static sublane offset
        lhs = x_ref[0, off:off + tq, :].astype(jnp.bfloat16)
        y_ref[0] += jnp.dot(lhs, w_ref[tap], preferred_element_type=jnp.float32)

    # Partial BatchNorm statistics over the *valid* rows of this tile only.
    y = y_ref[0] * m_ref[0]
    s_ref[0, 0:1, :] = jnp.sum(y, axis=0, keepdims=True)
    s_ref[0, 1:2, :] = jnp.sum(y * y, axis=0, keepdims=True)


# ---------------------------------------------------------------------------
# Kernel B: BatchNorm affine (precomputed global scale/bias) + ReLU
# ---------------------------------------------------------------------------
def _bn_relu_kernel(y_ref, scale_ref, bias_ref, o_ref):
    y = y_ref[...]                                # (1, TQ, Coutp) f32
    o_ref[...] = jnp.maximum(
        y * scale_ref[...] + bias_ref[...], 0.0
    ).astype(o_ref.dtype)


# ---------------------------------------------------------------------------
# One Conv(3x3, pad 1, no bias) -> BatchNorm(train stats) -> ReLU layer.
# ---------------------------------------------------------------------------
def _conv_bn_relu(x_nhwc, w_oihw, gamma, beta, *, tq):
    n, h, w, cin = x_nhwc.shape
    cout = w_oihw.shape[0]
    coutp = _round_up(cout, _LANES)               # lane-dense output channels

    wp = w + 2                                    # padded width
    m_ext = h * wp                                # "extended" rows per image
    tq = min(_round_up(tq, 8), _round_up(m_ext, 8))
    m_ext_pad = _round_up(m_ext, tq)
    num_qb = m_ext_pad // tq                      # row-tiles per image
    halo = 2 * wp + 2                             # halo rows per tile
    g = n * num_qb                                # total grid steps

    # --- weights: OIHW -> (tap, Cin, Coutp), zero-padded lanes, bf16 -------
    w_t = jnp.transpose(w_oihw, (2, 3, 1, 0)).reshape(9, cin, cout)
    w_t = jnp.pad(w_t, ((0, 0), (0, 0), (0, coutp - cout))).astype(jnp.bfloat16)
    gamma_p = jnp.pad(gamma.astype(jnp.float32), (0, coutp - cout))
    beta_p = jnp.pad(beta.astype(jnp.float32), (0, coutp - cout))

    # --- fused-im2col input: pad, flatten, cut overlapping row windows -----
    # (one extra pass over the activation, replacing the 9x im2col blow-up)
    xp = jnp.pad(x_nhwc, ((0, 0), (2, 2), (1, 1), (0, 0)))      # (N, H+4, WP, Cin)
    xf = xp.reshape(n, (h + 4) * wp, cin)
    need = (num_qb - 1) * tq + (wp - 1) + (tq + halo)           # last window end
    extra = max(0, need - (h + 4) * wp)
    if extra:
        xf = jnp.pad(xf, ((0, 0), (0, extra), (0, 0)))          # tail slack rows
    xb = jnp.stack(
        [jax.lax.slice_in_dim(xf, b * tq + wp - 1, b * tq + wp - 1 + tq + halo,
                              axis=1)
         for b in range(num_qb)],
        axis=1,
    ).reshape(g, tq + halo, cin)

    # --- per-row validity mask: drops the 2 pad columns of each image row
    #     and the tail rows used to round M_ext up to a multiple of tq ------
    q = jnp.arange(m_ext_pad, dtype=jnp.int32)
    col = q % wp
    valid = (col != 0) & (col != wp - 1) & (q < m_ext)
    mask = jnp.broadcast_to(
        valid.astype(jnp.float32).reshape(1, num_qb, tq, 1),
        (n, num_qb, tq, 1),
    ).reshape(g, tq, 1)

    flops = 2 * g * tq * 9 * cin * coutp
    bytes_accessed = (xb.size * 4 + w_t.size * 2 + mask.size * 4
                      + g * tq * coutp * 4 + g * 2 * coutp * 4)

    # --- pass 1: conv + per-tile partial stats ------------------------------
    y_ext, stats = pl.pallas_call(
        _conv3x3_stats_kernel,
        out_shape=(
            jax.ShapeDtypeStruct((g, tq, coutp), jnp.float32),
            jax.ShapeDtypeStruct((g, 2, coutp), jnp.float32),
        ),
        grid=(g,),
        in_specs=[
            pl.BlockSpec((1, tq + halo, cin), lambda i: (i, 0, 0)),
            pl.BlockSpec((9, cin, coutp), lambda i: (0, 0, 0)),   # resident
            pl.BlockSpec((1, tq, 1), lambda i: (i, 0, 0)),
        ],
        out_specs=(
            pl.BlockSpec((1, tq, coutp), lambda i: (i, 0, 0)),
            pl.BlockSpec((1, 2, coutp), lambda i: (i, 0, 0)),
        ),
        compiler_params=pltpu.CompilerParams(
            dimension_semantics=("parallel",),
            vmem_limit_bytes=32 * 1024 * 1024,
        ),
        cost_estimate=pl.CostEstimate(
            flops=flops, transcendentals=0, bytes_accessed=bytes_accessed),
    )(xb, w_t, mask)

    # --- global BatchNorm combine (training-mode batch statistics) ----------
    m_valid = float(n * h * w)
    tot = jnp.sum(stats, axis=0)                  # (2, Coutp)
    mean = tot[0] / m_valid
    var = jnp.maximum(tot[1] / m_valid - mean * mean, 0.0)
    inv = jax.lax.rsqrt(var + EPS)
    scale = (gamma_p * inv).reshape(1, coutp)
    bias = (beta_p - mean * gamma_p * inv).reshape(1, coutp)

    # --- pass 2: BN affine + ReLU (pure VPU, fully parallel) -----------------
    y_bn = pl.pallas_call(
        _bn_relu_kernel,
        out_shape=jax.ShapeDtypeStruct((g, tq, coutp), jnp.float32),
        grid=(g,),
        in_specs=[
            pl.BlockSpec((1, tq, coutp), lambda i: (i, 0, 0)),
            pl.BlockSpec((1, coutp), lambda i: (0, 0)),
            pl.BlockSpec((1, coutp), lambda i: (0, 0)),
        ],
        out_specs=pl.BlockSpec((1, tq, coutp), lambda i: (i, 0, 0)),
        compiler_params=pltpu.CompilerParams(
            dimension_semantics=("parallel",),
            vmem_limit_bytes=32 * 1024 * 1024,
        ),
    )(y_ext, scale, bias)

    # --- drop pad columns / tail rows / padded channels ----------------------
    y_bn = y_bn.reshape(n, m_ext_pad, coutp)[:, :m_ext, :]
    y_bn = y_bn.reshape(n, h, wp, coutp)[:, :, 1:1 + w, :cout]
    return y_bn


@functools.partial(jax.jit, static_argnames=("tq",))
def convolution_layer(x_nchw, w1, g1, b1, w2, g2, b2, *, tq=512):
    """Forward pass of ConvolutionLayer. Input/output are NCHW like PyTorch."""
    x = jnp.transpose(x_nchw, (0, 2, 3, 1))       # NCHW -> NHWC (entry only)
    h = _conv_bn_relu(x, w1, g1, b1, tq=tq)       # stays NHWC between layers
    h = _conv_bn_relu(h, w2, g2, b2, tq=tq)
    return jnp.transpose(h, (0, 3, 1, 2))         # NHWC -> NCHW (exit only)


# ---------------- pure-JAX reference for validation ----------------
# Mirrors the kernel's MXU precision (bf16 inputs, f32 accumulation).
def _reference(x_nchw, w1, g1, b1, w2, g2, b2):
    def conv(x, w_oihw):
        w_hwio = jnp.transpose(w_oihw, (2, 3, 1, 0)).astype(jnp.bfloat16)
        return jax.lax.conv_general_dilated(
            x.astype(jnp.bfloat16), w_hwio, window_strides=(1, 1),
            padding="SAME", dimension_numbers=("NHWC", "HWIO", "NHWC"),
            preferred_element_type=jnp.float32)

    def bn_relu(y, g, b):
        m = jnp.mean(y, axis=(0, 1, 2), keepdims=True)
        v = jnp.mean((y - m) ** 2, axis=(0, 1, 2), keepdims=True)
        return jnp.maximum((y - m) * jax.lax.rsqrt(v + EPS) * g + b, 0.0)

    x = jnp.transpose(x_nchw, (0, 2, 3, 1))
    y = bn_relu(conv(x, w1), g1, b1)
    y = bn_relu(conv(y, w2), g2, b2)
    return jnp.transpose(y, (0, 3, 1, 2))


if __name__ == "__main__":
    N, C_IN, C_OUT, H, W = 2, 4, 8, 16, 16

    key = jax.random.PRNGKey(0)
    kx, kw1, kw2 = jax.random.split(key, 3)
    x = jax.random.normal(kx, (N, C_IN, H, W), jnp.float32)
    # Conv2d weights (OIHW, bias=False); BatchNorm2d gamma=1, beta=0 (torch init).
    w1 = 0.2 * jax.random.normal(kw1, (C_OUT, C_IN, 3, 3), jnp.float32)
    w2 = 0.2 * jax.random.normal(kw2, (C_OUT, C_OUT, 3, 3), jnp.float32)
    g1 = jnp.ones((C_OUT,), jnp.float32)
    b1 = jnp.zeros((C_OUT,), jnp.float32)
    g2 = jnp.ones((C_OUT,), jnp.float32)
    b2 = jnp.zeros((C_OUT,), jnp.float32)

    # tq=128 exercises the multi-tile path (several grid steps per image) at
    # this small size; production shapes use the default tq=512.
    out = convolution_layer(x, w1, g1, b1, w2, g2, b2, tq=128)
    out = jax.block_until_ready(out)

    ref = _reference(x, w1, g1, b1, w2, g2, b2)
    assert out.shape == (N, C_OUT, H, W), out.shape
    max_err = float(jnp.max(jnp.abs(out - ref)))
    # Tolerance sized for bf16 MXU inputs (the reference uses the same conv
    # precision; residual differences come from summation order and bf16
    # requantization of the inter-layer activation).
    assert jnp.allclose(out, ref, atol=1e-2, rtol=1e-2), f"max_err={max_err}"

    print("KERNEL_OK")
</pallas_src>

<mosaic_0001>
module attributes {stable_mosaic.version = 11 : i64} {
  func.func @_conv3x3_stats_kernel(%arg0: i32, %arg1: memref<1x166x4xf32, #tpu.memory_space<vmem>>, %arg2: memref<9x4x128xbf16, #tpu.memory_space<vmem>>, %arg3: memref<1x128x1xf32, #tpu.memory_space<vmem>>, %arg4: memref<1x128x128xf32, #tpu.memory_space<vmem>>, %arg5: memref<1x2x128xf32, #tpu.memory_space<vmem>>) attributes {dimension_semantics = [#tpu.dimension_semantics<parallel>], iteration_bounds = array<i64: 6>, scalar_prefetch = 0 : i64, scratch_operands = 0 : i64, tpu.core_type = #tpu.core_type<tc>, window_params = [{transform_indices = @transform_0, window_bounds = array<i64: 1, 166, 4>}, {pipeline_mode = #tpu.pipeline_mode<synchronous>, transform_indices = @transform_1, window_bounds = array<i64: 9, 4, 128>}, {transform_indices = @transform_2, window_bounds = array<i64: 1, 128, 1>}, {transform_indices = @transform_3, window_bounds = array<i64: 1, 128, 128>}, {transform_indices = @transform_4, window_bounds = array<i64: 1, 2, 128>}]} {
    %cst = arith.constant 0.000000e+00 : f32
    %0 = vector.broadcast %cst : f32 to vector<128x128xf32>
    %c0 = arith.constant 0 : index
    %c0_0 = arith.constant 0 : index
    %c0_1 = arith.constant 0 : index
    %1 = vector.load %arg4[%c0, %c0_0, %c0_1] : memref<1x128x128xf32, #tpu.memory_space<vmem>>, vector<1x128x128xf32>
    %2 = vector.shape_cast %1 : vector<1x128x128xf32> to vector<128x128xf32>
    %3 = vector.shape_cast %0 : vector<128x128xf32> to vector<1x128x128xf32>
    tpu.vector_store %arg4[%c0, %c0_0, %c0_1], %3 {strides = array<i32>} : memref<1x128x128xf32, #tpu.memory_space<vmem>>, vector<1x128x128xf32>,
    %c0_2 = arith.constant 0 : index
    %c0_3 = arith.constant 0 : index
    %c0_4 = arith.constant 0 : index
    %4 = vector.load %arg1[%c0_2, %c0_3, %c0_4] : memref<1x166x4xf32, #tpu.memory_space<vmem>>, vector<1x128x4xf32>
    %5 = vector.shape_cast %4 : vector<1x128x4xf32> to vector<128x4xf32>
    %6 = arith.truncf %5 : vector<128x4xf32> to vector<128x4xbf16>
    %c0_5 = arith.constant 0 : index
    %c0_6 = arith.constant 0 : index
    %c0_7 = arith.constant 0 : index
    %7 = vector.load %arg4[%c0_5, %c0_6, %c0_7] : memref<1x128x128xf32, #tpu.memory_space<vmem>>, vector<1x128x128xf32>
    %8 = vector.shape_cast %7 : vector<1x128x128xf32> to vector<128x128xf32>
    %c0_8 = arith.constant 0 : index
    %c0_9 = arith.constant 0 : index
    %c0_10 = arith.constant 0 : index
    %9 = vector.load %arg2[%c0_8, %c0_9, %c0_10] : memref<9x4x128xbf16, #tpu.memory_space<vmem>>, vector<1x4x128xbf16>
    %10 = vector.shape_cast %9 : vector<1x4x128xbf16> to vector<4x128xbf16>
    %cst_11 = arith.constant dense<0.000000e+00> : vector<128x128xf32>
    %11 = tpu.matmul %6, %10, %cst_11 {dimension_numbers = #tpu.dot_dimension_numbers<[1], [0], [0], [1], [0, 0, 1, 1], [], []>} : vector<128x4xbf16>, vector<4x128xbf16>, vector<128x128xf32> -> vector<128x128xf32>
    %12 = arith.addf %8, %11 : vector<128x128xf32>
    %c0_12 = arith.constant 0 : index
    %c0_13 = arith.constant 0 : index
    %c0_14 = arith.constant 0 : index
    %13 = vector.load %arg4[%c0_12, %c0_13, %c0_14] : memref<1x128x128xf32, #tpu.memory_space<vmem>>, vector<1x128x128xf32>
    %14 = vector.shape_cast %13 : vector<1x128x128xf32> to vector<128x128xf32>
    %15 = vector.shape_cast %12 : vector<128x128xf32> to vector<1x128x128xf32>
    tpu.vector_store %arg4[%c0_12, %c0_13, %c0_14], %15 {strides = array<i32>} : memref<1x128x128xf32, #tpu.memory_space<vmem>>, vector<1x128x128xf32>,
    %c0_15 = arith.constant 0 : index
    %c1 = arith.constant 1 : index
    %c0_16 = arith.constant 0 : index
    %16 = vector.load %arg1[%c0_15, %c1, %c0_16] : memref<1x166x4xf32, #tpu.memory_space<vmem>>, vector<1x128x4xf32>
    %17 = vector.shape_cast %16 : vector<1x128x4xf32> to vector<128x4xf32>
    %18 = arith.truncf %17 : vector<128x4xf32> to vector<128x4xbf16>
    %c0_17 = arith.constant 0 : index
    %c0_18 = arith.constant 0 : index
    %c0_19 = arith.constant 0 : index
    %19 = vector.load %arg4[%c0_17, %c0_18, %c0_19] : memref<1x128x128xf32, #tpu.memory_space<vmem>>, vector<1x128x128xf32>
    %20 = vector.shape_cast %19 : vector<1x128x128xf32> to vector<128x128xf32>
    %c1_20 = arith.constant 1 : index
    %c0_21 = arith.constant 0 : index
    %c0_22 = arith.constant 0 : index
    %21 = vector.load %arg2[%c1_20, %c0_21, %c0_22] : memref<9x4x128xbf16, #tpu.memory_space<vmem>>, vector<1x4x128xbf16>
    %22 = vector.shape_cast %21 : vector<1x4x128xbf16> to vector<4x128xbf16>
    %cst_23 = arith.constant dense<0.000000e+00> : vector<128x128xf32>
    %23 = tpu.matmul %18, %22, %cst_23 {dimension_numbers = #tpu.dot_dimension_numbers<[1], [0], [0], [1], [0, 0, 1, 1], [], []>} : vector<128x4xbf16>, vector<4x128xbf16>, vector<128x128xf32> -> vector<128x128xf32>
    %24 = arith.addf %20, %23 : vector<128x128xf32>
    %c0_24 = arith.constant 0 : index
    %c0_25 = arith.constant 0 : index
    %c0_26 = arith.constant 0 : index
    %25 = vector.load %arg4[%c0_24, %c0_25, %c0_26] : memref<1x128x128xf32, #tpu.memory_space<vmem>>, vector<1x128x128xf32>
    %26 = vector.shape_cast %25 : vector<1x128x128xf32> to vector<128x128xf32>
    %27 = vector.shape_cast %24 : vector<128x128xf32> to vector<1x128x128xf32>
    tpu.vector_store %arg4[%c0_24, %c0_25, %c0_26], %27 {strides = array<i32>} : memref<1x128x128xf32, #tpu.memory_space<vmem>>, vector<1x128x128xf32>,
    %c0_27 = arith.constant 0 : index
    %c2 = arith.constant 2 : index
    %c0_28 = arith.constant 0 : index
    %28 = vector.load %arg1[%c0_27, %c2, %c0_28] : memref<1x166x4xf32, #tpu.memory_space<vmem>>, vector<1x128x4xf32>
    %29 = vector.shape_cast %28 : vector<1x128x4xf32> to vector<128x4xf32>
    %30 = arith.truncf %29 : vector<128x4xf32> to vector<128x4xbf16>
    %c0_29 = arith.constant 0 : index
    %c0_30 = arith.constant 0 : index
    %c0_31 = arith.constant 0 : index
    %31 = vector.load %arg4[%c0_29, %c0_30, %c0_31] : memref<1x128x128xf32, #tpu.memory_space<vmem>>, vector<1x128x128xf32>
    %32 = vector.shape_cast %31 : vector<1x128x128xf32> to vector<128x128xf32>
    %c2_32 = arith.constant 2 : index
    %c0_33 = arith.constant 0 : index
    %c0_34 = arith.constant 0 : index
    %33 = vector.load %arg2[%c2_32, %c0_33, %c0_34] : memref<9x4x128xbf16, #tpu.memory_space<vmem>>, vector<1x4x128xbf16>
    %34 = vector.shape_cast %33 : vector<1x4x128xbf16> to vector<4x128xbf16>
    %cst_35 = arith.constant dense<0.000000e+00> : vector<128x128xf32>
    %35 = tpu.matmul %30, %34, %cst_35 {dimension_numbers = #tpu.dot_dimension_numbers<[1], [0], [0], [1], [0, 0, 1, 1], [], []>} : vector<128x4xbf16>, vector<4x128xbf16>, vector<128x128xf32> -> vector<128x128xf32>
    %36 = arith.addf %32, %35 : vector<128x128xf32>
    %c0_36 = arith.constant 0 : index
    %c0_37 = arith.constant 0 : index
    %c0_38 = arith.constant 0 : index
    %37 = vector.load %arg4[%c0_36, %c0_37, %c0_38] : memref<1x128x128xf32, #tpu.memory_space<vmem>>, vector<1x128x128xf32>
    %38 = vector.shape_cast %37 : vector<1x128x128xf32> to vector<128x128xf32>
    %39 = vector.shape_cast %36 : vector<128x128xf32> to vector<1x128x128xf32>
    tpu.vector_store %arg4[%c0_36, %c0_37, %c0_38], %39 {strides = array<i32>} : memref<1x128x128xf32, #tpu.memory_space<vmem>>, vector<1x128x128xf32>,
    %c0_39 = arith.constant 0 : index
    %c18 = arith.constant 18 : index
    %c0_40 = arith.constant 0 : index
    %40 = vector.load %arg1[%c0_39, %c18, %c0_40] : memref<1x166x4xf32, #tpu.memory_space<vmem>>, vector<1x128x4xf32>
    %41 = vector.shape_cast %40 : vector<1x128x4xf32> to vector<128x4xf32>
    %42 = arith.truncf %41 : vector<128x4xf32> to vector<128x4xbf16>
    %c0_41 = arith.constant 0 : index
    %c0_42 = arith.constant 0 : index
    %c0_43 = arith.constant 0 : index
    %43 = vector.load %arg4[%c0_41, %c0_42, %c0_43] : memref<1x128x128xf32, #tpu.memory_space<vmem>>, vector<1x128x128xf32>
    %44 = vector.shape_cast %43 : vector<1x128x128xf32> to vector<128x128xf32>
    %c3 = arith.constant 3 : index
    %c0_44 = arith.constant 0 : index
    %c0_45 = arith.constant 0 : index
    %45 = vector.load %arg2[%c3, %c0_44, %c0_45] : memref<9x4x128xbf16, #tpu.memory_space<vmem>>, vector<1x4x128xbf16>
    %46 = vector.shape_cast %45 : vector<1x4x128xbf16> to vector<4x128xbf16>
    %cst_46 = arith.constant dense<0.000000e+00> : vector<128x128xf32>
    %47 = tpu.matmul %42, %46, %cst_46 {dimension_numbers = #tpu.dot_dimension_numbers<[1], [0], [0], [1], [0, 0, 1, 1], [], []>} : vector<128x4xbf16>, vector<4x128xbf16>, vector<128x128xf32> -> vector<128x128xf32>
    %48 = arith.addf %44, %47 : vector<128x128xf32>
    %c0_47 = arith.constant 0 : index
    %c0_48 = arith.constant 0 : index
    %c0_49 = arith.constant 0 : index
    %49 = vector.load %arg4[%c0_47, %c0_48, %c0_49] : memref<1x128x128xf32, #tpu.memory_space<vmem>>, vector<1x128x128xf32>
    %50 = vector.shape_cast %49 : vector<1x128x128xf32> to vector<128x128xf32>
    %51 = vector.shape_cast %48 : vector<128x128xf32> to vector<1x128x128xf32>
    tpu.vector_store %arg4[%c0_47, %c0_48, %c0_49], %51 {strides = array<i32>} : memref<1x128x128xf32, #tpu.memory_space<vmem>>, vector<1x128x128xf32>,
    %c0_50 = arith.constant 0 : index
    %c19 = arith.constant 19 : index
    %c0_51 = arith.constant 0 : index
    %52 = vector.load %arg1[%c0_50, %c19, %c0_51] : memref<1x166x4xf32, #tpu.memory_space<vmem>>, vector<1x128x4xf32>
    %53 = vector.shape_cast %52 : vector<1x128x4xf32> to vector<128x4xf32>
    %54 = arith.truncf %53 : vector<128x4xf32> to vector<128x4xbf16>
    %c0_52 = arith.constant 0 : index
    %c0_53 = arith.constant 0 : index
    %c0_54 = arith.constant 0 : index
    %55 = vector.load %arg4[%c0_52, %c0_53, %c0_54] : memref<1x128x128xf32, #tpu.memory_space<vmem>>, vector<1x128x128xf32>
    %56 = vector.shape_cast %55 : vector<1x128x128xf32> to vector<128x128xf32>
    %c4 = arith.constant 4 : index
    %c0_55 = arith.constant 0 : index
    %c0_56 = arith.constant 0 : index
    %57 = vector.load %arg2[%c4, %c0_55, %c0_56] : memref<9x4x128xbf16, #tpu.memory_space<vmem>>, vector<1x4x128xbf16>
    %58 = vector.shape_cast %57 : vector<1x4x128xbf16> to vector<4x128xbf16>
    %cst_57 = arith.constant dense<0.000000e+00> : vector<128x128xf32>
    %59 = tpu.matmul %54, %58, %cst_57 {dimension_numbers = #tpu.dot_dimension_numbers<[1], [0], [0], [1], [0, 0, 1, 1], [], []>} : vector<128x4xbf16>, vector<4x128xbf16>, vector<128x128xf32> -> vector<128x128xf32>
    %60 = arith.addf %56, %59 : vector<128x128xf32>
    %c0_58 = arith.constant 0 : index
    %c0_59 = arith.constant 0 : index
    %c0_60 = arith.constant 0 : index
    %61 = vector.load %arg4[%c0_58, %c0_59, %c0_60] : memref<1x128x128xf32, #tpu.memory_space<vmem>>, vector<1x128x128xf32>
    %62 = vector.shape_cast %61 : vector<1x128x128xf32> to vector<128x128xf32>
    %63 = vector.shape_cast %60 : vector<128x128xf32> to vector<1x128x128xf32>
    tpu.vector_store %arg4[%c0_58, %c0_59, %c0_60], %63 {strides = array<i32>} : memref<1x128x128xf32, #tpu.memory_space<vmem>>, vector<1x128x128xf32>,
    %c0_61 = arith.constant 0 : index
    %c20 = arith.constant 20 : index
    %c0_62 = arith.constant 0 : index
    %64 = vector.load %arg1[%c0_61, %c20, %c0_62] : memref<1x166x4xf32, #tpu.memory_space<vmem>>, vector<1x128x4xf32>
    %65 = vector.shape_cast %64 : vector<1x128x4xf32> to vector<128x4xf32>
    %66 = arith.truncf %65 : vector<128x4xf32> to vector<128x4xbf16>
    %c0_63 = arith.constant 0 : index
    %c0_64 = arith.constant 0 : index
    %c0_65 = arith.constant 0 : index
    %67 = vector.load %arg4[%c0_63, %c0_64, %c0_65] : memref<1x128x128xf32, #tpu.memory_space<vmem>>, vector<1x128x128xf32>
    %68 = vector.shape_cast %67 : vector<1x128x128xf32> to vector<128x128xf32>
    %c5 = arith.constant 5 : index
    %c0_66 = arith.constant 0 : index
    %c0_67 = arith.constant 0 : index
    %69 = vector.load %arg2[%c5, %c0_66, %c0_67] : memref<9x4x128xbf16, #tpu.memory_space<vmem>>, vector<1x4x128xbf16>
    %70 = vector.shape_cast %69 : vector<1x4x128xbf16> to vector<4x128xbf16>
    %cst_68 = arith.constant dense<0.000000e+00> : vector<128x128xf32>
    %71 = tpu.matmul %66, %70, %cst_68 {dimension_numbers = #tpu.dot_dimension_numbers<[1], [0], [0], [1], [0, 0, 1, 1], [], []>} : vector<128x4xbf16>, vector<4x128xbf16>, vector<128x128xf32> -> vector<128x128xf32>
    %72 = arith.addf %68, %71 : vector<128x128xf32>
    %c0_69 = arith.constant 0 : index
    %c0_70 = arith.constant 0 : index
    %c0_71 = arith.constant 0 : index
    %73 = vector.load %arg4[%c0_69, %c0_70, %c0_71] : memref<1x128x128xf32, #tpu.memory_space<vmem>>, vector<1x128x128xf32>
    %74 = vector.shape_cast %73 : vector<1x128x128xf32> to vector<128x128xf32>
    %75 = vector.shape_cast %72 : vector<128x128xf32> to vector<1x128x128xf32>
    tpu.vector_store %arg4[%c0_69, %c0_70, %c0_71], %75 {strides = array<i32>} : memref<1x128x128xf32, #tpu.memory_space<vmem>>, vector<1x128x128xf32>,
    %c0_72 = arith.constant 0 : index
    %c36 = arith.constant 36 : index
    %c0_73 = arith.constant 0 : index
    %76 = vector.load %arg1[%c0_72, %c36, %c0_73] : memref<1x166x4xf32, #tpu.memory_space<vmem>>, vector<1x128x4xf32>
    %77 = vector.shape_cast %76 : vector<1x128x4xf32> to vector<128x4xf32>
    %78 = arith.truncf %77 : vector<128x4xf32> to vector<128x4xbf16>
    %c0_74 = arith.constant 0 : index
    %c0_75 = arith.constant 0 : index
    %c0_76 = arith.constant 0 : index
    %79 = vector.load %arg4[%c0_74, %c0_75, %c0_76] : memref<1x128x128xf32, #tpu.memory_space<vmem>>, vector<1x128x128xf32>
    %80 = vector.shape_cast %79 : vector<1x128x128xf32> to vector<128x128xf32>
    %c6 = arith.constant 6 : index
    %c0_77 = arith.constant 0 : index
    %c0_78 = arith.constant 0 : index
    %81 = vector.load %arg2[%c6, %c0_77, %c0_78] : memref<9x4x128xbf16, #tpu.memory_space<vmem>>, vector<1x4x128xbf16>
    %82 = vector.shape_cast %81 : vector<1x4x128xbf16> to vector<4x128xbf16>
    %cst_79 = arith.constant dense<0.000000e+00> : vector<128x128xf32>
    %83 = tpu.matmul %78, %82, %cst_79 {dimension_numbers = #tpu.dot_dimension_numbers<[1], [0], [0], [1], [0, 0, 1, 1], [], []>} : vector<128x4xbf16>, vector<4x128xbf16>, vector<128x128xf32> -> vector<128x128xf32>
    %84 = arith.addf %80, %83 : vector<128x128xf32>
    %c0_80 = arith.constant 0 : index
    %c0_81 = arith.constant 0 : index
    %c0_82 = arith.constant 0 : index
    %85 = vector.load %arg4[%c0_80, %c0_81, %c0_82] : memref<1x128x128xf32, #tpu.memory_space<vmem>>, vector<1x128x128xf32>
    %86 = vector.shape_cast %85 : vector<1x128x128xf32> to vector<128x128xf32>
    %87 = vector.shape_cast %84 : vector<128x128xf32> to vector<1x128x128xf32>
    tpu.vector_store %arg4[%c0_80, %c0_81, %c0_82], %87 {strides = array<i32>} : memref<1x128x128xf32, #tpu.memory_space<vmem>>, vector<1x128x128xf32>,
    %c0_83 = arith.constant 0 : index
    %c37 = arith.constant 37 : index
    %c0_84 = arith.constant 0 : index
    %88 = vector.load %arg1[%c0_83, %c37, %c0_84] : memref<1x166x4xf32, #tpu.memory_space<vmem>>, vector<1x128x4xf32>
    %89 = vector.shape_cast %88 : vector<1x128x4xf32> to vector<128x4xf32>
    %90 = arith.truncf %89 : vector<128x4xf32> to vector<128x4xbf16>
    %c0_85 = arith.constant 0 : index
    %c0_86 = arith.constant 0 : index
    %c0_87 = arith.constant 0 : index
    %91 = vector.load %arg4[%c0_85, %c0_86, %c0_87] : memref<1x128x128xf32, #tpu.memory_space<vmem>>, vector<1x128x128xf32>
    %92 = vector.shape_cast %91 : vector<1x128x128xf32> to vector<128x128xf32>
    %c7 = arith.constant 7 : index
    %c0_88 = arith.constant 0 : index
    %c0_89 = arith.constant 0 : index
    %93 = vector.load %arg2[%c7, %c0_88, %c0_89] : memref<9x4x128xbf16, #tpu.memory_space<vmem>>, vector<1x4x128xbf16>
    %94 = vector.shape_cast %93 : vector<1x4x128xbf16> to vector<4x128xbf16>
    %cst_90 = arith.constant dense<0.000000e+00> : vector<128x128xf32>
    %95 = tpu.matmul %90, %94, %cst_90 {dimension_numbers = #tpu.dot_dimension_numbers<[1], [0], [0], [1], [0, 0, 1, 1], [], []>} : vector<128x4xbf16>, vector<4x128xbf16>, vector<128x128xf32> -> vector<128x128xf32>
    %96 = arith.addf %92, %95 : vector<128x128xf32>
    %c0_91 = arith.constant 0 : index
    %c0_92 = arith.constant 0 : index
    %c0_93 = arith.constant 0 : index
    %97 = vector.load %arg4[%c0_91, %c0_92, %c0_93] : memref<1x128x128xf32, #tpu.memory_space<vmem>>, vector<1x128x128xf32>
    %98 = vector.shape_cast %97 : vector<1x128x128xf32> to vector<128x128xf32>
    %99 = vector.shape_cast %96 : vector<128x128xf32> to vector<1x128x128xf32>
    tpu.vector_store %arg4[%c0_91, %c0_92, %c0_93], %99 {strides = array<i32>} : memref<1x128x128xf32, #tpu.memory_space<vmem>>, vector<1x128x128xf32>,
    %c0_94 = arith.constant 0 : index
    %c38 = arith.constant 38 : index
    %c0_95 = arith.constant 0 : index
    %100 = vector.load %arg1[%c0_94, %c38, %c0_95] : memref<1x166x4xf32, #tpu.memory_space<vmem>>, vector<1x128x4xf32>
    %101 = vector.shape_cast %100 : vector<1x128x4xf32> to vector<128x4xf32>
    %102 = arith.truncf %101 : vector<128x4xf32> to vector<128x4xbf16>
    %c0_96 = arith.constant 0 : index
    %c0_97 = arith.constant 0 : index
    %c0_98 = arith.constant 0 : index
    %103 = vector.load %arg4[%c0_96, %c0_97, %c0_98] : memref<1x128x128xf32, #tpu.memory_space<vmem>>, vector<1x128x128xf32>
    %104 = vector.shape_cast %103 : vector<1x128x128xf32> to vector<128x128xf32>
    %c8 = arith.constant 8 : index
    %c0_99 = arith.constant 0 : index
    %c0_100 = arith.constant 0 : index
    %105 = vector.load %arg2[%c8, %c0_99, %c0_100] : memref<9x4x128xbf16, #tpu.memory_space<vmem>>, vector<1x4x128xbf16>
    %106 = vector.shape_cast %105 : vector<1x4x128xbf16> to vector<4x128xbf16>
    %cst_101 = arith.constant dense<0.000000e+00> : vector<128x128xf32>
    %107 = tpu.matmul %102, %106, %cst_101 {dimension_numbers = #tpu.dot_dimension_numbers<[1], [0], [0], [1], [0, 0, 1, 1], [], []>} : vector<128x4xbf16>, vector<4x128xbf16>, vector<128x128xf32> -> vector<128x128xf32>
    %108 = arith.addf %104, %107 : vector<128x128xf32>
    %c0_102 = arith.constant 0 : index
    %c0_103 = arith.constant 0 : index
    %c0_104 = arith.constant 0 : index
    %109 = vector.load %arg4[%c0_102, %c0_103, %c0_104] : memref<1x128x128xf32, #tpu.memory_space<vmem>>, vector<1x128x128xf32>
    %110 = vector.shape_cast %109 : vector<1x128x128xf32> to vector<128x128xf32>
    %111 = vector.shape_cast %108 : vector<128x128xf32> to vector<1x128x128xf32>
    tpu.vector_store %arg4[%c0_102, %c0_103, %c0_104], %111 {strides = array<i32>} : memref<1x128x128xf32, #tpu.memory_space<vmem>>, vector<1x128x128xf32>,
    %c0_105 = arith.constant 0 : index
    %c0_106 = arith.constant 0 : index
    %c0_107 = arith.constant 0 : index
    %112 = vector.load %arg4[%c0_105, %c0_106, %c0_107] : memref<1x128x128xf32, #tpu.memory_space<vmem>>, vector<1x128x128xf32>
    %113 = vector.shape_cast %112 : vector<1x128x128xf32> to vector<128x128xf32>
    %c0_108 = arith.constant 0 : index
    %c0_109 = arith.constant 0 : index
    %c0_110 = arith.constant 0 : index
    %114 = vector.load %arg3[%c0_108, %c0_109, %c0_110] : memref<1x128x1xf32, #tpu.memory_space<vmem>>, vector<1x128x1xf32>
    %115 = vector.shape_cast %114 : vector<1x128x1xf32> to vector<128x1xf32>
    %116 = vector.broadcast %115 : vector<128x1xf32> to vector<128x128xf32>
    %117 = arith.mulf %113, %116 : vector<128x128xf32>
    %cst_111 = arith.constant dense<0.000000e+00> : vector<128xf32>
    %118 = vector.multi_reduction <add>, %117, %cst_111 [0] : vector<128x128xf32> to vector<128xf32>
    %119 = vector.shape_cast %118 : vector<128xf32> to vector<1x128xf32>
    %c0_112 = arith.constant 0 : index
    %c0_113 = arith.constant 0 : index
    %c0_114 = arith.constant 0 : index
    %120 = vector.load %arg5[%c0_112, %c0_113, %c0_114] : memref<1x2x128xf32, #tpu.memory_space<vmem>>, vector<1x1x128xf32>
    %121 = vector.shape_cast %120 : vector<1x1x128xf32> to vector<1x128xf32>
    %122 = vector.shape_cast %119 : vector<1x128xf32> to vector<1x1x128xf32>
    tpu.vector_store %arg5[%c0_112, %c0_113, %c0_114], %122 {strides = array<i32>} : memref<1x2x128xf32, #tpu.memory_space<vmem>>, vector<1x1x128xf32>,
    %123 = arith.mulf %117, %117 : vector<128x128xf32>
    %cst_115 = arith.constant dense<0.000000e+00> : vector<128xf32>
    %124 = vector.multi_reduction <add>, %123, %cst_115 [0] : vector<128x128xf32> to vector<128xf32>
    %125 = vector.shape_cast %124 : vector<128xf32> to vector<1x128xf32>
    %c0_116 = arith.constant 0 : index
    %c1_117 = arith.constant 1 : index
    %c0_118 = arith.constant 0 : index
    %126 = vector.load %arg5[%c0_116, %c1_117, %c0_118] : memref<1x2x128xf32, #tpu.memory_space<vmem>>, vector<1x1x128xf32>
    %127 = vector.shape_cast %126 : vector<1x1x128xf32> to vector<1x128xf32>
    %128 = vector.shape_cast %125 : vector<1x128xf32> to vector<1x1x128xf32>
    tpu.vector_store %arg5[%c0_116, %c1_117, %c0_118], %128 {strides = array<i32>} : memref<1x2x128xf32, #tpu.memory_space<vmem>>, vector<1x1x128xf32>,
    return
  }
  func.func @transform_0(%arg0: i32) -> (i32, i32, i32) {
    %c0_i32 = arith.constant 0 : i32
    %c0_i32_0 = arith.constant 0 : i32
    %c0_i32_1 = arith.constant 0 : i32
    return %arg0, %c0_i32, %c0_i32_0 : i32, i32, i32
  }
  func.func @transform_1(%arg0: i32) -> (i32, i32, i32) {
    %c0_i32 = arith.constant 0 : i32
    %c0_i32_0 = arith.constant 0 : i32
    %c0_i32_1 = arith.constant 0 : i32
    %c0_i32_2 = arith.constant 0 : i32
    return %c0_i32, %c0_i32_0, %c0_i32_1 : i32, i32, i32
  }
  func.func @transform_2(%arg0: i32) -> (i32, i32, i32) {
    %c0_i32 = arith.constant 0 : i32
    %c0_i32_0 = arith.constant 0 : i32
    %c0_i32_1 = arith.constant 0 : i32
    return %arg0, %c0_i32, %c0_i32_0 : i32, i32, i32
  }
  func.func @transform_3(%arg0: i32) -> (i32, i32, i32) {
    %c0_i32 = arith.constant 0 : i32
    %c0_i32_0 = arith.constant 0 : i32
    %c0_i32_1 = arith.constant 0 : i32
    return %arg0, %c0_i32, %c0_i32_0 : i32, i32, i32
  }
  func.func @transform_4(%arg0: i32) -> (i32, i32, i32) {
    %c0_i32 = arith.constant 0 : i32
    %c0_i32_0 = arith.constant 0 : i32
    %c0_i32_1 = arith.constant 0 : i32
    return %arg0, %c0_i32, %c0_i32_0 : i32, i32, i32
  }
}

module attributes {stable_mosaic.version = 11 : i64} {
  func.func @_bn_relu_kernel(%arg0: i32, %arg1: memref<1x128x128xf32, #tpu.memory_space<vmem>>, %arg2: memref<1x128xf32, #tpu.memory_space<vmem>>, %arg3: memref<1x128xf32, #tpu.memory_space<vmem>>, %arg4: memref<1x128x128xf32, #tpu.memory_space<vmem>>) attributes {dimension_semantics = [#tpu.dimension_semantics<parallel>], iteration_bounds = array<i64: 6>, scalar_prefetch = 0 : i64, scratch_operands = 0 : i64, tpu.core_type = #tpu.core_type<tc>, window_params = [{transform_indices = @transform_0, window_bounds = array<i64: 1, 128, 128>}, {pipeline_mode = #tpu.pipeline_mode<synchronous>, transform_indices = @transform_1, window_bounds = array<i64: 1, 128>}, {pipeline_mode = #tpu.pipeline_mode<synchronous>, transform_indices = @transform_2, window_bounds = array<i64: 1, 128>}, {transform_indices = @transform_3, window_bounds = array<i64: 1, 128, 128>}]} {
    %c0 = arith.constant 0 : index
    %c0_0 = arith.constant 0 : index
    %c0_1 = arith.constant 0 : index
    %0 = vector.load %arg1[%c0, %c0_0, %c0_1] : memref<1x128x128xf32, #tpu.memory_space<vmem>>, vector<1x128x128xf32>
    %c0_2 = arith.constant 0 : index
    %c0_3 = arith.constant 0 : index
    %1 = vector.load %arg2[%c0_2, %c0_3] : memref<1x128xf32, #tpu.memory_space<vmem>>, vector<1x128xf32>
    %2 = vector.shape_cast %1 : vector<1x128xf32> to vector<1x1x128xf32>
    %3 = vector.broadcast %2 : vector<1x1x128xf32> to vector<1x128x128xf32>
    %4 = arith.mulf %0, %3 : vector<1x128x128xf32>
    %c0_4 = arith.constant 0 : index
    %c0_5 = arith.constant 0 : index
    %5 = vector.load %arg3[%c0_4, %c0_5] : memref<1x128xf32, #tpu.memory_space<vmem>>, vector<1x128xf32>
    %6 = vector.shape_cast %5 : vector<1x128xf32> to vector<1x1x128xf32>
    %7 = vector.broadcast %6 : vector<1x1x128xf32> to vector<1x128x128xf32>
    %8 = arith.addf %4, %7 : vector<1x128x128xf32>
    %cst = arith.constant 0.000000e+00 : f32
    %9 = vector.broadcast %cst : f32 to vector<1x128x128xf32>
    %10 = arith.maximumf %8, %9 : vector<1x128x128xf32>
    %c0_6 = arith.constant 0 : index
    %c0_7 = arith.constant 0 : index
    %c0_8 = arith.constant 0 : index
    %11 = vector.load %arg4[%c0_6, %c0_7, %c0_8] : memref<1x128x128xf32, #tpu.memory_space<vmem>>, vector<1x128x128xf32>
    tpu.vector_store %arg4[%c0_6, %c0_7, %c0_8], %10 {strides = array<i32>} : memref<1x128x128xf32, #tpu.memory_space<vmem>>, vector<1x128x128xf32>,
    return
  }
  func.func @transform_0(%arg0: i32) -> (i32, i32, i32) {
    %c0_i32 = arith.constant 0 : i32
    %c0_i32_0 = arith.constant 0 : i32
    %c0_i32_1 = arith.constant 0 : i32
    return %arg0, %c0_i32, %c0_i32_0 : i32, i32, i32
  }
  func.func @transform_1(%arg0: i32) -> (i32, i32) {
    %c0_i32 = arith.constant 0 : i32
    %c0_i32_0 = arith.constant 0 : i32
    %c0_i32_1 = arith.constant 0 : i32
    return %c0_i32, %c0_i32_0 : i32, i32
  }
  func.func @transform_2(%arg0: i32) -> (i32, i32) {
    %c0_i32 = arith.constant 0 : i32
    %c0_i32_0 = arith.constant 0 : i32
    %c0_i32_1 = arith.constant 0 : i32
    return %c0_i32, %c0_i32_0 : i32, i32
  }
  func.func @transform_3(%arg0: i32) -> (i32, i32, i32) {
    %c0_i32 = arith.constant 0 : i32
    %c0_i32_0 = arith.constant 0 : i32
    %c0_i32_1 = arith.constant 0 : i32
    return %arg0, %c0_i32, %c0_i32_0 : i32, i32, i32
  }
}

module attributes {stable_mosaic.version = 11 : i64} {
  func.func @_conv3x3_stats_kernel(%arg0: i32, %arg1: memref<1x166x8xf32, #tpu.memory_space<vmem>>, %arg2: memref<9x8x128xbf16, #tpu.memory_space<vmem>>, %arg3: memref<1x128x1xf32, #tpu.memory_space<vmem>>, %arg4: memref<1x128x128xf32, #tpu.memory_space<vmem>>, %arg5: memref<1x2x128xf32, #tpu.memory_space<vmem>>) attributes {dimension_semantics = [#tpu.dimension_semantics<parallel>], iteration_bounds = array<i64: 6>, scalar_prefetch = 0 : i64, scratch_operands = 0 : i64, tpu.core_type = #tpu.core_type<tc>, window_params = [{transform_indices = @transform_0, window_bounds = array<i64: 1, 166, 8>}, {pipeline_mode = #tpu.pipeline_mode<synchronous>, transform_indices = @transform_1, window_bounds = array<i64: 9, 8, 128>}, {transform_indices = @transform_2, window_bounds = array<i64: 1, 128, 1>}, {transform_indices = @transform_3, window_bounds = array<i64: 1, 128, 128>}, {transform_indices = @transform_4, window_bounds = array<i64: 1, 2, 128>}]} {
    %cst = arith.constant 0.000000e+00 : f32
    %0 = vector.broadcast %cst : f32 to vector<128x128xf32>
    %c0 = arith.constant 0 : index
    %c0_0 = arith.constant 0 : index
    %c0_1 = arith.constant 0 : index
    %1 = vector.load %arg4[%c0, %c0_0, %c0_1] : memref<1x128x128xf32, #tpu.memory_space<vmem>>, vector<1x128x128xf32>
    %2 = vector.shape_cast %1 : vector<1x128x128xf32> to vector<128x128xf32>
    %3 = vector.shape_cast %0 : vector<128x128xf32> to vector<1x128x128xf32>
    tpu.vector_store %arg4[%c0, %c0_0, %c0_1], %3 {strides = array<i32>} : memref<1x128x128xf32, #tpu.memory_space<vmem>>, vector<1x128x128xf32>,
    %c0_2 = arith.constant 0 : index
    %c0_3 = arith.constant 0 : index
    %c0_4 = arith.constant 0 : index
    %4 = vector.load %arg1[%c0_2, %c0_3, %c0_4] : memref<1x166x8xf32, #tpu.memory_space<vmem>>, vector<1x128x8xf32>
    %5 = vector.shape_cast %4 : vector<1x128x8xf32> to vector<128x8xf32>
    %6 = arith.truncf %5 : vector<128x8xf32> to vector<128x8xbf16>
    %c0_5 = arith.constant 0 : index
    %c0_6 = arith.constant 0 : index
    %c0_7 = arith.constant 0 : index
    %7 = vector.load %arg4[%c0_5, %c0_6, %c0_7] : memref<1x128x128xf32, #tpu.memory_space<vmem>>, vector<1x128x128xf32>
    %8 = vector.shape_cast %7 : vector<1x128x128xf32> to vector<128x128xf32>
    %c0_8 = arith.constant 0 : index
    %c0_9 = arith.constant 0 : index
    %c0_10 = arith.constant 0 : index
    %9 = vector.load %arg2[%c0_8, %c0_9, %c0_10] : memref<9x8x128xbf16, #tpu.memory_space<vmem>>, vector<1x8x128xbf16>
    %10 = vector.shape_cast %9 : vector<1x8x128xbf16> to vector<8x128xbf16>
    %cst_11 = arith.constant dense<0.000000e+00> : vector<128x128xf32>
    %11 = tpu.matmul %6, %10, %cst_11 {dimension_numbers = #tpu.dot_dimension_numbers<[1], [0], [0], [1], [0, 0, 1, 1], [], []>} : vector<128x8xbf16>, vector<8x128xbf16>, vector<128x128xf32> -> vector<128x128xf32>
    %12 = arith.addf %8, %11 : vector<128x128xf32>
    %c0_12 = arith.constant 0 : index
    %c0_13 = arith.constant 0 : index
    %c0_14 = arith.constant 0 : index
    %13 = vector.load %arg4[%c0_12, %c0_13, %c0_14] : memref<1x128x128xf32, #tpu.memory_space<vmem>>, vector<1x128x128xf32>
    %14 = vector.shape_cast %13 : vector<1x128x128xf32> to vector<128x128xf32>
    %15 = vector.shape_cast %12 : vector<128x128xf32> to vector<1x128x128xf32>
    tpu.vector_store %arg4[%c0_12, %c0_13, %c0_14], %15 {strides = array<i32>} : memref<1x128x128xf32, #tpu.memory_space<vmem>>, vector<1x128x128xf32>,
    %c0_15 = arith.constant 0 : index
    %c1 = arith.constant 1 : index
    %c0_16 = arith.constant 0 : index
    %16 = vector.load %arg1[%c0_15, %c1, %c0_16] : memref<1x166x8xf32, #tpu.memory_space<vmem>>, vector<1x128x8xf32>
    %17 = vector.shape_cast %16 : vector<1x128x8xf32> to vector<128x8xf32>
    %18 = arith.truncf %17 : vector<128x8xf32> to vector<128x8xbf16>
    %c0_17 = arith.constant 0 : index
    %c0_18 = arith.constant 0 : index
    %c0_19 = arith.constant 0 : index
    %19 = vector.load %arg4[%c0_17, %c0_18, %c0_19] : memref<1x128x128xf32, #tpu.memory_space<vmem>>, vector<1x128x128xf32>
    %20 = vector.shape_cast %19 : vector<1x128x128xf32> to vector<128x128xf32>
    %c1_20 = arith.constant 1 : index
    %c0_21 = arith.constant 0 : index
    %c0_22 = arith.constant 0 : index
    %21 = vector.load %arg2[%c1_20, %c0_21, %c0_22] : memref<9x8x128xbf16, #tpu.memory_space<vmem>>, vector<1x8x128xbf16>
    %22 = vector.shape_cast %21 : vector<1x8x128xbf16> to vector<8x128xbf16>
    %cst_23 = arith.constant dense<0.000000e+00> : vector<128x128xf32>
    %23 = tpu.matmul %18, %22, %cst_23 {dimension_numbers = #tpu.dot_dimension_numbers<[1], [0], [0], [1], [0, 0, 1, 1], [], []>} : vector<128x8xbf16>, vector<8x128xbf16>, vector<128x128xf32> -> vector<128x128xf32>
    %24 = arith.addf %20, %23 : vector<128x128xf32>
    %c0_24 = arith.constant 0 : index
    %c0_25 = arith.constant 0 : index
    %c0_26 = arith.constant 0 : index
    %25 = vector.load %arg4[%c0_24, %c0_25, %c0_26] : memref<1x128x128xf32, #tpu.memory_space<vmem>>, vector<1x128x128xf32>
    %26 = vector.shape_cast %25 : vector<1x128x128xf32> to vector<128x128xf32>
    %27 = vector.shape_cast %24 : vector<128x128xf32> to vector<1x128x128xf32>
    tpu.vector_store %arg4[%c0_24, %c0_25, %c0_26], %27 {strides = array<i32>} : memref<1x128x128xf32, #tpu.memory_space<vmem>>, vector<1x128x128xf32>,
    %c0_27 = arith.constant 0 : index
    %c2 = arith.constant 2 : index
    %c0_28 = arith.constant 0 : index
    %28 = vector.load %arg1[%c0_27, %c2, %c0_28] : memref<1x166x8xf32, #tpu.memory_space<vmem>>, vector<1x128x8xf32>
    %29 = vector.shape_cast %28 : vector<1x128x8xf32> to vector<128x8xf32>
    %30 = arith.truncf %29 : vector<128x8xf32> to vector<128x8xbf16>
    %c0_29 = arith.constant 0 : index
    %c0_30 = arith.constant 0 : index
    %c0_31 = arith.constant 0 : index
    %31 = vector.load %arg4[%c0_29, %c0_30, %c0_31] : memref<1x128x128xf32, #tpu.memory_space<vmem>>, vector<1x128x128xf32>
    %32 = vector.shape_cast %31 : vector<1x128x128xf32> to vector<128x128xf32>
    %c2_32 = arith.constant 2 : index
    %c0_33 = arith.constant 0 : index
    %c0_34 = arith.constant 0 : index
    %33 = vector.load %arg2[%c2_32, %c0_33, %c0_34] : memref<9x8x128xbf16, #tpu.memory_space<vmem>>, vector<1x8x128xbf16>
    %34 = vector.shape_cast %33 : vector<1x8x128xbf16> to vector<8x128xbf16>
    %cst_35 = arith.constant dense<0.000000e+00> : vector<128x128xf32>
    %35 = tpu.matmul %30, %34, %cst_35 {dimension_numbers = #tpu.dot_dimension_numbers<[1], [0], [0], [1], [0, 0, 1, 1], [], []>} : vector<128x8xbf16>, vector<8x128xbf16>, vector<128x128xf32> -> vector<128x128xf32>
    %36 = arith.addf %32, %35 : vector<128x128xf32>
    %c0_36 = arith.constant 0 : index
    %c0_37 = arith.constant 0 : index
    %c0_38 = arith.constant 0 : index
    %37 = vector.load %arg4[%c0_36, %c0_37, %c0_38] : memref<1x128x128xf32, #tpu.memory_space<vmem>>, vector<1x128x128xf32>
    %38 = vector.shape_cast %37 : vector<1x128x128xf32> to vector<128x128xf32>
    %39 = vector.shape_cast %36 : vector<128x128xf32> to vector<1x128x128xf32>
    tpu.vector_store %arg4[%c0_36, %c0_37, %c0_38], %39 {strides = array<i32>} : memref<1x128x128xf32, #tpu.memory_space<vmem>>, vector<1x128x128xf32>,
    %c0_39 = arith.constant 0 : index
    %c18 = arith.constant 18 : index
    %c0_40 = arith.constant 0 : index
    %40 = vector.load %arg1[%c0_39, %c18, %c0_40] : memref<1x166x8xf32, #tpu.memory_space<vmem>>, vector<1x128x8xf32>
    %41 = vector.shape_cast %40 : vector<1x128x8xf32> to vector<128x8xf32>
    %42 = arith.truncf %41 : vector<128x8xf32> to vector<128x8xbf16>
    %c0_41 = arith.constant 0 : index
    %c0_42 = arith.constant 0 : index
    %c0_43 = arith.constant 0 : index
    %43 = vector.load %arg4[%c0_41, %c0_42, %c0_43] : memref<1x128x128xf32, #tpu.memory_space<vmem>>, vector<1x128x128xf32>
    %44 = vector.shape_cast %43 : vector<1x128x128xf32> to vector<128x128xf32>
    %c3 = arith.constant 3 : index
    %c0_44 = arith.constant 0 : index
    %c0_45 = arith.constant 0 : index
    %45 = vector.load %arg2[%c3, %c0_44, %c0_45] : memref<9x8x128xbf16, #tpu.memory_space<vmem>>, vector<1x8x128xbf16>
    %46 = vector.shape_cast %45 : vector<1x8x128xbf16> to vector<8x128xbf16>
    %cst_46 = arith.constant dense<0.000000e+00> : vector<128x128xf32>
    %47 = tpu.matmul %42, %46, %cst_46 {dimension_numbers = #tpu.dot_dimension_numbers<[1], [0], [0], [1], [0, 0, 1, 1], [], []>} : vector<128x8xbf16>, vector<8x128xbf16>, vector<128x128xf32> -> vector<128x128xf32>
    %48 = arith.addf %44, %47 : vector<128x128xf32>
    %c0_47 = arith.constant 0 : index
    %c0_48 = arith.constant 0 : index
    %c0_49 = arith.constant 0 : index
    %49 = vector.load %arg4[%c0_47, %c0_48, %c0_49] : memref<1x128x128xf32, #tpu.memory_space<vmem>>, vector<1x128x128xf32>
    %50 = vector.shape_cast %49 : vector<1x128x128xf32> to vector<128x128xf32>
    %51 = vector.shape_cast %48 : vector<128x128xf32> to vector<1x128x128xf32>
    tpu.vector_store %arg4[%c0_47, %c0_48, %c0_49], %51 {strides = array<i32>} : memref<1x128x128xf32, #tpu.memory_space<vmem>>, vector<1x128x128xf32>,
    %c0_50 = arith.constant 0 : index
    %c19 = arith.constant 19 : index
    %c0_51 = arith.constant 0 : index
    %52 = vector.load %arg1[%c0_50, %c19, %c0_51] : memref<1x166x8xf32, #tpu.memory_space<vmem>>, vector<1x128x8xf32>
    %53 = vector.shape_cast %52 : vector<1x128x8xf32> to vector<128x8xf32>
    %54 = arith.truncf %53 : vector<128x8xf32> to vector<128x8xbf16>
    %c0_52 = arith.constant 0 : index
    %c0_53 = arith.constant 0 : index
    %c0_54 = arith.constant 0 : index
    %55 = vector.load %arg4[%c0_52, %c0_53, %c0_54] : memref<1x128x128xf32, #tpu.memory_space<vmem>>, vector<1x128x128xf32>
    %56 = vector.shape_cast %55 : vector<1x128x128xf32> to vector<128x128xf32>
    %c4 = arith.constant 4 : index
    %c0_55 = arith.constant 0 : index
    %c0_56 = arith.constant 0 : index
    %57 = vector.load %arg2[%c4, %c0_55, %c0_56] : memref<9x8x128xbf16, #tpu.memory_space<vmem>>, vector<1x8x128xbf16>
    %58 = vector.shape_cast %57 : vector<1x8x128xbf16> to vector<8x128xbf16>
    %cst_57 = arith.constant dense<0.000000e+00> : vector<128x128xf32>
    %59 = tpu.matmul %54, %58, %cst_57 {dimension_numbers = #tpu.dot_dimension_numbers<[1], [0], [0], [1], [0, 0, 1, 1], [], []>} : vector<128x8xbf16>, vector<8x128xbf16>, vector<128x128xf32> -> vector<128x128xf32>
    %60 = arith.addf %56, %59 : vector<128x128xf32>
    %c0_58 = arith.constant 0 : index
    %c0_59 = arith.constant 0 : index
    %c0_60 = arith.constant 0 : index
    %61 = vector.load %arg4[%c0_58, %c0_59, %c0_60] : memref<1x128x128xf32, #tpu.memory_space<vmem>>, vector<1x128x128xf32>
    %62 = vector.shape_cast %61 : vector<1x128x128xf32> to vector<128x128xf32>
    %63 = vector.shape_cast %60 : vector<128x128xf32> to vector<1x128x128xf32>
    tpu.vector_store %arg4[%c0_58, %c0_59, %c0_60], %63 {strides = array<i32>} : memref<1x128x128xf32, #tpu.memory_space<vmem>>, vector<1x128x128xf32>,
    %c0_61 = arith.constant 0 : index
    %c20 = arith.constant 20 : index
    %c0_62 = arith.constant 0 : index
    %64 = vector.load %arg1[%c0_61, %c20, %c0_62] : memref<1x166x8xf32, #tpu.memory_space<vmem>>, vector<1x128x8xf32>
    %65 = vector.shape_cast %64 : vector<1x128x8xf32> to vector<128x8xf32>
    %66 = arith.truncf %65 : vector<128x8xf32> to vector<128x8xbf16>
    %c0_63 = arith.constant 0 : index
    %c0_64 = arith.constant 0 : index
    %c0_65 = arith.constant 0 : index
    %67 = vector.load %arg4[%c0_63, %c0_64, %c0_65] : memref<1x128x128xf32, #tpu.memory_space<vmem>>, vector<1x128x128xf32>
    %68 = vector.shape_cast %67 : vector<1x128x128xf32> to vector<128x128xf32>
    %c5 = arith.constant 5 : index
    %c0_66 = arith.constant 0 : index
    %c0_67 = arith.constant 0 : index
    %69 = vector.load %arg2[%c5, %c0_66, %c0_67] : memref<9x8x128xbf16, #tpu.memory_space<vmem>>, vector<1x8x128xbf16>
    %70 = vector.shape_cast %69 : vector<1x8x128xbf16> to vector<8x128xbf16>
    %cst_68 = arith.constant dense<0.000000e+00> : vector<128x128xf32>
    %71 = tpu.matmul %66, %70, %cst_68 {dimension_numbers = #tpu.dot_dimension_numbers<[1], [0], [0], [1], [0, 0, 1, 1], [], []>} : vector<128x8xbf16>, vector<8x128xbf16>, vector<128x128xf32> -> vector<128x128xf32>
    %72 = arith.addf %68, %71 : vector<128x128xf32>
    %c0_69 = arith.constant 0 : index
    %c0_70 = arith.constant 0 : index
    %c0_71 = arith.constant 0 : index
    %73 = vector.load %arg4[%c0_69, %c0_70, %c0_71] : memref<1x128x128xf32, #tpu.memory_space<vmem>>, vector<1x128x128xf32>
    %74 = vector.shape_cast %73 : vector<1x128x128xf32> to vector<128x128xf32>
    %75 = vector.shape_cast %72 : vector<128x128xf32> to vector<1x128x128xf32>
    tpu.vector_store %arg4[%c0_69, %c0_70, %c0_71], %75 {strides = array<i32>} : memref<1x128x128xf32, #tpu.memory_space<vmem>>, vector<1x128x128xf32>,
    %c0_72 = arith.constant 0 : index
    %c36 = arith.constant 36 : index
    %c0_73 = arith.constant 0 : index
    %76 = vector.load %arg1[%c0_72, %c36, %c0_73] : memref<1x166x8xf32, #tpu.memory_space<vmem>>, vector<1x128x8xf32>
    %77 = vector.shape_cast %76 : vector<1x128x8xf32> to vector<128x8xf32>
    %78 = arith.truncf %77 : vector<128x8xf32> to vector<128x8xbf16>
    %c0_74 = arith.constant 0 : index
    %c0_75 = arith.constant 0 : index
    %c0_76 = arith.constant 0 : index
    %79 = vector.load %arg4[%c0_74, %c0_75, %c0_76] : memref<1x128x128xf32, #tpu.memory_space<vmem>>, vector<1x128x128xf32>
    %80 = vector.shape_cast %79 : vector<1x128x128xf32> to vector<128x128xf32>
    %c6 = arith.constant 6 : index
    %c0_77 = arith.constant 0 : index
    %c0_78 = arith.constant 0 : index
    %81 = vector.load %arg2[%c6, %c0_77, %c0_78] : memref<9x8x128xbf16, #tpu.memory_space<vmem>>, vector<1x8x128xbf16>
    %82 = vector.shape_cast %81 : vector<1x8x128xbf16> to vector<8x128xbf16>
    %cst_79 = arith.constant dense<0.000000e+00> : vector<128x128xf32>
    %83 = tpu.matmul %78, %82, %cst_79 {dimension_numbers = #tpu.dot_dimension_numbers<[1], [0], [0], [1], [0, 0, 1, 1], [], []>} : vector<128x8xbf16>, vector<8x128xbf16>, vector<128x128xf32> -> vector<128x128xf32>
    %84 = arith.addf %80, %83 : vector<128x128xf32>
    %c0_80 = arith.constant 0 : index
    %c0_81 = arith.constant 0 : index
    %c0_82 = arith.constant 0 : index
    %85 = vector.load %arg4[%c0_80, %c0_81, %c0_82] : memref<1x128x128xf32, #tpu.memory_space<vmem>>, vector<1x128x128xf32>
    %86 = vector.shape_cast %85 : vector<1x128x128xf32> to vector<128x128xf32>
    %87 = vector.shape_cast %84 : vector<128x128xf32> to vector<1x128x128xf32>
    tpu.vector_store %arg4[%c0_80, %c0_81, %c0_82], %87 {strides = array<i32>} : memref<1x128x128xf32, #tpu.memory_space<vmem>>, vector<1x128x128xf32>,
    %c0_83 = arith.constant 0 : index
    %c37 = arith.constant 37 : index
    %c0_84 = arith.constant 0 : index
    %88 = vector.load %arg1[%c0_83, %c37, %c0_84] : memref<1x166x8xf32, #tpu.memory_space<vmem>>, vector<1x128x8xf32>
    %89 = vector.shape_cast %88 : vector<1x128x8xf32> to vector<128x8xf32>
    %90 = arith.truncf %89 : vector<128x8xf32> to vector<128x8xbf16>
    %c0_85 = arith.constant 0 : index
    %c0_86 = arith.constant 0 : index
    %c0_87 = arith.constant 0 : index
    %91 = vector.load %arg4[%c0_85, %c0_86, %c0_87] : memref<1x128x128xf32, #tpu.memory_space<vmem>>, vector<1x128x128xf32>
    %92 = vector.shape_cast %91 : vector<1x128x128xf32> to vector<128x128xf32>
    %c7 = arith.constant 7 : index
    %c0_88 = arith.constant 0 : index
    %c0_89 = arith.constant 0 : index
    %93 = vector.load %arg2[%c7, %c0_88, %c0_89] : memref<9x8x128xbf16, #tpu.memory_space<vmem>>, vector<1x8x128xbf16>
    %94 = vector.shape_cast %93 : vector<1x8x128xbf16> to vector<8x128xbf16>
    %cst_90 = arith.constant dense<0.000000e+00> : vector<128x128xf32>
    %95 = tpu.matmul %90, %94, %cst_90 {dimension_numbers = #tpu.dot_dimension_numbers<[1], [0], [0], [1], [0, 0, 1, 1], [], []>} : vector<128x8xbf16>, vector<8x128xbf16>, vector<128x128xf32> -> vector<128x128xf32>
    %96 = arith.addf %92, %95 : vector<128x128xf32>
    %c0_91 = arith.constant 0 : index
    %c0_92 = arith.constant 0 : index
    %c0_93 = arith.constant 0 : index
    %97 = vector.load %arg4[%c0_91, %c0_92, %c0_93] : memref<1x128x128xf32, #tpu.memory_space<vmem>>, vector<1x128x128xf32>
    %98 = vector.shape_cast %97 : vector<1x128x128xf32> to vector<128x128xf32>
    %99 = vector.shape_cast %96 : vector<128x128xf32> to vector<1x128x128xf32>
    tpu.vector_store %arg4[%c0_91, %c0_92, %c0_93], %99 {strides = array<i32>} : memref<1x128x128xf32, #tpu.memory_space<vmem>>, vector<1x128x128xf32>,
    %c0_94 = arith.constant 0 : index
    %c38 = arith.constant 38 : index
    %c0_95 = arith.constant 0 : index
    %100 = vector.load %arg1[%c0_94, %c38, %c0_95] : memref<1x166x8xf32, #tpu.memory_space<vmem>>, vector<1x128x8xf32>
    %101 = vector.shape_cast %100 : vector<1x128x8xf32> to vector<128x8xf32>
    %102 = arith.truncf %101 : vector<128x8xf32> to vector<128x8xbf16>
    %c0_96 = arith.constant 0 : index
    %c0_97 = arith.constant 0 : index
    %c0_98 = arith.constant 0 : index
    %103 = vector.load %arg4[%c0_96, %c0_97, %c0_98] : memref<1x128x128xf32, #tpu.memory_space<vmem>>, vector<1x128x128xf32>
    %104 = vector.shape_cast %103 : vector<1x128x128xf32> to vector<128x128xf32>
    %c8 = arith.constant 8 : index
    %c0_99 = arith.constant 0 : index
    %c0_100 = arith.constant 0 : index
    %105 = vector.load %arg2[%c8, %c0_99, %c0_100] : memref<9x8x128xbf16, #tpu.memory_space<vmem>>, vector<1x8x128xbf16>
    %106 = vector.shape_cast %105 : vector<1x8x128xbf16> to vector<8x128xbf16>
    %cst_101 = arith.constant dense<0.000000e+00> : vector<128x128xf32>
    %107 = tpu.matmul %102, %106, %cst_101 {dimension_numbers = #tpu.dot_dimension_numbers<[1], [0], [0], [1], [0, 0, 1, 1], [], []>} : vector<128x8xbf16>, vector<8x128xbf16>, vector<128x128xf32> -> vector<128x128xf32>
    %108 = arith.addf %104, %107 : vector<128x128xf32>
    %c0_102 = arith.constant 0 : index
    %c0_103 = arith.constant 0 : index
    %c0_104 = arith.constant 0 : index
    %109 = vector.load %arg4[%c0_102, %c0_103, %c0_104] : memref<1x128x128xf32, #tpu.memory_space<vmem>>, vector<1x128x128xf32>
    %110 = vector.shape_cast %109 : vector<1x128x128xf32> to vector<128x128xf32>
    %111 = vector.shape_cast %108 : vector<128x128xf32> to vector<1x128x128xf32>
    tpu.vector_store %arg4[%c0_102, %c0_103, %c0_104], %111 {strides = array<i32>} : memref<1x128x128xf32, #tpu.memory_space<vmem>>, vector<1x128x128xf32>,
    %c0_105 = arith.constant 0 : index
    %c0_106 = arith.constant 0 : index
    %c0_107 = arith.constant 0 : index
    %112 = vector.load %arg4[%c0_105, %c0_106, %c0_107] : memref<1x128x128xf32, #tpu.memory_space<vmem>>, vector<1x128x128xf32>
    %113 = vector.shape_cast %112 : vector<1x128x128xf32> to vector<128x128xf32>
    %c0_108 = arith.constant 0 : index
    %c0_109 = arith.constant 0 : index
    %c0_110 = arith.constant 0 : index
    %114 = vector.load %arg3[%c0_108, %c0_109, %c0_110] : memref<1x128x1xf32, #tpu.memory_space<vmem>>, vector<1x128x1xf32>
    %115 = vector.shape_cast %114 : vector<1x128x1xf32> to vector<128x1xf32>
    %116 = vector.broadcast %115 : vector<128x1xf32> to vector<128x128xf32>
    %117 = arith.mulf %113, %116 : vector<128x128xf32>
    %cst_111 = arith.constant dense<0.000000e+00> : vector<128xf32>
    %118 = vector.multi_reduction <add>, %117, %cst_111 [0] : vector<128x128xf32> to vector<128xf32>
    %119 = vector.shape_cast %118 : vector<128xf32> to vector<1x128xf32>
    %c0_112 = arith.constant 0 : index
    %c0_113 = arith.constant 0 : index
    %c0_114 = arith.constant 0 : index
    %120 = vector.load %arg5[%c0_112, %c0_113, %c0_114] : memref<1x2x128xf32, #tpu.memory_space<vmem>>, vector<1x1x128xf32>
    %121 = vector.shape_cast %120 : vector<1x1x128xf32> to vector<1x128xf32>
    %122 = vector.shape_cast %119 : vector<1x128xf32> to vector<1x1x128xf32>
    tpu.vector_store %arg5[%c0_112, %c0_113, %c0_114], %122 {strides = array<i32>} : memref<1x2x128xf32, #tpu.memory_space<vmem>>, vector<1x1x128xf32>,
    %123 = arith.mulf %117, %117 : vector<128x128xf32>
    %cst_115 = arith.constant dense<0.000000e+00> : vector<128xf32>
    %124 = vector.multi_reduction <add>, %123, %cst_115 [0] : vector<128x128xf32> to vector<128xf32>
    %125 = vector.shape_cast %124 : vector<128xf32> to vector<1x128xf32>
    %c0_116 = arith.constant 0 : index
    %c1_117 = arith.constant 1 : index
    %c0_118 = arith.constant 0 : index
    %126 = vector.load %arg5[%c0_116, %c1_117, %c0_118] : memref<1x2x128xf32, #tpu.memory_space<vmem>>, vector<1x1x128xf32>
    %127 = vector.shape_cast %126 : vector<1x1x128xf32> to vector<1x128xf32>
    %128 = vector.shape_cast %125 : vector<1x128xf32> to vector<1x1x128xf32>
    tpu.vector_store %arg5[%c0_116, %c1_117, %c0_118], %128 {strides = array<i32>} : memref<1x2x128xf32, #tpu.memory_space<vmem>>, vector<1x1x128xf32>,
    return
  }
  func.func @transform_0(%arg0: i32) -> (i32, i32, i32) {
    %c0_i32 = arith.constant 0 : i32
    %c0_i32_0 = arith.constant 0 : i32
    %c0_i32_1 = arith.constant 0 : i32
    return %arg0, %c0_i32, %c0_i32_0 : i32, i32, i32
  }
  func.func @transform_1(%arg0: i32) -> (i32, i32, i32) {
    %c0_i32 = arith.constant 0 : i32
    %c0_i32_0 = arith.constant 0 : i32
    %c0_i32_1 = arith.constant 0 : i32
    %c0_i32_2 = arith.constant 0 : i32
    return %c0_i32, %c0_i32_0, %c0_i32_1 : i32, i32, i32
  }
  func.func @transform_2(%arg0: i32) -> (i32, i32, i32) {
    %c0_i32 = arith.constant 0 : i32
    %c0_i32_0 = arith.constant 0 : i32
    %c0_i32_1 = arith.constant 0 : i32
    return %arg0, %c0_i32, %c0_i32_0 : i32, i32, i32
  }
  func.func @transform_3(%arg0: i32) -> (i32, i32, i32) {
    %c0_i32 = arith.constant 0 : i32
    %c0_i32_0 = arith.constant 0 : i32
    %c0_i32_1 = arith.constant 0 : i32
    return %arg0, %c0_i32, %c0_i32_0 : i32, i32, i32
  }
  func.func @transform_4(%arg0: i32) -> (i32, i32, i32) {
    %c0_i32 = arith.constant 0 : i32
    %c0_i32_0 = arith.constant 0 : i32
    %c0_i32_1 = arith.constant 0 : i32
    return %arg0, %c0_i32, %c0_i32_0 : i32, i32, i32
  }
}

</mosaic_0001>

<bundles_post_ra>
// kernel: convolution_layer.5
= control target key start
LH: loop header
LB: loop body
LE: loop exit
PB: predicated region body
PF: predicated region fallthrough
CT: control target
= control target key end

     0   :  { %s365_s12 = smov 0   ;;  %s442_s0 = inlined_call_operand.vmem [shape: f32[6,128,128], index: 0, kind: input, shape index: {}]   ;;  %s443_s1 = inlined_call_operand.vmem [shape: f32[1,128], index: 1, kind: input, shape index: {}]   ;;  %s444_s2 = inlined_call_operand.vmem [shape: f32[1,128], index: 2, kind: input, shape index: {}]   ;;  %s445_s3 = inlined_call_operand.vmem [shape: f32[6,128,128], index: 3, kind: output, shape index: {}]  }
   0x1 LB: > { %s314_s13 = sadd.s32 4294967295, %s343_s12   ;;  %p318_p0 = scmp.ge.s32.totalorder %s343_s12, 1  ;;  %s343_s12 = sphi %s365_s12, %s13_s12  }
   0x2   : > { %p137_p1 = scmp.lt.s32.totalorder %s343_s12, 7 }
   0x4   : > { %p138_p2 = pnand %p318_p0, %p137_p1 }
   0x5   : > { %p161_p3 = scmp.lt.s32.totalorder (!%p138_p2), %s314_s13, 5 }
   0x6   : > { %141 = sbr.rel (%p138_p2) target bundleno = 37 (0x25), region = 32 }
   0xb   : > { %s447_s13 = smov (!%p161_p3, %s314_s13), 5  ;;  %v335_v0 = vld [vmem:[%s443_s1] ss:$0 sm:$0xff] }
   0xc   : > { %s325_s16 = sshll.u32 %s447_s13, 7  ;;  %v384_v1 = vld [vmem:[%s444_s2] ss:$0 sm:$0xff] }
   0xd   : > { %s379_s19 = scalar_lea.vmem %s442_s0, %s325_s16  ;;  %s400_s24 = scalar_lea.vmem %s445_s3, %s325_s16 }
   0xe   : > { %v171_v2 = vld [vmem:[%s379_s19] sm:$0xff]  ;;  %v172_v3 = vld [vmem:[%s379_s19 + $0x8] sm:$0xff]  ;;  %v173_v4 = vld [vmem:[%s379_s19 + $0x10] sm:$0xff] }
   0xf   : > { %v191_v5 = vmul.f32 %v335_v0, %v171_v2  ;;  %v192_v6 = vmul.f32 %v335_v0, %v172_v3  ;;  %v193_v7 = vmul.f32 %v335_v0, %v173_v4  ;;  %v174_v8 = vld [vmem:[%s379_s19 + $0x18] sm:$0xff]  ;;  %v175_v9 = vld [vmem:[%s379_s19 + $0x20] sm:$0xff]  ;;  %v176_v10 = vld [vmem:[%s379_s19 + $0x28] sm:$0xff] }
  0x10   : > { %v194_v11 = vmul.f32 %v335_v0, %v174_v8  ;;  %v195_v12 = vmul.f32 %v335_v0, %v175_v9  ;;  %v196_v13 = vmul.f32 %v335_v0, %v176_v10  ;;  %v177_v14 = vld [vmem:[%s379_s19 + $0x30] sm:$0xff]  ;;  %v178_v15 = vld [vmem:[%s379_s19 + $0x38] sm:$0xff]  ;;  %v179_v24 = vld [vmem:[%s379_s19 + $0x40] sm:$0xff] }
  0x11   : > { %v211_v16 = vadd.f32 %v384_v1, %v191_v5  ;;  %v212_v17 = vadd.f32 %v384_v1, %v192_v6  ;;  %v213_v18 = vadd.f32 %v384_v1, %v193_v7  ;;  %v197_v19 = vmul.f32 %v335_v0, %v177_v14  ;;  %v180_v25 = vld [vmem:[%s379_s19 + $0x48] sm:$0xff]  ;;  %v181_v26 = vld [vmem:[%s379_s19 + $0x50] sm:$0xff]  ;;  %v182_v31 = vld [vmem:[%s379_s19 + $0x58] sm:$0xff] }
  0x12   : > { %v214_v20 = vadd.f32 %v384_v1, %v194_v11  ;;  %v215_v21 = vadd.f32 %v384_v1, %v195_v12  ;;  %v216_v22 = vadd.f32 %v384_v1, %v196_v13  ;;  %v198_v23 = vmul.f32 %v335_v0, %v178_v15  ;;  %v183_v32 = vld [vmem:[%s379_s19 + $0x60] sm:$0xff]  ;;  %v184_v33 = vld [vmem:[%s379_s19 + $0x68] sm:$0xff]  ;;  %v185_v37 = vld [vmem:[%s379_s19 + $0x70] sm:$0xff] }
  0x13   : > { %v227_v27 = vmax.f32 %v211_v16, 0.0  ;;  %v228_v28 = vmax.f32 %v212_v17, 0.0  ;;  %v229_v29 = vmax.f32 %v213_v18, 0.0  ;;  %v217_v30 = vadd.f32 %v384_v1, %v197_v19  ;;  %v186_v42 = vld [vmem:[%s379_s19 + $0x78] sm:$0xff] }
  0x14   : > { %v230_v34 = vmax.f32 %v214_v20, 0.0  ;;  %v231_v35 = vmax.f32 %v215_v21, 0.0  ;;  %v218_v36 = vadd.f32 %v384_v1, %v198_v23  ;;  %v232_v38 = vmax.f32 %v216_v22, 0.0 }
  0x15   : > { %243 = vst [vmem:[%s400_s24] sm:$0xff] %v227_v27  ;;  %v199_v39 = vmul.f32 %v335_v0, %v179_v24  ;;  %v200_v40 = vmul.f32 %v335_v0, %v180_v25  ;;  %v201_v41 = vmul.f32 %v335_v0, %v181_v26  ;;  %v233_v43 = vmax.f32 %v217_v30, 0.0 }
  0x16   : > { %244 = vst [vmem:[%s400_s24 + $0x8] sm:$0xff] %v228_v28  ;;  %v202_v44 = vmul.f32 %v335_v0, %v182_v31  ;;  %v203_v45 = vmul.f32 %v335_v0, %v183_v32  ;;  %v204_v46 = vmul.f32 %v335_v0, %v184_v33  ;;  %v205_v50 = vmul.f32 %v335_v0, %v185_v37 }
  0x17   : > { %245 = vst [vmem:[%s400_s24 + $0x10] sm:$0xff] %v229_v29  ;;  %v219_v47 = vadd.f32 %v384_v1, %v199_v39  ;;  %v220_v48 = vadd.f32 %v384_v1, %v200_v40  ;;  %v221_v49 = vadd.f32 %v384_v1, %v201_v41  ;;  %v234_v51 = vmax.f32 %v218_v36, 0.0 }
  0x18   : > { %246 = vst [vmem:[%s400_s24 + $0x18] sm:$0xff] %v230_v34  ;;  %v222_v52 = vadd.f32 %v384_v1, %v202_v44  ;;  %v206_v53 = vmul.f32 %v335_v0, %v186_v42  ;;  %v223_v55 = vadd.f32 %v384_v1, %v203_v45  ;;  %v224_v57 = vadd.f32 %v384_v1, %v204_v46 }
  0x19   : > { %247 = vst [vmem:[%s400_s24 + $0x20] sm:$0xff] %v231_v35  ;;  %v235_v54 = vmax.f32 %v219_v47, 0.0  ;;  %v236_v56 = vmax.f32 %v220_v48, 0.0  ;;  %v237_v58 = vmax.f32 %v221_v49, 0.0  ;;  %v225_v59 = vadd.f32 %v384_v1, %v205_v50 }
  0x1a   : > { %248 = vst [vmem:[%s400_s24 + $0x28] sm:$0xff] %v232_v38  ;;  %v238_v60 = vmax.f32 %v222_v52, 0.0  ;;  %v226_v61 = vadd.f32 %v384_v1, %v206_v53  ;;  %v239_v62 = vmax.f32 %v223_v55, 0.0  ;;  %v240_v63 = vmax.f32 %v224_v57, 0.0 }
  0x1b   : > { %249 = vst [vmem:[%s400_s24 + $0x30] sm:$0xff] %v233_v43  ;;  %v241_v0 = vmax.f32 %v225_v59, 0.0 }
  0x1c   : > { %250 = vst [vmem:[%s400_s24 + $0x38] sm:$0xff] %v234_v51  ;;  %v242_v2 = vmax.f32 %v226_v61, 0.0 }
  0x1d   : > { %251 = vst [vmem:[%s400_s24 + $0x40] sm:$0xff] %v235_v54 }
  0x1e   : > { %252 = vst [vmem:[%s400_s24 + $0x48] sm:$0xff] %v236_v56 }
  0x1f   : > { %253 = vst [vmem:[%s400_s24 + $0x50] sm:$0xff] %v237_v58 }
  0x20   : > { %254 = vst [vmem:[%s400_s24 + $0x58] sm:$0xff] %v238_v60 }
  0x21   : > { %255 = vst [vmem:[%s400_s24 + $0x60] sm:$0xff] %v239_v62 }
  0x22   : > { %256 = vst [vmem:[%s400_s24 + $0x68] sm:$0xff] %v240_v63 }
  0x23   : > { %257 = vst [vmem:[%s400_s24 + $0x70] sm:$0xff] %v241_v0 }
  0x24   : > { %258 = vst [vmem:[%s400_s24 + $0x78] sm:$0xff] %v242_v2 }
  0x25 PF: > { %s13_s12 = sadd.s32 1, %s343_s12  }
  0x26   : > { %p10_p4 = scmp.ge.s32.totalorder %s13_s12, 8  }
  0x28   :  { %12 = sbr.rel (!%p10_p4) target bundleno = 1 (0x1), region = 62 }

// kernel: convolution_layer.4
= control target key start
LH: loop header
LB: loop body
LE: loop exit
PB: predicated region body
PF: predicated region fallthrough
CT: control target
= control target key end

     0   :  { %s2029_s15 = smov 0   ;;  %s2410_s0 = inlined_call_operand.vmem [shape: f32[6,166,4], index: 0, kind: input, shape index: {}]   ;;  %s2411_s1 = inlined_call_operand.vmem [shape: bf16[9,4,128], index: 1, kind: input, shape index: {}]   ;;  %s2412_s2 = inlined_call_operand.vmem [shape: f32[6,128,1], index: 2, kind: input, shape index: {}]   ;;  %s2413_s3 = inlined_call_operand.vmem [shape: f32[6,128,128], index: 3, kind: output, shape index: {0}]   ;;  %s2414_s4 = inlined_call_operand.vmem [shape: f32[6,2,128], index: 4, kind: output, shape index: {1}]  }
   0x1 LB: > { %s1883_s16 = sadd.s32 4294967295, %s2001_s15   ;;  %p1887_p0 = scmp.ge.s32.totalorder %s2001_s15, 1  ;;  %s2001_s15 = sphi %s2029_s15, %s15_s15  }
   0x2   : > { %p175_p1 = scmp.lt.s32.totalorder %s2001_s15, 7 }
   0x4   : > { %p176_p2 = pnand %p1887_p0, %p175_p1 }
   0x5   : > { %p210_p3 = scmp.lt.s32.totalorder (!%p176_p2), %s1883_s16, 5 }
   0x6   : > { %179 = sbr.rel (%p176_p2) target bundleno = 457 (0x1c9), region = 32 }
   0xb   : > { %v286_v0 = vld [vmem:[%s2411_s1] sm:$0x3]  ;;  %vm312_vm0 = vcmask 1041408   ;;  %v1902_v2 = vld [vmem:[%s2411_s1 + $0x2] sm:$0x3]  ;;  %s2416_s16 = smov (!%p210_p3, %s1883_s16), 5 }
   0xc   : > { %v314_v1 = vsel %vm312_vm0, %v286_v0, 0  ;;  %v1911_v3 = vld [vmem:[%s2411_s1 + $0x4] sm:$0x3]  ;;  %v464_v4 = vsel %vm312_vm0, %v1902_v2, 0  ;;  %v1920_v6 = vld [vmem:[%s2411_s1 + $0x6] sm:$0x3] }
   0xd   : > { %1978 = vmatpush.bf16.msra.mxu1 %v314_v1  ;;  %1979 = vmatpush.bf16.msra.mxu2 %v314_v1  ;;  %v614_v5 = vsel %vm312_vm0, %v1911_v3, 0  ;;  %v764_v7 = vsel %vm312_vm0, %v1920_v6, 0  ;;  %v1929_v8 = vld [vmem:[%s2411_s1 + $0x8] sm:$0x3]  ;;  %s1981_s27 = smul.u32 168, %s2416_s16  ;;  %vm287_vm1 = vcmask 31744  }
   0xe   : > { %1980 = vmatpush.bf16.msra.mxu3 %v314_v1  ;;  %v914_v9 = vsel %vm312_vm0, %v1929_v8, 0  ;;  %323 = vmatpush.bf16.msra.mxu0 %v314_v1  ;;  %v1938_v22 = vld [vmem:[%s2411_s1 + $0xa] sm:$0x3]  ;;  %v1947_v23 = vld [vmem:[%s2411_s1 + $0xc] sm:$0x3]  ;;  %s1976_s13 = sshll.u32 %s2416_s16, 7 }
   0xf   : > { %s2063_s30 = scalar_lea.vmem %s2410_s0, %s1981_s27  ;;  %v1064_v24 = vsel %vm312_vm0, %v1938_v22, 0  ;;  %v1214_v25 = vsel %vm312_vm0, %v1947_v23, 0  ;;  %v1956_v26 = vld [vmem:[%s2411_s1 + $0xe] sm:$0x3]  ;;  %v1965_v40 = vld [vmem:[%s2411_s1 + $0x10] sm:$0x3]  ;;  %s2211_s18 = scalar_lea.vmem %s2412_s2, %s1976_s13 }
  0x10   : > { %v250_v10 = vld [vmem:[%s2063_s30 + $0x20] sm:$0xff]  ;;  %v251_v11 = vld [vmem:[%s2063_s30 + $0x28] sm:$0xff]  ;;  %v1364_v27 = vsel %vm312_vm0, %v1956_v26, 0  ;;  %v252_v28 = vld [vmem:[%s2063_s30 + $0x30] sm:$0xff]  ;;  %v1514_v41 = vsel %vm312_vm0, %v1965_v40, 0  ;;  %s2370_s21 = scalar_lea.vmem %s2413_s3, %s1976_s13  ;;  %s1893_s22 = sshll.u32 %s2416_s16, 1 }
  0x11   : > { %473 = vmatpush.bf16.msrb.mxu1 %v464_v4  ;;  %623 = vmatpush.bf16.msrb.mxu2 %v614_v5  ;;  %v254_v12 = vld [vmem:[%s2063_s30 + $0x40] sm:$0xff]  ;;  %v264_v13 = vpack.c.bf16 %v251_v11, %v250_v10  ;;  %v255_v14 = vld [vmem:[%s2063_s30 + $0x48] sm:$0xff]  ;;  %v253_v29 = vld [vmem:[%s2063_s30 + $0x38] sm:$0xff]  ;;  %s228_s25 = scalar_lea.vmem %s2414_s4, %s1893_s22 }
  0x12   : > { %773 = vmatpush.bf16.msrb.mxu3 %v764_v7  ;;  %923 = vmatpush.bf16.msrb.mxu0 %v914_v9  ;;  %v258_v15 = vld [vmem:[%s2063_s30 + $0x60] sm:$0xff]  ;;  %v259_v16 = vld [vmem:[%s2063_s30 + $0x68] sm:$0xff]  ;;  %v266_v17 = vpack.c.bf16 %v255_v14, %v254_v12  ;;  %v256_v30 = vld [vmem:[%s2063_s30 + $0x50] sm:$0xff]  ;;  %v265_v34 = vpack.c.bf16 %v253_v29, %v252_v28 }
  0x13   : > { %v268_v18 = vpack.c.bf16 %v259_v16, %v258_v15  ;;  %1896 = vmatmul.msk.bf16.vlgmr.msra.gmra.mxu1 %vm287_vm1, %v264_v13  ;;  %v246_v19 = vld [vmem:[%s2063_s30] sm:$0xff]  ;;  %v247_v20 = vld [vmem:[%s2063_s30 + $0x8] sm:$0xff]  ;;  %v257_v31 = vld [vmem:[%s2063_s30 + $0x58] sm:$0xff] }
  0x14   : > { %1898 = vmatmul.msk.bf16.vlgmr.msra.gmra.mxu2 %vm287_vm1, %v266_v17  ;;  %v262_v21 = vpack.c.bf16 %v247_v20, %v246_v19  ;;  %v260_v32 = vld [vmem:[%s2063_s30 + $0x70] sm:$0xff]  ;;  %v261_v33 = vld [vmem:[%s2063_s30 + $0x78] sm:$0xff]  ;;  %v267_v37 = vpack.c.bf16 %v257_v31, %v256_v30  ;;  %v397_v42 = vld [vmem:[%s2063_s30 + $0x1] sm:$0xff] }
  0x15   : > { %1900 = vmatmul.msk.bf16.vlgmr.msra.gmra.mxu3 %vm287_vm1, %v268_v18  ;;  %1073 = vmatpush.bf16.msra.mxu1 %v1064_v24  ;;  %v248_v35 = vld [vmem:[%s2063_s30 + $0x10] sm:$0xff]  ;;  %v249_v36 = vld [vmem:[%s2063_s30 + $0x18] sm:$0xff]  ;;  %v269_v38 = vpack.c.bf16 %v261_v33, %v260_v32  ;;  %v547_v44 = vld [vmem:[%s2063_s30 + $0x2] sm:$0xff] }
  0x16   : > { %1894 = vmatmul.msk.bf16.vlgmr.msra.gmra.mxu0 %vm287_vm1, %v262_v21  ;;  %1223 = vmatpush.bf16.msra.mxu2 %v1214_v25  ;;  %v263_v39 = vpack.c.bf16 %v249_v36, %v248_v35  ;;  %v398_v43 = vld [vmem:[%s2063_s30 + $0x9] sm:$0xff]  ;;  %v697_v46 = vld [vmem:[%s2063_s30 + $0x12] sm:$0xff]  ;;  %v698_v47 = vld [vmem:[%s2063_s30 + $0x1a] sm:$0xff] }
  0x17   : > { %1373 = vmatpush.bf16.msra.mxu3 %v1364_v27  ;;  %1523 = vmatpush.bf16.msra.mxu0 %v1514_v41  ;;  %v548_v45 = vld [vmem:[%s2063_s30 + $0xa] sm:$0xff]  ;;  %v413_v48 = vpack.c.bf16 %v398_v43, %v397_v42  ;;  %v847_v49 = vld [vmem:[%s2063_s30 + $0x13] sm:$0xff]  ;;  %v848_v50 = vld [vmem:[%s2063_s30 + $0x1b] sm:$0xff]  ;;  %v713_v52 = vpack.c.bf16 %v698_v47, %v697_v46 }
  0x18   : > { %v563_v51 = vpack.c.bf16 %v548_v45, %v547_v44  ;;  %v863_v53 = vpack.c.bf16 %v848_v50, %v847_v49  ;;  %v399_v54 = vld [vmem:[%s2063_s30 + $0x11] sm:$0xff]  ;;  %v400_v55 = vld [vmem:[%s2063_s30 + $0x19] sm:$0xff]  ;;  %v699_v56 = vld [vmem:[%s2063_s30 + $0x22] sm:$0xff] }
  0x19   : > { %v700_v57 = vld [vmem:[%s2063_s30 + $0x2a] sm:$0xff]  ;;  %v414_v58 = vpack.c.bf16 %v400_v55, %v399_v54  ;;  %v401_v63 = vld [vmem:[%s2063_s30 + $0x21] sm:$0xff]  ;;  %v701_v1 = vld [vmem:[%s2063_s30 + $0x32] sm:$0xff] }
  0x1a   : > { %v849_v59 = vld [vmem:[%s2063_s30 + $0x23] sm:$0xff]  ;;  %v850_v60 = vld [vmem:[%s2063_s30 + $0x2b] sm:$0xff]  ;;  %v714_v61 = vpack.c.bf16 %v700_v57, %v699_v56  ;;  %v702_v2 = vld [vmem:[%s2063_s30 + $0x3a] sm:$0xff] }
  0x1b   : > { %v864_v62 = vpack.c.bf16 %v850_v60, %v849_v59  ;;  %v402_v0 = vld [vmem:[%s2063_s30 + $0x29] sm:$0xff]  ;;  %v851_v4 = vld [vmem:[%s2063_s30 + $0x33] sm:$0xff]  ;;  %v852_v5 = vld [vmem:[%s2063_s30 + $0x3b] sm:$0xff]  ;;  %v715_v6 = vpack.c.bf16 %v702_v2, %v701_v1  ;;  %v2003_v2 = vmov 0  }
  0x1c   : > { %v415_v3 = vpack.c.bf16 %v402_v0, %v401_v63  ;;  %v865_v7 = vpack.c.bf16 %v852_v5, %v851_v4  ;;  %v403_v8 = vld [vmem:[%s2063_s30 + $0x31] sm:$0xff]  ;;  %v404_v9 = vld [vmem:[%s2063_s30 + $0x39] sm:$0xff]  ;;  %v703_v10 = vld [vmem:[%s2063_s30 + $0x42] sm:$0xff]  ;;  %1992 = vset.pattern.permute.xlu0 %v2003_v2  ;;  %1993 = vset.pattern.permute.xlu1 %v2003_v2 }
  0x1d   : > { %v704_v11 = vld [vmem:[%s2063_s30 + $0x4a] sm:$0xff]  ;;  %v416_v12 = vpack.c.bf16 %v404_v9, %v403_v8  ;;  %v405_v17 = vld [vmem:[%s2063_s30 + $0x41] sm:$0xff]  ;;  %v705_v19 = vld [vmem:[%s2063_s30 + $0x52] sm:$0xff]  ;;  %1994 = vset.pattern.permute.xlu2 %v2003_v2 }
  0x1e   : > { %v853_v13 = vld [vmem:[%s2063_s30 + $0x43] sm:$0xff]  ;;  %v854_v14 = vld [vmem:[%s2063_s30 + $0x4b] sm:$0xff]  ;;  %v716_v15 = vpack.c.bf16 %v704_v11, %v703_v10  ;;  %v706_v20 = vld [vmem:[%s2063_s30 + $0x5a] sm:$0xff] }
  0x1f   : > { %v866_v16 = vpack.c.bf16 %v854_v14, %v853_v13  ;;  %v406_v18 = vld [vmem:[%s2063_s30 + $0x49] sm:$0xff]  ;;  %v855_v22 = vld [vmem:[%s2063_s30 + $0x53] sm:$0xff]  ;;  %v856_v23 = vld [vmem:[%s2063_s30 + $0x5b] sm:$0xff]  ;;  %v717_v24 = vpack.c.bf16 %v706_v20, %v705_v19 }
  0x20   : > { %v417_v21 = vpack.c.bf16 %v406_v18, %v405_v17  ;;  %v867_v25 = vpack.c.bf16 %v856_v23, %v855_v22  ;;  %v407_v26 = vld [vmem:[%s2063_s30 + $0x51] sm:$0xff]  ;;  %v408_v27 = vld [vmem:[%s2063_s30 + $0x59] sm:$0xff]  ;;  %v707_v28 = vld [vmem:[%s2063_s30 + $0x62] sm:$0xff] }
  0x21   : > { %v708_v29 = vld [vmem:[%s2063_s30 + $0x6a] sm:$0xff]  ;;  %v418_v30 = vpack.c.bf16 %v408_v27, %v407_v26  ;;  %v409_v35 = vld [vmem:[%s2063_s30 + $0x61] sm:$0xff]  ;;  %v859_v40 = vld [vmem:[%s2063_s30 + $0x73] sm:$0xff] }
  0x22   : > { %v857_v31 = vld [vmem:[%s2063_s30 + $0x63] sm:$0xff]  ;;  %v858_v32 = vld [vmem:[%s2063_s30 + $0x6b] sm:$0xff]  ;;  %v718_v33 = vpack.c.bf16 %v708_v29, %v707_v28  ;;  %v860_v41 = vld [vmem:[%s2063_s30 + $0x7b] sm:$0xff] }
  0x23   : > { %1897 = vmatmul.msk.bf16.gmra.mxu1 %vm287_vm1, %v265_v34  ;;  %v868_v34 = vpack.c.bf16 %v858_v32, %v857_v31  ;;  %v410_v36 = vld [vmem:[%s2063_s30 + $0x69] sm:$0xff]  ;;  %v869_v44 = vpack.c.bf16 %v860_v41, %v859_v40  ;;  %v411_v50 = vld [vmem:[%s2063_s30 + $0x71] sm:$0xff] }
  0x24   : > { %1899 = vmatmul.msk.bf16.gmra.mxu2 %vm287_vm1, %v267_v37  ;;  %v709_v37 = vld [vmem:[%s2063_s30 + $0x72] sm:$0xff]  ;;  %v861_v57 = vld [vmem:[%s2063_s30 + $0x83] sm:$0xff] }
  0x25   : > { %1901 = vmatmul.msk.bf16.gmra.mxu3 %vm287_vm1, %v269_v38  ;;  %v710_v38 = vld [vmem:[%s2063_s30 + $0x7a] sm:$0xff]  ;;  %v1148_v8 = vld [vmem:[%s2063_s30 + $0x2c] sm:$0xff] }
  0x26   : > { %1895 = vmatmul.msk.bf16.gmra.mxu0 %vm287_vm1, %v263_v39  ;;  %v419_v39 = vpack.c.bf16 %v410_v36, %v409_v35  ;;  %v719_v43 = vpack.c.bf16 %v710_v38, %v709_v37  ;;  %v997_v5 = vld [vmem:[%s2063_s30 + $0x14] sm:$0xff]  ;;  %v1297_v9 = vld [vmem:[%s2063_s30 + $0x25] sm:$0xff]  ;;  %v1300_v35 = vld [vmem:[%s2063_s30 + $0x3d] sm:$0xff] }
  0x27   : > { %v1298_v10 = vld [vmem:[%s2063_s30 + $0x2d] sm:$0xff]  ;;  %v1449_v38 = vld [vmem:[%s2063_s30 + $0x36] sm:$0xff] }
  0x28   : > { %v1447_v14 = vld [vmem:[%s2063_s30 + $0x26] sm:$0xff]  ;;  %v1313_v18 = vpack.c.bf16 %v1298_v10, %v1297_v9  ;;  %v1615_v29 = vld [vmem:[%s2211_s18 + $0x10] sm:$0xff] }
  0x29   : > { %1641 = vperm.xlu1 %1993, %v1615_v29   ;;  %v1149_v31 = vld [vmem:[%s2063_s30 + $0x34] sm:$0xff] }
  0x33   : > { %1903 = vmatmul.msk.bf16.vlgmr.msrb.gmra.mxu1 %vm287_vm1, %v413_v48 }
  0x34   : > { %1912 = vmatmul.msk.bf16.vlgmr.msrb.gmra.mxu2 %vm287_vm1, %v563_v51  ;;  %v412_v51 = vld [vmem:[%s2063_s30 + $0x79] sm:$0xff] }
  0x35   : > { %1921 = vmatmul.msk.bf16.vlgmr.msrb.gmra.mxu3 %vm287_vm1, %v713_v52  ;;  %v420_v55 = vpack.c.bf16 %v412_v51, %v411_v50  ;;  %v1616_v51 = vld [vmem:[%s2211_s18 + $0x18] sm:$0xff] }
  0x36   : > { %1930 = vmatmul.msk.bf16.vlgmr.msrb.gmra.mxu0 %vm287_vm1, %v863_v53  ;;  %v712_v53 = vld [vmem:[%s2063_s30 + $0x8a] sm:$0xff]  ;;  %1646 = vperm.xlu1 %1993, %v1616_v51   ;;  %v1620_v51 = vld [vmem:[%s2211_s18 + $0x38] sm:$0xff] }
  0x3e   : > { %1666 = vperm.xlu1 %1993, %v1620_v51  }
  0x43   : > { %1904 = vmatmul.msk.bf16.gmra.mxu1 %vm287_vm1, %v414_v58  ;;  %v862_v58 = vld [vmem:[%s2063_s30 + $0x8b] sm:$0xff] }
  0x44   : > { %1913 = vmatmul.msk.bf16.gmra.mxu2 %vm287_vm1, %v713_v52  ;;  %v711_v52 = vld [vmem:[%s2063_s30 + $0x82] sm:$0xff] }
  0x45   : > { %1922 = vmatmul.msk.bf16.gmra.mxu3 %vm287_vm1, %v714_v61  ;;  %v720_v60 = vpack.c.bf16 %v712_v53, %v711_v52 }
  0x46   : > { %1931 = vmatmul.msk.bf16.gmra.mxu0 %vm287_vm1, %v864_v62 }
  0x53   : > { %1905 = vmatmul.msk.bf16.gmra.mxu1 %vm287_vm1, %v415_v3  ;;  %v1613_v3 = vld [vmem:[%s2211_s18] sm:$0xff] }
  0x54   : > { %1914 = vmatmul.msk.bf16.gmra.mxu2 %vm287_vm1, %v714_v61  ;;  %v870_v61 = vpack.c.bf16 %v862_v58, %v861_v57  ;;  %1631 = vperm.xlu0 %1992, %v1613_v3   ;;  %v1151_v3 = vld [vmem:[%s2063_s30 + $0x44] sm:$0xff] }
  0x55   : > { %1923 = vmatmul.msk.bf16.gmra.mxu3 %vm287_vm1, %v715_v6 }
  0x56   : > { %1932 = vmatmul.msk.bf16.gmra.mxu0 %vm287_vm1, %v865_v7  ;;  %v1147_v7 = vld [vmem:[%s2063_s30 + $0x24] sm:$0xff] }
  0x57   : > { %v1163_v17 = vpack.c.bf16 %v1148_v8, %v1147_v7  ;;  %v1301_v7 = vld [vmem:[%s2063_s30 + $0x45] sm:$0xff]  ;;  %v1302_v8 = vld [vmem:[%s2063_s30 + $0x4d] sm:$0xff] }
  0x63   : > { %1906 = vmatmul.msk.bf16.gmra.mxu1 %vm287_vm1, %v416_v12 }
  0x64   : > { %1915 = vmatmul.msk.bf16.gmra.mxu2 %vm287_vm1, %v715_v6  ;;  %v998_v6 = vld [vmem:[%s2063_s30 + $0x1c] sm:$0xff] }
  0x65   : > { %1924 = vmatmul.msk.bf16.gmra.mxu3 %vm287_vm1, %v716_v15  ;;  %v1013_v12 = vpack.c.bf16 %v998_v6, %v997_v5  ;;  %v1152_v6 = vld [vmem:[%s2063_s30 + $0x4c] sm:$0xff] }
  0x66   : > { %1933 = vmatmul.msk.bf16.gmra.mxu0 %vm287_vm1, %v866_v16 }
  0x73   : > { %1907 = vmatmul.msk.bf16.gmra.mxu1 %vm287_vm1, %v417_v21  ;;  %v1614_v21 = vld [vmem:[%s2211_s18 + $0x8] sm:$0xff] }
  0x74   : > { %1916 = vmatmul.msk.bf16.gmra.mxu2 %vm287_vm1, %v716_v15  ;;  %v1448_v15 = vld [vmem:[%s2063_s30 + $0x2e] sm:$0xff]  ;;  %1636 = vperm.xlu0 %1992, %v1614_v21  }
  0x75   : > { %1925 = vmatmul.msk.bf16.gmra.mxu3 %vm287_vm1, %v717_v24  ;;  %v1463_v20 = vpack.c.bf16 %v1448_v15, %v1447_v14  ;;  %v1452_v14 = vld [vmem:[%s2063_s30 + $0x4e] sm:$0xff] }
  0x76   : > { %1934 = vmatmul.msk.bf16.gmra.mxu0 %vm287_vm1, %v867_v25 }
  0x83   : > { %1908 = vmatmul.msk.bf16.gmra.mxu1 %vm287_vm1, %v418_v30 }
  0x84   : > { %1917 = vmatmul.msk.bf16.gmra.mxu2 %vm287_vm1, %v717_v24 }
  0x85   : > { %1926 = vmatmul.msk.bf16.gmra.mxu3 %vm287_vm1, %v718_v33 }
  0x86   : > { %1935 = vmatmul.msk.bf16.gmra.mxu0 %vm287_vm1, %v868_v34  ;;  %v1299_v34 = vld [vmem:[%s2063_s30 + $0x35] sm:$0xff] }
  0x90   : > { %v2173_v42 = vpop.f32.mrf.mxu1 }
  0x93   : > { %1909 = vmatmul.msk.bf16.gmra.mxu1 %vm287_vm1, %v419_v39  ;;  %v325_v45 = vpop.f32.mrf.mxu0  ;;  %v1450_v39 = vld [vmem:[%s2063_s30 + $0x3e] sm:$0xff] }
  0x94   : > { %1918 = vmatmul.msk.bf16.gmra.mxu2 %vm287_vm1, %v718_v33  ;;  %v1150_v33 = vld [vmem:[%s2063_s30 + $0x3c] sm:$0xff]  ;;  %v1464_v50 = vpack.c.bf16 %v1450_v39, %v1449_v38 }
  0x95   : > { %1927 = vmatmul.msk.bf16.gmra.mxu3 %vm287_vm1, %v719_v43  ;;  %v1453_v38 = vld [vmem:[%s2063_s30 + $0x56] sm:$0xff]  ;;  %v1454_v39 = vld [vmem:[%s2063_s30 + $0x5e] sm:$0xff] }
  0x96   : > { %1936 = vmatmul.msk.bf16.gmra.mxu0 %vm287_vm1, %v869_v44  ;;  %v1314_v44 = vpack.c.bf16 %v1300_v35, %v1299_v34  ;;  %v1303_v34 = vld [vmem:[%s2063_s30 + $0x55] sm:$0xff]  ;;  %v1304_v35 = vld [vmem:[%s2063_s30 + $0x5d] sm:$0xff] }
  0x97   : > { %v2179_v46 = vpop.f32.mrf.mxu2 }
  0x98   : > { %v2181_v47 = vpop.f32.mrf.mxu3  ;;  %v2183_v48 = vpop.f32.mrf.mxu1 }
  0x9b   : > { %v327_v49 = vpop.f32.mrf.mxu0 }
  0x9f   : > { %v2189_v54 = vpop.f32.mrf.mxu2 }
  0xa0   : > { %v2191_v56 = vpop.f32.mrf.mxu3  ;;  %v2195_v59 = vpop.f32.mrf.mxu1 }
  0xa3   : > { %1910 = vmatmul.msk.bf16.gmra.mxu1 %vm287_vm1, %v420_v55  ;;  %v330_v62 = vpop.f32.mrf.mxu0 }
  0xa4   : > { %1919 = vmatmul.msk.bf16.gmra.mxu2 %vm287_vm1, %v719_v43  ;;  %v1164_v43 = vpack.c.bf16 %v1150_v33, %v1149_v31  ;;  %v1154_v33 = vld [vmem:[%s2063_s30 + $0x5c] sm:$0xff] }
  0xa5   : > { %1928 = vmatmul.msk.bf16.gmra.mxu3 %vm287_vm1, %v720_v60 }
  0xa6   : > { %1937 = vmatmul.msk.bf16.gmra.mxu0 %vm287_vm1, %v870_v61 }
  0xa7   : > { %v2202_v63 = vpop.f32.mrf.mxu2 }
  0xa8   : > { %v2204_v0 = vpop.f32.mrf.mxu3  ;;  %v2213_v1 = vpop.f32.mrf.mxu1 }
  0xab   : > { %v2216_v4 = vpop.f32.mrf.mxu0 }
  0xaf   : > { %v2224_v11 = vpop.f32.mrf.mxu2 }
  0xb0   : > { %v2226_v13 = vpop.f32.mrf.mxu3  ;;  %v475_v16 = vpop.f32.mrf.mxu1 }
  0xb1   : > { %v515_v19 = vadd.f32 %v475_v16, %v325_v45 }
  0xb3   : > { %1939 = vmatmul.msk.bf16.vlgmr.msra.gmra.mxu1 %vm287_vm1, %v1013_v12  ;;  %v925_v22 = vpop.f32.mrf.mxu0  ;;  %v1451_v12 = vld [vmem:[%s2063_s30 + $0x46] sm:$0xff] }
  0xb4   : > { %1948 = vmatmul.msk.bf16.vlgmr.msra.gmra.mxu2 %vm287_vm1, %v1163_v17 }
  0xb5   : > { %1957 = vmatmul.msk.bf16.vlgmr.msra.gmra.mxu3 %vm287_vm1, %v1313_v18  ;;  %v1315_v18 = vpack.c.bf16 %v1302_v8, %v1301_v7  ;;  %v1155_v7 = vld [vmem:[%s2063_s30 + $0x64] sm:$0xff] }
  0xb6   : > { %1966 = vmatmul.msk.bf16.vlgmr.msra.gmra.mxu0 %vm287_vm1, %v1463_v20  ;;  %v1465_v20 = vpack.c.bf16 %v1452_v14, %v1451_v12  ;;  %v1306_v12 = vld [vmem:[%s2063_s30 + $0x6d] sm:$0xff] }
  0xb7   : > { %v625_v23 = vpop.f32.mrf.mxu2 }
  0xb8   : > { %v775_v24 = vpop.f32.mrf.mxu3  ;;  %v665_v25 = vadd.f32 %v625_v23, %v515_v19  ;;  %v477_v26 = vpop.f32.mrf.mxu1 }
  0xb9   : > { %v516_v27 = vadd.f32 %v477_v26, %v327_v49 }
  0xba   : > { %v815_v28 = vadd.f32 %v775_v24, %v665_v25 }
  0xbb   : > { %v927_v30 = vpop.f32.mrf.mxu0 }
  0xbc   : > { %v2237_v32 = vadd.f32 %v925_v22, %v815_v28  ;;  %v1619_v28 = vld [vmem:[%s2211_s18 + $0x30] sm:$0xff] }
  0xbd   : > { %1661 = vperm.xlu0 %1992, %v1619_v28  }
  0xbf   : > { %v627_v36 = vpop.f32.mrf.mxu2 }
  0xc0   : > { %v777_v37 = vpop.f32.mrf.mxu3  ;;  %v666_v40 = vadd.f32 %v627_v36, %v516_v27  ;;  %v480_v41 = vpop.f32.mrf.mxu1 }
  0xc1   : > { %v517_v45 = vadd.f32 %v480_v41, %v330_v62 }
  0xc2   : > { %v816_v49 = vadd.f32 %v777_v37, %v666_v40 }
  0xc3   : > { %1940 = vmatmul.msk.bf16.gmra.mxu1 %vm287_vm1, %v1163_v17  ;;  %v930_v52 = vpop.f32.mrf.mxu0  ;;  %v1165_v17 = vpack.c.bf16 %v1152_v6, %v1151_v3  ;;  %v1622_v3 = vld [vmem:[%s2211_s18 + $0x48] sm:$0xff] }
  0xc4   : > { %1949 = vmatmul.msk.bf16.gmra.mxu2 %vm287_vm1, %v1164_v43  ;;  %v2248_v53 = vadd.f32 %v927_v30, %v816_v49  ;;  %v1153_v30 = vld [vmem:[%s2063_s30 + $0x54] sm:$0xff]  ;;  %v1466_v49 = vpack.c.bf16 %v1454_v39, %v1453_v38  ;;  %v1158_v38 = vld [vmem:[%s2063_s30 + $0x7c] sm:$0xff] }
  0xc5   : > { %1958 = vmatmul.msk.bf16.gmra.mxu3 %vm287_vm1, %v1314_v44  ;;  %1676 = vperm.xlu0 %1992, %v1622_v3   ;;  %v1307_v39 = vld [vmem:[%s2063_s30 + $0x75] sm:$0xff] }
  0xc6   : > { %1967 = vmatmul.msk.bf16.gmra.mxu0 %vm287_vm1, %v1464_v50  ;;  %v1617_v50 = vld [vmem:[%s2211_s18 + $0x20] sm:$0xff] }
  0xc7   : > { %v630_v55 = vpop.f32.mrf.mxu2  ;;  %1651 = vperm.xlu2 %1994, %v1617_v50  }
  0xc8   : > { %v780_v57 = vpop.f32.mrf.mxu3  ;;  %v667_v58 = vadd.f32 %v630_v55, %v517_v45  ;;  %v482_v60 = vpop.f32.mrf.mxu1 }
  0xc9   : > { %v518_v61 = vadd.f32 %v482_v60, %v2216_v4 }
  0xca   : > { %v817_v62 = vadd.f32 %v780_v57, %v667_v58 }
  0xcb   : > { %v932_v2 = vpop.f32.mrf.mxu0 }
  0xcc   : > { %v2253_v5 = vadd.f32 %v930_v52, %v817_v62 }
  0xcf   : > { %v632_v9 = vpop.f32.mrf.mxu2 }
  0xd0   : > { %v782_v10 = vpop.f32.mrf.mxu3  ;;  %v668_v15 = vadd.f32 %v632_v9, %v518_v61  ;;  %v485_v16 = vpop.f32.mrf.mxu1  ;;  %v1156_v9 = vld [vmem:[%s2063_s30 + $0x6c] sm:$0xff] }
  0xd1   : > { %v519_v19 = vadd.f32 %v485_v16, %v2173_v42  ;;  %v1455_v16 = vld [vmem:[%s2063_s30 + $0x66] sm:$0xff] }
  0xd2   : > { %v818_v4 = vadd.f32 %v782_v10, %v668_v15  ;;  %v1305_v10 = vld [vmem:[%s2063_s30 + $0x65] sm:$0xff] }
  0xd3   : > { %1941 = vmatmul.msk.bf16.gmra.mxu1 %vm287_vm1, %v1164_v43  ;;  %v935_v21 = vpop.f32.mrf.mxu0  ;;  %v1166_v43 = vpack.c.bf16 %v1154_v33, %v1153_v30 }
  0xd4   : > { %1950 = vmatmul.msk.bf16.gmra.mxu2 %vm287_vm1, %v1165_v17  ;;  %v2264_v22 = vadd.f32 %v932_v2, %v818_v4  ;;  %v1618_v2 = vld [vmem:[%s2211_s18 + $0x28] sm:$0xff]  ;;  %v1317_v4 = vpack.c.bf16 %v1306_v12, %v1305_v10 }
  0xd5   : > { %1959 = vmatmul.msk.bf16.gmra.mxu3 %vm287_vm1, %v1315_v18  ;;  %1656 = vperm.xlu2 %1994, %v1618_v2   ;;  %v1159_v10 = vld [vmem:[%s2063_s30 + $0x84] sm:$0xff] }
  0xd6   : > { %1968 = vmatmul.msk.bf16.gmra.mxu0 %vm287_vm1, %v1465_v20 }
  0xd7   : > { %v635_v23 = vpop.f32.mrf.mxu2 }
  0xd8   : > { %v785_v42 = vpop.f32.mrf.mxu3  ;;  %v669_v24 = vadd.f32 %v635_v23, %v519_v19  ;;  %v487_v25 = vpop.f32.mrf.mxu1  ;;  %v1167_v19 = vpack.c.bf16 %v1156_v9, %v1155_v7 }
  0xd9   : > { %v520_v26 = vadd.f32 %v487_v25, %v2183_v48  ;;  %v1316_v48 = vpack.c.bf16 %v1304_v35, %v1303_v34  ;;  %v1628_v34 = vld [vmem:[%s2211_s18 + $0x78] sm:$0xff] }
  0xda   : > { %v819_v27 = vadd.f32 %v785_v42, %v669_v24  ;;  %v1625_v42 = vld [vmem:[%s2211_s18 + $0x60] sm:$0xff] }
  0xdb   : > { %v937_v29 = vpop.f32.mrf.mxu0  ;;  %1691 = vperm.xlu0 %1992, %v1625_v42   ;;  %v1624_v42 = vld [vmem:[%s2211_s18 + $0x58] sm:$0xff] }
  0xdc   : > { %v2270_v31 = vadd.f32 %v935_v21, %v819_v27 }
  0xdf   : > { %v637_v36 = vpop.f32.mrf.mxu2 }
  0xe0   : > { %v787_v37 = vpop.f32.mrf.mxu3  ;;  %v670_v40 = vadd.f32 %v637_v36, %v520_v26  ;;  %v490_v41 = vpop.f32.mrf.mxu1  ;;  %v1157_v36 = vld [vmem:[%s2063_s30 + $0x74] sm:$0xff] }
  0xe1   : > { %v521_v44 = vadd.f32 %v490_v41, %v2195_v59  ;;  %v1626_v41 = vld [vmem:[%s2211_s18 + $0x68] sm:$0xff] }
  0xe2   : > { %v820_v45 = vadd.f32 %v787_v37, %v670_v40  ;;  %v1308_v40 = vld [vmem:[%s2063_s30 + $0x7d] sm:$0xff] }
  0xe3   : > { %1942 = vmatmul.msk.bf16.gmra.mxu1 %vm287_vm1, %v1165_v17  ;;  %v940_v52 = vpop.f32.mrf.mxu0  ;;  %v1456_v17 = vld [vmem:[%s2063_s30 + $0x6e] sm:$0xff]  ;;  %1706 = vperm.xlu0 %1992, %v1628_v34   ;;  %v1318_v51 = vpack.c.bf16 %v1308_v40, %v1307_v39  ;;  %v1162_v40 = vld [vmem:[%s2063_s30 + $0x9c] sm:$0xff] }
  0xe4   : > { %1951 = vmatmul.msk.bf16.gmra.mxu2 %vm287_vm1, %v1166_v43  ;;  %v2283_v55 = vadd.f32 %v937_v29, %v820_v45  ;;  %v1467_v23 = vpack.c.bf16 %v1456_v17, %v1455_v16  ;;  %v1458_v45 = vld [vmem:[%s2063_s30 + $0x7e] sm:$0xff]  ;;  %v1310_v16 = vld [vmem:[%s2063_s30 + $0x8d] sm:$0xff] }
  0xe5   : > { %1960 = vmatmul.msk.bf16.gmra.mxu3 %vm287_vm1, %v1316_v48 }
  0xe6   : > { %1969 = vmatmul.msk.bf16.gmra.mxu0 %vm287_vm1, %v1466_v49 }
  0xe7   : > { %v640_v59 = vpop.f32.mrf.mxu2 }
  0xe8   : > { %v790_v57 = vpop.f32.mrf.mxu3  ;;  %v671_v58 = vadd.f32 %v640_v59, %v521_v44  ;;  %v492_v60 = vpop.f32.mrf.mxu1  ;;  %v1457_v44 = vld [vmem:[%s2063_s30 + $0x76] sm:$0xff] }
  0xe9   : > { %v522_v61 = vadd.f32 %v492_v60, %v2213_v1 }
  0xea   : > { %v821_v62 = vadd.f32 %v790_v57, %v671_v58  ;;  %v1468_v57 = vpack.c.bf16 %v1458_v45, %v1457_v44  ;;  %v1621_v58 = vld [vmem:[%s2211_s18 + $0x40] sm:$0xff]  ;;  %v1461_v45 = vld [vmem:[%s2063_s30 + $0x96] sm:$0xff] }
  0xeb   : > { %v942_v6 = vpop.f32.mrf.mxu0  ;;  %1671 = vperm.xlu2 %1994, %v1621_v58  }
  0xec   : > { %v2290_v8 = vadd.f32 %v940_v52, %v821_v62 }
  0xef   : > { %v642_v14 = vpop.f32.mrf.mxu2 }
  0xf0   : > { %v792_v15 = vpop.f32.mrf.mxu3  ;;  %v672_v18 = vadd.f32 %v642_v14, %v522_v61  ;;  %v495_v1 = vpop.f32.mrf.mxu1  ;;  %v1160_v14 = vld [vmem:[%s2063_s30 + $0x8c] sm:$0xff] }
  0xf1   : > { %v523_v20 = vadd.f32 %v495_v1, %v2179_v46  ;;  %v1623_v46 = vld [vmem:[%s2211_s18 + $0x50] sm:$0xff]  ;;  %v1459_v1 = vld [vmem:[%s2063_s30 + $0x86] sm:$0xff] }
  0xf2   : > { %v822_v21 = vadd.f32 %v792_v15, %v672_v18  ;;  %1681 = vperm.xlu1 %1993, %v1623_v46   ;;  %v1309_v15 = vld [vmem:[%s2063_s30 + $0x85] sm:$0xff] }
  0xf3   : > { %1943 = vmatmul.msk.bf16.gmra.mxu1 %vm287_vm1, %v1166_v43  ;;  %v945_v24 = vpop.f32.mrf.mxu0  ;;  %1686 = vperm.xlu2 %1994, %v1624_v42  }
  0xf4   : > { %1952 = vmatmul.msk.bf16.gmra.mxu2 %vm287_vm1, %v1167_v19  ;;  %v2302_v25 = vadd.f32 %v942_v6, %v822_v21  ;;  %v1169_v21 = vpack.c.bf16 %v1160_v14, %v1159_v10 }
  0xf5   : > { %1961 = vmatmul.msk.bf16.gmra.mxu3 %vm287_vm1, %v1317_v4 }
  0xf6   : > { %1970 = vmatmul.msk.bf16.gmra.mxu0 %vm287_vm1, %v1467_v23  ;;  %v1319_v23 = vpack.c.bf16 %v1310_v16, %v1309_v15 }
  0xf7   : > { %v645_v26 = vpop.f32.mrf.mxu2 }
  0xf8   : > { %v795_v27 = vpop.f32.mrf.mxu3  ;;  %v673_v28 = vadd.f32 %v645_v26, %v523_v20  ;;  %v497_v29 = vpop.f32.mrf.mxu1 }
  0xf9   : > { %v524_v30 = vadd.f32 %v497_v29, %v2189_v54  ;;  %v1168_v54 = vpack.c.bf16 %v1158_v38, %v1157_v36  ;;  %v1161_v38 = vld [vmem:[%s2063_s30 + $0x94] sm:$0xff] }
  0xfa   : > { %v823_v33 = vadd.f32 %v795_v27, %v673_v28  ;;  %1696 = vperm.xlu1 %1993, %v1626_v41   ;;  %v1311_v41 = vld [vmem:[%s2063_s30 + $0x95] sm:$0xff] }
  0xfb   : > { %v947_v35 = vpop.f32.mrf.mxu0 }
  0xfc   : > { %v2309_v37 = vadd.f32 %v945_v24, %v823_v33  ;;  %v1627_v33 = vld [vmem:[%s2211_s18 + $0x70] sm:$0xff] }
  0xfd   : > { %1701 = vperm.xlu2 %1994, %v1627_v33  }
  0xff   : > { %v647_v43 = vpop.f32.mrf.mxu2 }
 0x100   : > { %v797_v48 = vpop.f32.mrf.mxu3  ;;  %v674_v49 = vadd.f32 %v647_v43, %v524_v30  ;;  %v500_v50 = vpop.f32.mrf.mxu1  ;;  %v1312_v43 = vld [vmem:[%s2063_s30 + $0x9d] sm:$0xff] }
 0x101   : > { %v525_v52 = vadd.f32 %v500_v50, %v2202_v63 }
 0x102   : > { %v824_v59 = vadd.f32 %v797_v48, %v674_v49  ;;  %v1462_v49 = vld [vmem:[%s2063_s30 + $0x9e] sm:$0xff] }
 0x103   : > { %1944 = vmatmul.msk.bf16.gmra.mxu1 %vm287_vm1, %v1167_v19  ;;  %v950_v60 = vpop.f32.mrf.mxu0  ;;  %v1460_v19 = vld [vmem:[%s2063_s30 + $0x8e] sm:$0xff] }
 0x104   : > { %1953 = vmatmul.msk.bf16.gmra.mxu2 %vm287_vm1, %v1168_v54  ;;  %v2322_v61 = vadd.f32 %v947_v35, %v824_v59  ;;  %v1469_v46 = vpack.c.bf16 %v1460_v19, %v1459_v1 }
 0x105   : > { %1962 = vmatmul.msk.bf16.gmra.mxu3 %vm287_vm1, %v1318_v51  ;;  %v1170_v51 = vpack.c.bf16 %v1162_v40, %v1161_v38 }
 0x106   : > { %1971 = vmatmul.msk.bf16.gmra.mxu0 %vm287_vm1, %v1468_v57  ;;  %v1470_v57 = vpack.c.bf16 %v1462_v49, %v1461_v45  ;;  %v1642_v49 = vpop.permute.xlu1 %1641 }
 0x107   : > { %v650_v63 = vpop.f32.mrf.mxu2 }
 0x108   : > { %v800_v62 = vpop.f32.mrf.mxu3  ;;  %v675_v2 = vadd.f32 %v650_v63, %v525_v52  ;;  %v502_v3 = vpop.f32.mrf.mxu1  ;;  %v1320_v52 = vpack.c.bf16 %v1312_v43, %v1311_v41 }
 0x109   : > { %v526_v6 = vadd.f32 %v502_v3, %v2224_v11 }
 0x10a   : > { %v825_v7 = vadd.f32 %v800_v62, %v675_v2 }
 0x10b   : > { %v952_v9 = vpop.f32.mrf.mxu0 }
 0x10c   : > { %v2327_v12 = vadd.f32 %v950_v60, %v825_v7 }
 0x10f   : > { %v652_v17 = vpop.f32.mrf.mxu2 }
 0x110   : > { %v802_v18 = vpop.f32.mrf.mxu3  ;;  %v676_v4 = vadd.f32 %v652_v17, %v526_v6  ;;  %v505_v20 = vpop.f32.mrf.mxu1 }
 0x111   : > { %v527_v11 = vadd.f32 %v505_v20, %v2181_v47 }
 0x112   : > { %v826_v24 = vadd.f32 %v802_v18, %v676_v4 }
 0x113   : > { %1945 = vmatmul.msk.bf16.gmra.mxu1 %vm287_vm1, %v1168_v54  ;;  %v955_v26 = vpop.f32.mrf.mxu0 }
 0x114   : > { %1954 = vmatmul.msk.bf16.gmra.mxu2 %vm287_vm1, %v1169_v21  ;;  %v2339_v27 = vadd.f32 %v952_v9, %v826_v24 }
 0x115   : > { %1963 = vmatmul.msk.bf16.gmra.mxu3 %vm287_vm1, %v1319_v23 }
 0x116   : > { %1972 = vmatmul.msk.bf16.gmra.mxu0 %vm287_vm1, %v1469_v46 }
 0x117   : > { %v655_v28 = vpop.f32.mrf.mxu2 }
 0x118   : > { %v805_v47 = vpop.f32.mrf.mxu3  ;;  %v677_v29 = vadd.f32 %v655_v28, %v527_v11  ;;  %v507_v30 = vpop.f32.mrf.mxu1 }
 0x119   : > { %v528_v34 = vadd.f32 %v507_v30, %v2191_v56 }
 0x11a   : > { %v827_v35 = vadd.f32 %v805_v47, %v677_v29 }
 0x11b   : > { %v957_v36 = vpop.f32.mrf.mxu0 }
 0x11c   : > { %v2345_v39 = vadd.f32 %v955_v26, %v827_v35 }
 0x11f   : > { %v657_v48 = vpop.f32.mrf.mxu2 }
 0x120   : > { %v807_v44 = vpop.f32.mrf.mxu3  ;;  %v678_v50 = vadd.f32 %v657_v48, %v528_v34  ;;  %v510_v54 = vpop.f32.mrf.mxu1 }
 0x121   : > { %v529_v59 = vadd.f32 %v510_v54, %v2204_v0 }
 0x122   : > { %v828_v56 = vadd.f32 %v807_v44, %v678_v50 }
 0x123   : > { %1946 = vmatmul.msk.bf16.gmra.mxu1 %vm287_vm1, %v1169_v21  ;;  %v960_v58 = vpop.f32.mrf.mxu0 }
 0x124   : > { %1955 = vmatmul.msk.bf16.gmra.mxu2 %vm287_vm1, %v1170_v51  ;;  %v2356_v60 = vadd.f32 %v957_v36, %v828_v56 }
 0x125   : > { %1964 = vmatmul.msk.bf16.gmra.mxu3 %vm287_vm1, %v1320_v52 }
 0x126   : > { %1973 = vmatmul.msk.bf16.gmra.mxu0 %vm287_vm1, %v1470_v57 }
 0x127   : > { %v660_v63 = vpop.f32.mrf.mxu2 }
 0x128   : > { %v810_v62 = vpop.f32.mrf.mxu3  ;;  %v679_v2 = vadd.f32 %v660_v63, %v529_v59  ;;  %v512_v3 = vpop.f32.mrf.mxu1 }
 0x129   : > { %v530_v6 = vadd.f32 %v512_v3, %v2226_v13  ;;  %v1632_v13 = vpop.permute.xlu0 %1631 }
 0x12a   : > { %v829_v0 = vadd.f32 %v810_v62, %v679_v2 }
 0x12b   : > { %v962_v7 = vpop.f32.mrf.mxu0 }
 0x12c   : > { %v2360_v9 = vadd.f32 %v960_v58, %v829_v0 }
 0x12f   : > { %v662_v10 = vpop.f32.mrf.mxu2 }
 0x130   : > { %v812_v14 = vpop.f32.mrf.mxu3  ;;  %v680_v15 = vadd.f32 %v662_v10, %v530_v6  ;;  %v1075_v16 = vpop.f32.mrf.mxu1 }
 0x131   : > { %v1115_v19 = vadd.f32 %v1075_v16, %v2237_v32  ;;  %v1637_v33 = vpop.permute.xlu0 %1636 }
 0x132   : > { %v830_v17 = vadd.f32 %v812_v14, %v680_v15 }
 0x133   : > { %v1525_v18 = vpop.f32.mrf.mxu0 }
 0x134   : > { %v2362_v1 = vadd.f32 %v962_v7, %v830_v17  ;;  %v1647_v7 = vpop.permute.xlu1 %1646 }
 0x137   : > { %v1225_v4 = vpop.f32.mrf.mxu2 }
 0x138   : > { %v1375_v20 = vpop.f32.mrf.mxu3  ;;  %v1265_v21 = vadd.f32 %v1225_v4, %v1115_v19  ;;  %v1077_v23 = vpop.f32.mrf.mxu1 }
 0x139   : > { %v1116_v46 = vadd.f32 %v1077_v23, %v2248_v53 }
 0x13a   : > { %v1415_v42 = vadd.f32 %v1375_v20, %v1265_v21  ;;  %v1652_v20 = vpop.permute.xlu2 %1651 }
 0x13b   : > { %v1527_v11 = vpop.f32.mrf.mxu0 }
 0x13c   : > { %v1565_v24 = vadd.f32 %v1525_v18, %v1415_v42 }
 0x13e   : > { %1581 = vst [vmem:[%s2370_s21] sm:$0xff] %v1565_v24  ;;  %v1709_v35 = vmul.f32 %v1632_v13, %v1565_v24 }
 0x13f   : > { %v1227_v32 = vpop.f32.mrf.mxu2 }
 0x140   : > { %v1377_v26 = vpop.f32.mrf.mxu3  ;;  %v1266_v28 = vadd.f32 %v1227_v32, %v1116_v46  ;;  %v1080_v47 = vpop.f32.mrf.mxu1  ;;  %v1747_v53 = vmul.f32 %v1709_v35, %v1709_v35 }
 0x141   : > { %v1117_v36 = vadd.f32 %v1080_v47, %v2253_v5 }
 0x142   : > { %v1416_v29 = vadd.f32 %v1377_v26, %v1266_v28 }
 0x143   : > { %v1530_v30 = vpop.f32.mrf.mxu0 }
 0x144   : > { %v1566_v34 = vadd.f32 %v1527_v11, %v1416_v29 }
 0x146   : > { %1582 = vst [vmem:[%s2370_s21 + $0x8] sm:$0xff] %v1566_v34  ;;  %v1710_v38 = vmul.f32 %v1637_v33, %v1566_v34  ;;  %v1657_v34 = vpop.permute.xlu2 %1656 }
 0x147   : > { %v1230_v40 = vpop.f32.mrf.mxu2 }
 0x148   : > { %v1380_v41 = vpop.f32.mrf.mxu3  ;;  %v1267_v43 = vadd.f32 %v1230_v40, %v1117_v36  ;;  %v1082_v48 = vpop.f32.mrf.mxu1  ;;  %v1725_v44 = vadd.f32 %v1710_v38, %v1709_v35  ;;  %v1748_v45 = vmul.f32 %v1710_v38, %v1710_v38 }
 0x149   : > { %v1118_v59 = vadd.f32 %v1082_v48, %v2264_v22 }
 0x14a   : > { %v1417_v50 = vadd.f32 %v1380_v41, %v1267_v43  ;;  %v1763_v54 = vadd.f32 %v1748_v45, %v1747_v53 }
 0x14b   : > { %v1532_v51 = vpop.f32.mrf.mxu0 }
 0x14c   : > { %v1567_v52 = vadd.f32 %v1530_v30, %v1417_v50  ;;  %v1662_v50 = vpop.permute.xlu0 %1661 }
 0x14e   : > { %1583 = vst [vmem:[%s2370_s21 + $0x10] sm:$0xff] %v1567_v52  ;;  %v1711_v5 = vmul.f32 %v1642_v49, %v1567_v52 }
 0x14f   : > { %v1232_v56 = vpop.f32.mrf.mxu2 }
 0x150   : > { %v1382_v57 = vpop.f32.mrf.mxu3  ;;  %v1268_v58 = vadd.f32 %v1232_v56, %v1118_v59  ;;  %v1085_v63 = vpop.f32.mrf.mxu1  ;;  %v1726_v62 = vadd.f32 %v1725_v44, %v1711_v5  ;;  %v1749_v2 = vmul.f32 %v1711_v5, %v1711_v5 }
 0x151   : > { %v1119_v14 = vadd.f32 %v1085_v63, %v2270_v31 }
 0x152   : > { %v1418_v3 = vadd.f32 %v1382_v57, %v1268_v58  ;;  %v1764_v6 = vadd.f32 %v1763_v54, %v1749_v2 }
 0x153   : > { %v1535_v0 = vpop.f32.mrf.mxu0 }
 0x154   : > { %v1568_v10 = vadd.f32 %v1532_v51, %v1418_v3  ;;  %v1667_v3 = vpop.permute.xlu1 %1666 }
 0x156   : > { %1584 = vst [vmem:[%s2370_s21 + $0x18] sm:$0xff] %v1568_v10  ;;  %v1712_v15 = vmul.f32 %v1647_v7, %v1568_v10 }
 0x157   : > { %v1235_v16 = vpop.f32.mrf.mxu2 }
 0x158   : > { %v1385_v22 = vpop.f32.mrf.mxu3  ;;  %v1269_v17 = vadd.f32 %v1235_v16, %v1119_v14  ;;  %v1087_v18 = vpop.f32.mrf.mxu1  ;;  %v1727_v19 = vadd.f32 %v1726_v62, %v1712_v15  ;;  %v1750_v4 = vmul.f32 %v1712_v15, %v1712_v15 }
 0x159   : > { %v1120_v11 = vadd.f32 %v1087_v18, %v2283_v55 }
 0x15a   : > { %v1419_v21 = vadd.f32 %v1385_v22, %v1269_v17  ;;  %v1765_v23 = vadd.f32 %v1764_v6, %v1750_v4  ;;  %v1672_v4 = vpop.permute.xlu2 %1671 }
 0x15b   : > { %v1537_v13 = vpop.f32.mrf.mxu0 }
 0x15c   : > { %v1569_v42 = vadd.f32 %v1535_v0, %v1419_v21 }
 0x15e   : > { %1585 = vst [vmem:[%s2370_s21 + $0x20] sm:$0xff] %v1569_v42  ;;  %v1713_v24 = vmul.f32 %v1652_v20, %v1569_v42 }
 0x15f   : > { %v1237_v46 = vpop.f32.mrf.mxu2 }
 0x160   : > { %v1387_v31 = vpop.f32.mrf.mxu3  ;;  %v1270_v32 = vadd.f32 %v1237_v46, %v1120_v11  ;;  %v1090_v26 = vpop.f32.mrf.mxu1  ;;  %v1728_v28 = vadd.f32 %v1727_v19, %v1713_v24  ;;  %v1751_v47 = vmul.f32 %v1713_v24, %v1713_v24 }
 0x161   : > { %v1121_v36 = vadd.f32 %v1090_v26, %v2290_v8 }
 0x162   : > { %v1420_v29 = vadd.f32 %v1387_v31, %v1270_v32  ;;  %v1766_v30 = vadd.f32 %v1765_v23, %v1751_v47  ;;  %v1677_v47 = vpop.permute.xlu0 %1676 }
 0x163   : > { %v1540_v33 = vpop.f32.mrf.mxu0 }
 0x164   : > { %v1570_v35 = vadd.f32 %v1537_v13, %v1420_v29 }
 0x166   : > { %1586 = vst [vmem:[%s2370_s21 + $0x28] sm:$0xff] %v1570_v35  ;;  %v1714_v38 = vmul.f32 %v1657_v34, %v1570_v35 }
 0x167   : > { %v1240_v40 = vpop.f32.mrf.mxu2 }
 0x168   : > { %v1390_v55 = vpop.f32.mrf.mxu3  ;;  %v1271_v41 = vadd.f32 %v1240_v40, %v1121_v36  ;;  %v1092_v43 = vpop.f32.mrf.mxu1  ;;  %v1729_v48 = vadd.f32 %v1728_v28, %v1714_v38  ;;  %v1752_v53 = vmul.f32 %v1714_v38, %v1714_v38 }
 0x169   : > { %v1122_v51 = vadd.f32 %v1092_v43, %v2302_v25 }
 0x16a   : > { %v1421_v44 = vadd.f32 %v1390_v55, %v1271_v41  ;;  %v1767_v45 = vadd.f32 %v1766_v30, %v1752_v53 }
 0x16b   : > { %v1542_v49 = vpop.f32.mrf.mxu0 }
 0x16c   : > { %v1571_v54 = vadd.f32 %v1540_v33, %v1421_v44 }
 0x16e   : > { %1587 = vst [vmem:[%s2370_s21 + $0x30] sm:$0xff] %v1571_v54  ;;  %v1715_v52 = vmul.f32 %v1662_v50, %v1571_v54 }
 0x16f   : > { %v1242_v59 = vpop.f32.mrf.mxu2 }
 0x170   : > { %v1392_v8 = vpop.f32.mrf.mxu3  ;;  %v1272_v5 = vadd.f32 %v1242_v59, %v1122_v51  ;;  %v1095_v56 = vpop.f32.mrf.mxu1  ;;  %v1730_v57 = vadd.f32 %v1729_v48, %v1715_v52  ;;  %v1753_v58 = vmul.f32 %v1715_v52, %v1715_v52 }
 0x171   : > { %v1123_v0 = vadd.f32 %v1095_v56, %v2309_v37  ;;  %v1682_v48 = vpop.permute.xlu1 %1681  ;;  %v1687_v56 = vpop.permute.xlu2 %1686 }
 0x172   : > { %v1422_v63 = vadd.f32 %v1392_v8, %v1272_v5  ;;  %v1768_v62 = vadd.f32 %v1767_v45, %v1753_v58 }
 0x173   : > { %v1545_v2 = vpop.f32.mrf.mxu0 }
 0x174   : > { %v1572_v6 = vadd.f32 %v1542_v49, %v1422_v63 }
 0x176   : > { %1588 = vst [vmem:[%s2370_s21 + $0x38] sm:$0xff] %v1572_v6  ;;  %v1716_v7 = vmul.f32 %v1667_v3, %v1572_v6 }
 0x177   : > { %v1245_v10 = vpop.f32.mrf.mxu2 }
 0x178   : > { %v1395_v25 = vpop.f32.mrf.mxu3  ;;  %v1273_v14 = vadd.f32 %v1245_v10, %v1123_v0  ;;  %v1097_v15 = vpop.f32.mrf.mxu1  ;;  %v1731_v16 = vadd.f32 %v1730_v57, %v1716_v7  ;;  %v1754_v22 = vmul.f32 %v1716_v7, %v1716_v7 }
 0x179   : > { %v1124_v21 = vadd.f32 %v1097_v15, %v2322_v61 }
 0x17a   : > { %v1423_v17 = vadd.f32 %v1395_v25, %v1273_v14  ;;  %v1769_v18 = vadd.f32 %v1768_v62, %v1754_v22  ;;  %v1692_v25 = vpop.permute.xlu0 %1691 }
 0x17b   : > { %v1547_v19 = vpop.f32.mrf.mxu0 }
 0x17c   : > { %v1573_v20 = vadd.f32 %v1545_v2, %v1423_v17 }
 0x17e   : > { %1589 = vst [vmem:[%s2370_s21 + $0x40] sm:$0xff] %v1573_v20  ;;  %v1717_v23 = vmul.f32 %v1672_v4, %v1573_v20 }
 0x17f   : > { %v1247_v13 = vpop.f32.mrf.mxu2 }
 0x180   : > { %v1397_v37 = vpop.f32.mrf.mxu3  ;;  %v1274_v42 = vadd.f32 %v1247_v13, %v1124_v21  ;;  %v1100_v11 = vpop.f32.mrf.mxu1  ;;  %v1732_v24 = vadd.f32 %v1731_v16, %v1717_v23  ;;  %v1755_v46 = vmul.f32 %v1717_v23, %v1717_v23 }
 0x181   : > { %v1125_v29 = vadd.f32 %v1100_v11, %v2327_v12  ;;  %v1697_v13 = vpop.permute.xlu1 %1696 }
 0x182   : > { %v1424_v31 = vadd.f32 %v1397_v37, %v1274_v42  ;;  %v1770_v32 = vadd.f32 %v1769_v18, %v1755_v46 }
 0x183   : > { %v1550_v26 = vpop.f32.mrf.mxu0 }
 0x184   : > { %v1574_v28 = vadd.f32 %v1547_v19, %v1424_v31 }
 0x186   : > { %1590 = vst [vmem:[%s2370_s21 + $0x48] sm:$0xff] %v1574_v28  ;;  %v1718_v30 = vmul.f32 %v1677_v47, %v1574_v28 }
 0x187   : > { %v1250_v33 = vpop.f32.mrf.mxu2 }
 0x188   : > { %v1400_v61 = vpop.f32.mrf.mxu3  ;;  %v1275_v34 = vadd.f32 %v1250_v33, %v1125_v29  ;;  %v1102_v35 = vpop.f32.mrf.mxu1  ;;  %v1733_v36 = vadd.f32 %v1732_v24, %v1718_v30  ;;  %v1756_v38 = vmul.f32 %v1718_v30, %v1718_v30 }
 0x189   : > { %v1126_v53 = vadd.f32 %v1102_v35, %v2339_v27  ;;  %v1702_v30 = vpop.permute.xlu2 %1701 }
 0x18a   : > { %v1425_v40 = vadd.f32 %v1400_v61, %v1275_v34  ;;  %v1771_v55 = vadd.f32 %v1770_v32, %v1756_v38 }
 0x18b   : > { %v1552_v41 = vpop.f32.mrf.mxu0 }
 0x18c   : > { %v1575_v43 = vadd.f32 %v1550_v26, %v1425_v40 }
 0x18e   : > { %1591 = vst [vmem:[%s2370_s21 + $0x50] sm:$0xff] %v1575_v43  ;;  %v1719_v44 = vmul.f32 %v1682_v48, %v1575_v43  ;;  %v1707_v48 = vpop.permute.xlu0 %1706 }
 0x18f   : > { %v1252_v45 = vpop.f32.mrf.mxu2 }
 0x190   : > { %v1402_v12 = vpop.f32.mrf.mxu3  ;;  %v1276_v49 = vadd.f32 %v1252_v45, %v1126_v53  ;;  %v1105_v50 = vpop.f32.mrf.mxu1  ;;  %v1734_v54 = vadd.f32 %v1733_v36, %v1719_v44  ;;  %v1757_v51 = vmul.f32 %v1719_v44, %v1719_v44 }
 0x191   : > { %v1127_v57 = vadd.f32 %v1105_v50, %v2345_v39 }
 0x192   : > { %v1426_v52 = vadd.f32 %v1402_v12, %v1276_v49  ;;  %v1772_v59 = vadd.f32 %v1771_v55, %v1757_v51 }
 0x193   : > { %v1555_v5 = vpop.f32.mrf.mxu0 }
 0x194   : > { %v1576_v8 = vadd.f32 %v1552_v41, %v1426_v52 }
 0x196   : > { %1592 = vst [vmem:[%s2370_s21 + $0x58] sm:$0xff] %v1576_v8  ;;  %v1720_v58 = vmul.f32 %v1687_v56, %v1576_v8 }
 0x197   : > { %v1255_v63 = vpop.f32.mrf.mxu2 }
 0x198   : > { %v1405_v27 = vpop.f32.mrf.mxu3  ;;  %v1277_v62 = vadd.f32 %v1255_v63, %v1127_v57  ;;  %v1107_v2 = vpop.f32.mrf.mxu1  ;;  %v1735_v3 = vadd.f32 %v1734_v54, %v1720_v58  ;;  %v1758_v6 = vmul.f32 %v1720_v58, %v1720_v58 }
 0x199   : > { %v1128_v14 = vadd.f32 %v1107_v2, %v2356_v60 }
 0x19a   : > { %v1427_v0 = vadd.f32 %v1405_v27, %v1277_v62  ;;  %v1773_v7 = vadd.f32 %v1772_v59, %v1758_v6 }
 0x19b   : > { %v1557_v16 = vpop.f32.mrf.mxu0 }
 0x19c   : > { %v1577_v10 = vadd.f32 %v1555_v5, %v1427_v0 }
 0x19e   : > { %1593 = vst [vmem:[%s2370_s21 + $0x60] sm:$0xff] %v1577_v10  ;;  %v1721_v15 = vmul.f32 %v1692_v25, %v1577_v10 }
 0x19f   : > { %v1257_v22 = vpop.f32.mrf.mxu2 }
 0x1a0   : > { %v1407_v39 = vpop.f32.mrf.mxu3  ;;  %v1278_v17 = vadd.f32 %v1257_v22, %v1128_v14  ;;  %v1736_v18 = vadd.f32 %v1735_v3, %v1721_v15  ;;  %v1759_v19 = vmul.f32 %v1721_v15, %v1721_v15  ;;  %v1110_v4 = vpop.f32.mrf.mxu1 }
 0x1a1   : > { %v1129_v37 = vadd.f32 %v1110_v4, %v2360_v9 }
 0x1a2   : > { %v1428_v20 = vadd.f32 %v1407_v39, %v1278_v17  ;;  %v1774_v21 = vadd.f32 %v1773_v7, %v1759_v19 }
 0x1a3   : > { %v1560_v32 = vpop.f32.mrf.mxu0 }
 0x1a4   : > { %v1578_v23 = vadd.f32 %v1557_v16, %v1428_v20 }
 0x1a6   : > { %1594 = vst [vmem:[%s2370_s21 + $0x68] sm:$0xff] %v1578_v23  ;;  %v1722_v42 = vmul.f32 %v1697_v13, %v1578_v23 }
 0x1a7   : > { %v1260_v11 = vpop.f32.mrf.mxu2 }
 0x1a8   : > { %v1410_v60 = vpop.f32.mrf.mxu3  ;;  %v1279_v24 = vadd.f32 %v1260_v11, %v1129_v37  ;;  %v1737_v46 = vadd.f32 %v1736_v18, %v1722_v42  ;;  %v1760_v31 = vmul.f32 %v1722_v42, %v1722_v42  ;;  %v1112_v47 = vpop.f32.mrf.mxu1 }
 0x1a9   : > { %v1130_v33 = vadd.f32 %v1112_v47, %v2362_v1 }
 0x1aa   : > { %v1429_v26 = vadd.f32 %v1410_v60, %v1279_v24  ;;  %v1775_v28 = vadd.f32 %v1774_v21, %v1760_v31 }
 0x1ab   : > { %v1562_v41 = vpop.f32.mrf.mxu0 }
 0x1ac   : > { %v1579_v29 = vadd.f32 %v1560_v32, %v1429_v26 }
 0x1ae   : > { %1595 = vst [vmem:[%s2370_s21 + $0x70] sm:$0xff] %v1579_v29  ;;  %v1723_v61 = vmul.f32 %v1702_v30, %v1579_v29 }
 0x1af   : > { %v1262_v34 = vpop.f32.mrf.mxu2 }
 0x1b0   : > { %v1280_v9 = vadd.f32 %v1262_v34, %v1130_v33  ;;  %v1738_v35 = vadd.f32 %v1737_v46, %v1723_v61  ;;  %v1761_v36 = vmul.f32 %v1723_v61, %v1723_v61  ;;  %v1412_v38 = vpop.f32.mrf.mxu3 }
 0x1b2   : > { %v1430_v40 = vadd.f32 %v1412_v38, %v1280_v9  ;;  %v1776_v55 = vadd.f32 %v1775_v28, %v1761_v36 }
 0x1b4   : > { %v1580_v43 = vadd.f32 %v1562_v41, %v1430_v40 }
 0x1b6   : > { %1596 = vst [vmem:[%s2370_s21 + $0x78] sm:$0xff] %v1580_v43  ;;  %v1724_v53 = vmul.f32 %v1707_v48, %v1580_v43 }
 0x1b8   : > { %v1739_v44 = vadd.f32 %v1738_v35, %v1724_v53  ;;  %v1762_v45 = vmul.f32 %v1724_v53, %v1724_v53 }
 0x1ba   : > { %v1740_v12 = vrot.slane %v1739_v44, 4  ;;  %v1777_v49 = vadd.f32 %v1776_v55, %v1762_v45 }
 0x1bc   : > { %v1741_v1 = vadd.f32 %v1740_v12, %v1739_v44  ;;  %v1778_v50 = vrot.slane %v1777_v49, 4 }
 0x1be   : > { %v1742_v54 = vrot.slane %v1741_v1, 2  ;;  %v1779_v51 = vadd.f32 %v1778_v50, %v1777_v49 }
 0x1c0   : > { %v1743_v52 = vadd.f32 %v1742_v54, %v1741_v1  ;;  %v1780_v59 = vrot.slane %v1779_v51, 2 }
 0x1c2   : > { %v1744_v8 = vrot.slane %v1743_v52, 1  ;;  %v1781_v5 = vadd.f32 %v1780_v59, %v1779_v51 }
 0x1c4   : > { %v1745_v56 = vadd.f32 %v1744_v8, %v1743_v52  ;;  %v1782_v57 = vrot.slane %v1781_v5, 1 }
 0x1c6   : > { %1746 = vst [vmem:[%s228_s25] sm:$0x1] %v1745_v56  ;;  %v1783_v58 = vadd.f32 %v1782_v57, %v1781_v5 }
 0x1c8   : > { %1784 = vst [vmem:[%s228_s25 + $0x1] sm:$0x1] %v1783_v58 }
 0x1c9 PF: > { %s15_s15 = sadd.s32 1, %s2001_s15  }
 0x1ca   : > { %p12_p4 = scmp.ge.s32.totalorder %s15_s15, 8  }
 0x1cc   :  { %14 = sbr.rel (!%p12_p4) target bundleno = 1 (0x1), region = 85 }

// kernel: convolution_layer.6
= control target key start
LH: loop header
LB: loop body
LE: loop exit
PB: predicated region body
PF: predicated region fallthrough
CT: control target
= control target key end

     0   :  { %s2029_s15 = smov 0   ;;  %s2410_s0 = inlined_call_operand.vmem [shape: f32[6,166,8], index: 0, kind: input, shape index: {}]   ;;  %s2411_s1 = inlined_call_operand.vmem [shape: bf16[9,8,128], index: 1, kind: input, shape index: {}]   ;;  %s2412_s2 = inlined_call_operand.vmem [shape: f32[6,128,1], index: 2, kind: input, shape index: {}]   ;;  %s2413_s3 = inlined_call_operand.vmem [shape: f32[6,128,128], index: 3, kind: output, shape index: {0}]   ;;  %s2414_s4 = inlined_call_operand.vmem [shape: f32[6,2,128], index: 4, kind: output, shape index: {1}]  }
   0x1 LB: > { %s1883_s16 = sadd.s32 4294967295, %s2001_s15   ;;  %p1887_p0 = scmp.ge.s32.totalorder %s2001_s15, 1  ;;  %s2001_s15 = sphi %s2029_s15, %s15_s15  }
   0x2   : > { %p175_p1 = scmp.lt.s32.totalorder %s2001_s15, 7 }
   0x4   : > { %p176_p2 = pnand %p1887_p0, %p175_p1 }
   0x5   : > { %p210_p3 = scmp.lt.s32.totalorder (!%p176_p2), %s1883_s16, 5 }
   0x6   : > { %179 = sbr.rel (%p176_p2) target bundleno = 457 (0x1c9), region = 32 }
   0xb   : > { %v286_v0 = vld [vmem:[%s2411_s1] sm:$0xf]  ;;  %vm312_vm0 = vcmask 1043456   ;;  %v1902_v2 = vld [vmem:[%s2411_s1 + $0x4] sm:$0xf]  ;;  %s2416_s16 = smov (!%p210_p3, %s1883_s16), 5 }
   0xc   : > { %v314_v1 = vsel %vm312_vm0, %v286_v0, 0  ;;  %v1911_v3 = vld [vmem:[%s2411_s1 + $0x8] sm:$0xf]  ;;  %v464_v4 = vsel %vm312_vm0, %v1902_v2, 0  ;;  %v1920_v6 = vld [vmem:[%s2411_s1 + $0xc] sm:$0xf] }
   0xd   : > { %1978 = vmatpush.bf16.msra.mxu1 %v314_v1  ;;  %1979 = vmatpush.bf16.msra.mxu2 %v314_v1  ;;  %v614_v5 = vsel %vm312_vm0, %v1911_v3, 0  ;;  %v764_v7 = vsel %vm312_vm0, %v1920_v6, 0  ;;  %v1929_v8 = vld [vmem:[%s2411_s1 + $0x10] sm:$0xf]  ;;  %s1981_s27 = smul.u32 168, %s2416_s16  ;;  %vm287_vm1 = vcmask 64512  }
   0xe   : > { %1980 = vmatpush.bf16.msra.mxu3 %v314_v1  ;;  %v914_v9 = vsel %vm312_vm0, %v1929_v8, 0  ;;  %323 = vmatpush.bf16.msra.mxu0 %v314_v1  ;;  %v1938_v22 = vld [vmem:[%s2411_s1 + $0x14] sm:$0xf]  ;;  %v1947_v23 = vld [vmem:[%s2411_s1 + $0x18] sm:$0xf]  ;;  %s1976_s13 = sshll.u32 %s2416_s16, 7 }
   0xf   : > { %s2063_s30 = scalar_lea.vmem %s2410_s0, %s1981_s27  ;;  %v1064_v24 = vsel %vm312_vm0, %v1938_v22, 0  ;;  %v1214_v25 = vsel %vm312_vm0, %v1947_v23, 0  ;;  %v1956_v26 = vld [vmem:[%s2411_s1 + $0x1c] sm:$0xf]  ;;  %v1965_v40 = vld [vmem:[%s2411_s1 + $0x20] sm:$0xf]  ;;  %s2211_s18 = scalar_lea.vmem %s2412_s2, %s1976_s13 }
  0x10   : > { %v250_v10 = vld [vmem:[%s2063_s30 + $0x20] sm:$0xff]  ;;  %v251_v11 = vld [vmem:[%s2063_s30 + $0x28] sm:$0xff]  ;;  %v1364_v27 = vsel %vm312_vm0, %v1956_v26, 0  ;;  %v252_v28 = vld [vmem:[%s2063_s30 + $0x30] sm:$0xff]  ;;  %v1514_v41 = vsel %vm312_vm0, %v1965_v40, 0  ;;  %s2370_s21 = scalar_lea.vmem %s2413_s3, %s1976_s13  ;;  %s1893_s22 = sshll.u32 %s2416_s16, 1 }
  0x11   : > { %473 = vmatpush.bf16.msrb.mxu1 %v464_v4  ;;  %623 = vmatpush.bf16.msrb.mxu2 %v614_v5  ;;  %v254_v12 = vld [vmem:[%s2063_s30 + $0x40] sm:$0xff]  ;;  %v264_v13 = vpack.c.bf16 %v251_v11, %v250_v10  ;;  %v255_v14 = vld [vmem:[%s2063_s30 + $0x48] sm:$0xff]  ;;  %v253_v29 = vld [vmem:[%s2063_s30 + $0x38] sm:$0xff]  ;;  %s228_s25 = scalar_lea.vmem %s2414_s4, %s1893_s22 }
  0x12   : > { %773 = vmatpush.bf16.msrb.mxu3 %v764_v7  ;;  %923 = vmatpush.bf16.msrb.mxu0 %v914_v9  ;;  %v258_v15 = vld [vmem:[%s2063_s30 + $0x60] sm:$0xff]  ;;  %v259_v16 = vld [vmem:[%s2063_s30 + $0x68] sm:$0xff]  ;;  %v266_v17 = vpack.c.bf16 %v255_v14, %v254_v12  ;;  %v256_v30 = vld [vmem:[%s2063_s30 + $0x50] sm:$0xff]  ;;  %v265_v34 = vpack.c.bf16 %v253_v29, %v252_v28 }
  0x13   : > { %v268_v18 = vpack.c.bf16 %v259_v16, %v258_v15  ;;  %1896 = vmatmul.msk.bf16.vlgmr.msra.gmra.mxu1 %vm287_vm1, %v264_v13  ;;  %v246_v19 = vld [vmem:[%s2063_s30] sm:$0xff]  ;;  %v247_v20 = vld [vmem:[%s2063_s30 + $0x8] sm:$0xff]  ;;  %v257_v31 = vld [vmem:[%s2063_s30 + $0x58] sm:$0xff] }
  0x14   : > { %1898 = vmatmul.msk.bf16.vlgmr.msra.gmra.mxu2 %vm287_vm1, %v266_v17  ;;  %v262_v21 = vpack.c.bf16 %v247_v20, %v246_v19  ;;  %v260_v32 = vld [vmem:[%s2063_s30 + $0x70] sm:$0xff]  ;;  %v261_v33 = vld [vmem:[%s2063_s30 + $0x78] sm:$0xff]  ;;  %v267_v37 = vpack.c.bf16 %v257_v31, %v256_v30  ;;  %v397_v42 = vld [vmem:[%s2063_s30 + $0x1] sm:$0xff] }
  0x15   : > { %1900 = vmatmul.msk.bf16.vlgmr.msra.gmra.mxu3 %vm287_vm1, %v268_v18  ;;  %1073 = vmatpush.bf16.msra.mxu1 %v1064_v24  ;;  %v248_v35 = vld [vmem:[%s2063_s30 + $0x10] sm:$0xff]  ;;  %v249_v36 = vld [vmem:[%s2063_s30 + $0x18] sm:$0xff]  ;;  %v269_v38 = vpack.c.bf16 %v261_v33, %v260_v32  ;;  %v547_v44 = vld [vmem:[%s2063_s30 + $0x2] sm:$0xff] }
  0x16   : > { %1894 = vmatmul.msk.bf16.vlgmr.msra.gmra.mxu0 %vm287_vm1, %v262_v21  ;;  %1223 = vmatpush.bf16.msra.mxu2 %v1214_v25  ;;  %v263_v39 = vpack.c.bf16 %v249_v36, %v248_v35  ;;  %v398_v43 = vld [vmem:[%s2063_s30 + $0x9] sm:$0xff]  ;;  %v697_v46 = vld [vmem:[%s2063_s30 + $0x12] sm:$0xff]  ;;  %v698_v47 = vld [vmem:[%s2063_s30 + $0x1a] sm:$0xff] }
  0x17   : > { %1373 = vmatpush.bf16.msra.mxu3 %v1364_v27  ;;  %1523 = vmatpush.bf16.msra.mxu0 %v1514_v41  ;;  %v548_v45 = vld [vmem:[%s2063_s30 + $0xa] sm:$0xff]  ;;  %v413_v48 = vpack.c.bf16 %v398_v43, %v397_v42  ;;  %v847_v49 = vld [vmem:[%s2063_s30 + $0x13] sm:$0xff]  ;;  %v848_v50 = vld [vmem:[%s2063_s30 + $0x1b] sm:$0xff]  ;;  %v713_v52 = vpack.c.bf16 %v698_v47, %v697_v46 }
  0x18   : > { %v563_v51 = vpack.c.bf16 %v548_v45, %v547_v44  ;;  %v863_v53 = vpack.c.bf16 %v848_v50, %v847_v49  ;;  %v399_v54 = vld [vmem:[%s2063_s30 + $0x11] sm:$0xff]  ;;  %v400_v55 = vld [vmem:[%s2063_s30 + $0x19] sm:$0xff]  ;;  %v699_v56 = vld [vmem:[%s2063_s30 + $0x22] sm:$0xff] }
  0x19   : > { %v700_v57 = vld [vmem:[%s2063_s30 + $0x2a] sm:$0xff]  ;;  %v414_v58 = vpack.c.bf16 %v400_v55, %v399_v54  ;;  %v401_v63 = vld [vmem:[%s2063_s30 + $0x21] sm:$0xff]  ;;  %v701_v1 = vld [vmem:[%s2063_s30 + $0x32] sm:$0xff] }
  0x1a   : > { %v849_v59 = vld [vmem:[%s2063_s30 + $0x23] sm:$0xff]  ;;  %v850_v60 = vld [vmem:[%s2063_s30 + $0x2b] sm:$0xff]  ;;  %v714_v61 = vpack.c.bf16 %v700_v57, %v699_v56  ;;  %v702_v2 = vld [vmem:[%s2063_s30 + $0x3a] sm:$0xff] }
  0x1b   : > { %v864_v62 = vpack.c.bf16 %v850_v60, %v849_v59  ;;  %v402_v0 = vld [vmem:[%s2063_s30 + $0x29] sm:$0xff]  ;;  %v851_v4 = vld [vmem:[%s2063_s30 + $0x33] sm:$0xff]  ;;  %v852_v5 = vld [vmem:[%s2063_s30 + $0x3b] sm:$0xff]  ;;  %v715_v6 = vpack.c.bf16 %v702_v2, %v701_v1  ;;  %v2003_v2 = vmov 0  }
  0x1c   : > { %v415_v3 = vpack.c.bf16 %v402_v0, %v401_v63  ;;  %v865_v7 = vpack.c.bf16 %v852_v5, %v851_v4  ;;  %v403_v8 = vld [vmem:[%s2063_s30 + $0x31] sm:$0xff]  ;;  %v404_v9 = vld [vmem:[%s2063_s30 + $0x39] sm:$0xff]  ;;  %v703_v10 = vld [vmem:[%s2063_s30 + $0x42] sm:$0xff]  ;;  %1992 = vset.pattern.permute.xlu0 %v2003_v2  ;;  %1993 = vset.pattern.permute.xlu1 %v2003_v2 }
  0x1d   : > { %v704_v11 = vld [vmem:[%s2063_s30 + $0x4a] sm:$0xff]  ;;  %v416_v12 = vpack.c.bf16 %v404_v9, %v403_v8  ;;  %v405_v17 = vld [vmem:[%s2063_s30 + $0x41] sm:$0xff]  ;;  %v705_v19 = vld [vmem:[%s2063_s30 + $0x52] sm:$0xff]  ;;  %1994 = vset.pattern.permute.xlu2 %v2003_v2 }
  0x1e   : > { %v853_v13 = vld [vmem:[%s2063_s30 + $0x43] sm:$0xff]  ;;  %v854_v14 = vld [vmem:[%s2063_s30 + $0x4b] sm:$0xff]  ;;  %v716_v15 = vpack.c.bf16 %v704_v11, %v703_v10  ;;  %v706_v20 = vld [vmem:[%s2063_s30 + $0x5a] sm:$0xff] }
  0x1f   : > { %v866_v16 = vpack.c.bf16 %v854_v14, %v853_v13  ;;  %v406_v18 = vld [vmem:[%s2063_s30 + $0x49] sm:$0xff]  ;;  %v855_v22 = vld [vmem:[%s2063_s30 + $0x53] sm:$0xff]  ;;  %v856_v23 = vld [vmem:[%s2063_s30 + $0x5b] sm:$0xff]  ;;  %v717_v24 = vpack.c.bf16 %v706_v20, %v705_v19 }
  0x20   : > { %v417_v21 = vpack.c.bf16 %v406_v18, %v405_v17  ;;  %v867_v25 = vpack.c.bf16 %v856_v23, %v855_v22  ;;  %v407_v26 = vld [vmem:[%s2063_s30 + $0x51] sm:$0xff]  ;;  %v408_v27 = vld [vmem:[%s2063_s30 + $0x59] sm:$0xff]  ;;  %v707_v28 = vld [vmem:[%s2063_s30 + $0x62] sm:$0xff] }
  0x21   : > { %v708_v29 = vld [vmem:[%s2063_s30 + $0x6a] sm:$0xff]  ;;  %v418_v30 = vpack.c.bf16 %v408_v27, %v407_v26  ;;  %v409_v35 = vld [vmem:[%s2063_s30 + $0x61] sm:$0xff]  ;;  %v859_v40 = vld [vmem:[%s2063_s30 + $0x73] sm:$0xff] }
  0x22   : > { %v857_v31 = vld [vmem:[%s2063_s30 + $0x63] sm:$0xff]  ;;  %v858_v32 = vld [vmem:[%s2063_s30 + $0x6b] sm:$0xff]  ;;  %v718_v33 = vpack.c.bf16 %v708_v29, %v707_v28  ;;  %v860_v41 = vld [vmem:[%s2063_s30 + $0x7b] sm:$0xff] }
  0x23   : > { %1897 = vmatmul.msk.bf16.gmra.mxu1 %vm287_vm1, %v265_v34  ;;  %v868_v34 = vpack.c.bf16 %v858_v32, %v857_v31  ;;  %v410_v36 = vld [vmem:[%s2063_s30 + $0x69] sm:$0xff]  ;;  %v869_v44 = vpack.c.bf16 %v860_v41, %v859_v40  ;;  %v411_v50 = vld [vmem:[%s2063_s30 + $0x71] sm:$0xff] }
  0x24   : > { %1899 = vmatmul.msk.bf16.gmra.mxu2 %vm287_vm1, %v267_v37  ;;  %v709_v37 = vld [vmem:[%s2063_s30 + $0x72] sm:$0xff]  ;;  %v861_v57 = vld [vmem:[%s2063_s30 + $0x83] sm:$0xff] }
  0x25   : > { %1901 = vmatmul.msk.bf16.gmra.mxu3 %vm287_vm1, %v269_v38  ;;  %v710_v38 = vld [vmem:[%s2063_s30 + $0x7a] sm:$0xff]  ;;  %v1148_v8 = vld [vmem:[%s2063_s30 + $0x2c] sm:$0xff] }
  0x26   : > { %1895 = vmatmul.msk.bf16.gmra.mxu0 %vm287_vm1, %v263_v39  ;;  %v419_v39 = vpack.c.bf16 %v410_v36, %v409_v35  ;;  %v719_v43 = vpack.c.bf16 %v710_v38, %v709_v37  ;;  %v997_v5 = vld [vmem:[%s2063_s30 + $0x14] sm:$0xff]  ;;  %v1297_v9 = vld [vmem:[%s2063_s30 + $0x25] sm:$0xff]  ;;  %v1300_v35 = vld [vmem:[%s2063_s30 + $0x3d] sm:$0xff] }
  0x27   : > { %v1298_v10 = vld [vmem:[%s2063_s30 + $0x2d] sm:$0xff]  ;;  %v1449_v38 = vld [vmem:[%s2063_s30 + $0x36] sm:$0xff] }
  0x28   : > { %v1447_v14 = vld [vmem:[%s2063_s30 + $0x26] sm:$0xff]  ;;  %v1313_v18 = vpack.c.bf16 %v1298_v10, %v1297_v9  ;;  %v1615_v29 = vld [vmem:[%s2211_s18 + $0x10] sm:$0xff] }
  0x29   : > { %1641 = vperm.xlu1 %1993, %v1615_v29   ;;  %v1149_v31 = vld [vmem:[%s2063_s30 + $0x34] sm:$0xff] }
  0x33   : > { %1903 = vmatmul.msk.bf16.vlgmr.msrb.gmra.mxu1 %vm287_vm1, %v413_v48 }
  0x34   : > { %1912 = vmatmul.msk.bf16.vlgmr.msrb.gmra.mxu2 %vm287_vm1, %v563_v51  ;;  %v412_v51 = vld [vmem:[%s2063_s30 + $0x79] sm:$0xff] }
  0x35   : > { %1921 = vmatmul.msk.bf16.vlgmr.msrb.gmra.mxu3 %vm287_vm1, %v713_v52  ;;  %v420_v55 = vpack.c.bf16 %v412_v51, %v411_v50  ;;  %v1616_v51 = vld [vmem:[%s2211_s18 + $0x18] sm:$0xff] }
  0x36   : > { %1930 = vmatmul.msk.bf16.vlgmr.msrb.gmra.mxu0 %vm287_vm1, %v863_v53  ;;  %v712_v53 = vld [vmem:[%s2063_s30 + $0x8a] sm:$0xff]  ;;  %1646 = vperm.xlu1 %1993, %v1616_v51   ;;  %v1620_v51 = vld [vmem:[%s2211_s18 + $0x38] sm:$0xff] }
  0x3e   : > { %1666 = vperm.xlu1 %1993, %v1620_v51  }
  0x43   : > { %1904 = vmatmul.msk.bf16.gmra.mxu1 %vm287_vm1, %v414_v58  ;;  %v862_v58 = vld [vmem:[%s2063_s30 + $0x8b] sm:$0xff] }
  0x44   : > { %1913 = vmatmul.msk.bf16.gmra.mxu2 %vm287_vm1, %v713_v52  ;;  %v711_v52 = vld [vmem:[%s2063_s30 + $0x82] sm:$0xff] }
  0x45   : > { %1922 = vmatmul.msk.bf16.gmra.mxu3 %vm287_vm1, %v714_v61  ;;  %v720_v60 = vpack.c.bf16 %v712_v53, %v711_v52 }
  0x46   : > { %1931 = vmatmul.msk.bf16.gmra.mxu0 %vm287_vm1, %v864_v62 }
  0x53   : > { %1905 = vmatmul.msk.bf16.gmra.mxu1 %vm287_vm1, %v415_v3  ;;  %v1613_v3 = vld [vmem:[%s2211_s18] sm:$0xff] }
  0x54   : > { %1914 = vmatmul.msk.bf16.gmra.mxu2 %vm287_vm1, %v714_v61  ;;  %v870_v61 = vpack.c.bf16 %v862_v58, %v861_v57  ;;  %1631 = vperm.xlu0 %1992, %v1613_v3   ;;  %v1151_v3 = vld [vmem:[%s2063_s30 + $0x44] sm:$0xff] }
  0x55   : > { %1923 = vmatmul.msk.bf16.gmra.mxu3 %vm287_vm1, %v715_v6 }
  0x56   : > { %1932 = vmatmul.msk.bf16.gmra.mxu0 %vm287_vm1, %v865_v7  ;;  %v1147_v7 = vld [vmem:[%s2063_s30 + $0x24] sm:$0xff] }
  0x57   : > { %v1163_v17 = vpack.c.bf16 %v1148_v8, %v1147_v7  ;;  %v1301_v7 = vld [vmem:[%s2063_s30 + $0x45] sm:$0xff]  ;;  %v1302_v8 = vld [vmem:[%s2063_s30 + $0x4d] sm:$0xff] }
  0x63   : > { %1906 = vmatmul.msk.bf16.gmra.mxu1 %vm287_vm1, %v416_v12 }
  0x64   : > { %1915 = vmatmul.msk.bf16.gmra.mxu2 %vm287_vm1, %v715_v6  ;;  %v998_v6 = vld [vmem:[%s2063_s30 + $0x1c] sm:$0xff] }
  0x65   : > { %1924 = vmatmul.msk.bf16.gmra.mxu3 %vm287_vm1, %v716_v15  ;;  %v1013_v12 = vpack.c.bf16 %v998_v6, %v997_v5  ;;  %v1152_v6 = vld [vmem:[%s2063_s30 + $0x4c] sm:$0xff] }
  0x66   : > { %1933 = vmatmul.msk.bf16.gmra.mxu0 %vm287_vm1, %v866_v16 }
  0x73   : > { %1907 = vmatmul.msk.bf16.gmra.mxu1 %vm287_vm1, %v417_v21  ;;  %v1614_v21 = vld [vmem:[%s2211_s18 + $0x8] sm:$0xff] }
  0x74   : > { %1916 = vmatmul.msk.bf16.gmra.mxu2 %vm287_vm1, %v716_v15  ;;  %v1448_v15 = vld [vmem:[%s2063_s30 + $0x2e] sm:$0xff]  ;;  %1636 = vperm.xlu0 %1992, %v1614_v21  }
  0x75   : > { %1925 = vmatmul.msk.bf16.gmra.mxu3 %vm287_vm1, %v717_v24  ;;  %v1463_v20 = vpack.c.bf16 %v1448_v15, %v1447_v14  ;;  %v1452_v14 = vld [vmem:[%s2063_s30 + $0x4e] sm:$0xff] }
  0x76   : > { %1934 = vmatmul.msk.bf16.gmra.mxu0 %vm287_vm1, %v867_v25 }
  0x83   : > { %1908 = vmatmul.msk.bf16.gmra.mxu1 %vm287_vm1, %v418_v30 }
  0x84   : > { %1917 = vmatmul.msk.bf16.gmra.mxu2 %vm287_vm1, %v717_v24 }
  0x85   : > { %1926 = vmatmul.msk.bf16.gmra.mxu3 %vm287_vm1, %v718_v33 }
  0x86   : > { %1935 = vmatmul.msk.bf16.gmra.mxu0 %vm287_vm1, %v868_v34  ;;  %v1299_v34 = vld [vmem:[%s2063_s30 + $0x35] sm:$0xff] }
  0x90   : > { %v2173_v42 = vpop.f32.mrf.mxu1 }
  0x93   : > { %1909 = vmatmul.msk.bf16.gmra.mxu1 %vm287_vm1, %v419_v39  ;;  %v325_v45 = vpop.f32.mrf.mxu0  ;;  %v1450_v39 = vld [vmem:[%s2063_s30 + $0x3e] sm:$0xff] }
  0x94   : > { %1918 = vmatmul.msk.bf16.gmra.mxu2 %vm287_vm1, %v718_v33  ;;  %v1150_v33 = vld [vmem:[%s2063_s30 + $0x3c] sm:$0xff]  ;;  %v1464_v50 = vpack.c.bf16 %v1450_v39, %v1449_v38 }
  0x95   : > { %1927 = vmatmul.msk.bf16.gmra.mxu3 %vm287_vm1, %v719_v43  ;;  %v1453_v38 = vld [vmem:[%s2063_s30 + $0x56] sm:$0xff]  ;;  %v1454_v39 = vld [vmem:[%s2063_s30 + $0x5e] sm:$0xff] }
  0x96   : > { %1936 = vmatmul.msk.bf16.gmra.mxu0 %vm287_vm1, %v869_v44  ;;  %v1314_v44 = vpack.c.bf16 %v1300_v35, %v1299_v34  ;;  %v1303_v34 = vld [vmem:[%s2063_s30 + $0x55] sm:$0xff]  ;;  %v1304_v35 = vld [vmem:[%s2063_s30 + $0x5d] sm:$0xff] }
  0x97   : > { %v2179_v46 = vpop.f32.mrf.mxu2 }
  0x98   : > { %v2181_v47 = vpop.f32.mrf.mxu3  ;;  %v2183_v48 = vpop.f32.mrf.mxu1 }
  0x9b   : > { %v327_v49 = vpop.f32.mrf.mxu0 }
  0x9f   : > { %v2189_v54 = vpop.f32.mrf.mxu2 }
  0xa0   : > { %v2191_v56 = vpop.f32.mrf.mxu3  ;;  %v2195_v59 = vpop.f32.mrf.mxu1 }
  0xa3   : > { %1910 = vmatmul.msk.bf16.gmra.mxu1 %vm287_vm1, %v420_v55  ;;  %v330_v62 = vpop.f32.mrf.mxu0 }
  0xa4   : > { %1919 = vmatmul.msk.bf16.gmra.mxu2 %vm287_vm1, %v719_v43  ;;  %v1164_v43 = vpack.c.bf16 %v1150_v33, %v1149_v31  ;;  %v1154_v33 = vld [vmem:[%s2063_s30 + $0x5c] sm:$0xff] }
  0xa5   : > { %1928 = vmatmul.msk.bf16.gmra.mxu3 %vm287_vm1, %v720_v60 }
  0xa6   : > { %1937 = vmatmul.msk.bf16.gmra.mxu0 %vm287_vm1, %v870_v61 }
  0xa7   : > { %v2202_v63 = vpop.f32.mrf.mxu2 }
  0xa8   : > { %v2204_v0 = vpop.f32.mrf.mxu3  ;;  %v2213_v1 = vpop.f32.mrf.mxu1 }
  0xab   : > { %v2216_v4 = vpop.f32.mrf.mxu0 }
  0xaf   : > { %v2224_v11 = vpop.f32.mrf.mxu2 }
  0xb0   : > { %v2226_v13 = vpop.f32.mrf.mxu3  ;;  %v475_v16 = vpop.f32.mrf.mxu1 }
  0xb1   : > { %v515_v19 = vadd.f32 %v475_v16, %v325_v45 }
  0xb3   : > { %1939 = vmatmul.msk.bf16.vlgmr.msra.gmra.mxu1 %vm287_vm1, %v1013_v12  ;;  %v925_v22 = vpop.f32.mrf.mxu0  ;;  %v1451_v12 = vld [vmem:[%s2063_s30 + $0x46] sm:$0xff] }
  0xb4   : > { %1948 = vmatmul.msk.bf16.vlgmr.msra.gmra.mxu2 %vm287_vm1, %v1163_v17 }
  0xb5   : > { %1957 = vmatmul.msk.bf16.vlgmr.msra.gmra.mxu3 %vm287_vm1, %v1313_v18  ;;  %v1315_v18 = vpack.c.bf16 %v1302_v8, %v1301_v7  ;;  %v1155_v7 = vld [vmem:[%s2063_s30 + $0x64] sm:$0xff] }
  0xb6   : > { %1966 = vmatmul.msk.bf16.vlgmr.msra.gmra.mxu0 %vm287_vm1, %v1463_v20  ;;  %v1465_v20 = vpack.c.bf16 %v1452_v14, %v1451_v12  ;;  %v1306_v12 = vld [vmem:[%s2063_s30 + $0x6d] sm:$0xff] }
  0xb7   : > { %v625_v23 = vpop.f32.mrf.mxu2 }
  0xb8   : > { %v775_v24 = vpop.f32.mrf.mxu3  ;;  %v665_v25 = vadd.f32 %v625_v23, %v515_v19  ;;  %v477_v26 = vpop.f32.mrf.mxu1 }
  0xb9   : > { %v516_v27 = vadd.f32 %v477_v26, %v327_v49 }
  0xba   : > { %v815_v28 = vadd.f32 %v775_v24, %v665_v25 }
  0xbb   : > { %v927_v30 = vpop.f32.mrf.mxu0 }
  0xbc   : > { %v2237_v32 = vadd.f32 %v925_v22, %v815_v28  ;;  %v1619_v28 = vld [vmem:[%s2211_s18 + $0x30] sm:$0xff] }
  0xbd   : > { %1661 = vperm.xlu0 %1992, %v1619_v28  }
  0xbf   : > { %v627_v36 = vpop.f32.mrf.mxu2 }
  0xc0   : > { %v777_v37 = vpop.f32.mrf.mxu3  ;;  %v666_v40 = vadd.f32 %v627_v36, %v516_v27  ;;  %v480_v41 = vpop.f32.mrf.mxu1 }
  0xc1   : > { %v517_v45 = vadd.f32 %v480_v41, %v330_v62 }
  0xc2   : > { %v816_v49 = vadd.f32 %v777_v37, %v666_v40 }
  0xc3   : > { %1940 = vmatmul.msk.bf16.gmra.mxu1 %vm287_vm1, %v1163_v17  ;;  %v930_v52 = vpop.f32.mrf.mxu0  ;;  %v1165_v17 = vpack.c.bf16 %v1152_v6, %v1151_v3  ;;  %v1622_v3 = vld [vmem:[%s2211_s18 + $0x48] sm:$0xff] }
  0xc4   : > { %1949 = vmatmul.msk.bf16.gmra.mxu2 %vm287_vm1, %v1164_v43  ;;  %v2248_v53 = vadd.f32 %v927_v30, %v816_v49  ;;  %v1153_v30 = vld [vmem:[%s2063_s30 + $0x54] sm:$0xff]  ;;  %v1466_v49 = vpack.c.bf16 %v1454_v39, %v1453_v38  ;;  %v1158_v38 = vld [vmem:[%s2063_s30 + $0x7c] sm:$0xff] }
  0xc5   : > { %1958 = vmatmul.msk.bf16.gmra.mxu3 %vm287_vm1, %v1314_v44  ;;  %1676 = vperm.xlu0 %1992, %v1622_v3   ;;  %v1307_v39 = vld [vmem:[%s2063_s30 + $0x75] sm:$0xff] }
  0xc6   : > { %1967 = vmatmul.msk.bf16.gmra.mxu0 %vm287_vm1, %v1464_v50  ;;  %v1617_v50 = vld [vmem:[%s2211_s18 + $0x20] sm:$0xff] }
  0xc7   : > { %v630_v55 = vpop.f32.mrf.mxu2  ;;  %1651 = vperm.xlu2 %1994, %v1617_v50  }
  0xc8   : > { %v780_v57 = vpop.f32.mrf.mxu3  ;;  %v667_v58 = vadd.f32 %v630_v55, %v517_v45  ;;  %v482_v60 = vpop.f32.mrf.mxu1 }
  0xc9   : > { %v518_v61 = vadd.f32 %v482_v60, %v2216_v4 }
  0xca   : > { %v817_v62 = vadd.f32 %v780_v57, %v667_v58 }
  0xcb   : > { %v932_v2 = vpop.f32.mrf.mxu0 }
  0xcc   : > { %v2253_v5 = vadd.f32 %v930_v52, %v817_v62 }
  0xcf   : > { %v632_v9 = vpop.f32.mrf.mxu2 }
  0xd0   : > { %v782_v10 = vpop.f32.mrf.mxu3  ;;  %v668_v15 = vadd.f32 %v632_v9, %v518_v61  ;;  %v485_v16 = vpop.f32.mrf.mxu1  ;;  %v1156_v9 = vld [vmem:[%s2063_s30 + $0x6c] sm:$0xff] }
  0xd1   : > { %v519_v19 = vadd.f32 %v485_v16, %v2173_v42  ;;  %v1455_v16 = vld [vmem:[%s2063_s30 + $0x66] sm:$0xff] }
  0xd2   : > { %v818_v4 = vadd.f32 %v782_v10, %v668_v15  ;;  %v1305_v10 = vld [vmem:[%s2063_s30 + $0x65] sm:$0xff] }
  0xd3   : > { %1941 = vmatmul.msk.bf16.gmra.mxu1 %vm287_vm1, %v1164_v43  ;;  %v935_v21 = vpop.f32.mrf.mxu0  ;;  %v1166_v43 = vpack.c.bf16 %v1154_v33, %v1153_v30 }
  0xd4   : > { %1950 = vmatmul.msk.bf16.gmra.mxu2 %vm287_vm1, %v1165_v17  ;;  %v2264_v22 = vadd.f32 %v932_v2, %v818_v4  ;;  %v1618_v2 = vld [vmem:[%s2211_s18 + $0x28] sm:$0xff]  ;;  %v1317_v4 = vpack.c.bf16 %v1306_v12, %v1305_v10 }
  0xd5   : > { %1959 = vmatmul.msk.bf16.gmra.mxu3 %vm287_vm1, %v1315_v18  ;;  %1656 = vperm.xlu2 %1994, %v1618_v2   ;;  %v1159_v10 = vld [vmem:[%s2063_s30 + $0x84] sm:$0xff] }
  0xd6   : > { %1968 = vmatmul.msk.bf16.gmra.mxu0 %vm287_vm1, %v1465_v20 }
  0xd7   : > { %v635_v23 = vpop.f32.mrf.mxu2 }
  0xd8   : > { %v785_v42 = vpop.f32.mrf.mxu3  ;;  %v669_v24 = vadd.f32 %v635_v23, %v519_v19  ;;  %v487_v25 = vpop.f32.mrf.mxu1  ;;  %v1167_v19 = vpack.c.bf16 %v1156_v9, %v1155_v7 }
  0xd9   : > { %v520_v26 = vadd.f32 %v487_v25, %v2183_v48  ;;  %v1316_v48 = vpack.c.bf16 %v1304_v35, %v1303_v34  ;;  %v1628_v34 = vld [vmem:[%s2211_s18 + $0x78] sm:$0xff] }
  0xda   : > { %v819_v27 = vadd.f32 %v785_v42, %v669_v24  ;;  %v1625_v42 = vld [vmem:[%s2211_s18 + $0x60] sm:$0xff] }
  0xdb   : > { %v937_v29 = vpop.f32.mrf.mxu0  ;;  %1691 = vperm.xlu0 %1992, %v1625_v42   ;;  %v1624_v42 = vld [vmem:[%s2211_s18 + $0x58] sm:$0xff] }
  0xdc   : > { %v2270_v31 = vadd.f32 %v935_v21, %v819_v27 }
  0xdf   : > { %v637_v36 = vpop.f32.mrf.mxu2 }
  0xe0   : > { %v787_v37 = vpop.f32.mrf.mxu3  ;;  %v670_v40 = vadd.f32 %v637_v36, %v520_v26  ;;  %v490_v41 = vpop.f32.mrf.mxu1  ;;  %v1157_v36 = vld [vmem:[%s2063_s30 + $0x74] sm:$0xff] }
  0xe1   : > { %v521_v44 = vadd.f32 %v490_v41, %v2195_v59  ;;  %v1626_v41 = vld [vmem:[%s2211_s18 + $0x68] sm:$0xff] }
  0xe2   : > { %v820_v45 = vadd.f32 %v787_v37, %v670_v40  ;;  %v1308_v40 = vld [vmem:[%s2063_s30 + $0x7d] sm:$0xff] }
  0xe3   : > { %1942 = vmatmul.msk.bf16.gmra.mxu1 %vm287_vm1, %v1165_v17  ;;  %v940_v52 = vpop.f32.mrf.mxu0  ;;  %v1456_v17 = vld [vmem:[%s2063_s30 + $0x6e] sm:$0xff]  ;;  %1706 = vperm.xlu0 %1992, %v1628_v34   ;;  %v1318_v51 = vpack.c.bf16 %v1308_v40, %v1307_v39  ;;  %v1162_v40 = vld [vmem:[%s2063_s30 + $0x9c] sm:$0xff] }
  0xe4   : > { %1951 = vmatmul.msk.bf16.gmra.mxu2 %vm287_vm1, %v1166_v43  ;;  %v2283_v55 = vadd.f32 %v937_v29, %v820_v45  ;;  %v1467_v23 = vpack.c.bf16 %v1456_v17, %v1455_v16  ;;  %v1458_v45 = vld [vmem:[%s2063_s30 + $0x7e] sm:$0xff]  ;;  %v1310_v16 = vld [vmem:[%s2063_s30 + $0x8d] sm:$0xff] }
  0xe5   : > { %1960 = vmatmul.msk.bf16.gmra.mxu3 %vm287_vm1, %v1316_v48 }
  0xe6   : > { %1969 = vmatmul.msk.bf16.gmra.mxu0 %vm287_vm1, %v1466_v49 }
  0xe7   : > { %v640_v59 = vpop.f32.mrf.mxu2 }
  0xe8   : > { %v790_v57 = vpop.f32.mrf.mxu3  ;;  %v671_v58 = vadd.f32 %v640_v59, %v521_v44  ;;  %v492_v60 = vpop.f32.mrf.mxu1  ;;  %v1457_v44 = vld [vmem:[%s2063_s30 + $0x76] sm:$0xff] }
  0xe9   : > { %v522_v61 = vadd.f32 %v492_v60, %v2213_v1 }
  0xea   : > { %v821_v62 = vadd.f32 %v790_v57, %v671_v58  ;;  %v1468_v57 = vpack.c.bf16 %v1458_v45, %v1457_v44  ;;  %v1621_v58 = vld [vmem:[%s2211_s18 + $0x40] sm:$0xff]  ;;  %v1461_v45 = vld [vmem:[%s2063_s30 + $0x96] sm:$0xff] }
  0xeb   : > { %v942_v6 = vpop.f32.mrf.mxu0  ;;  %1671 = vperm.xlu2 %1994, %v1621_v58  }
  0xec   : > { %v2290_v8 = vadd.f32 %v940_v52, %v821_v62 }
  0xef   : > { %v642_v14 = vpop.f32.mrf.mxu2 }
  0xf0   : > { %v792_v15 = vpop.f32.mrf.mxu3  ;;  %v672_v18 = vadd.f32 %v642_v14, %v522_v61  ;;  %v495_v1 = vpop.f32.mrf.mxu1  ;;  %v1160_v14 = vld [vmem:[%s2063_s30 + $0x8c] sm:$0xff] }
  0xf1   : > { %v523_v20 = vadd.f32 %v495_v1, %v2179_v46  ;;  %v1623_v46 = vld [vmem:[%s2211_s18 + $0x50] sm:$0xff]  ;;  %v1459_v1 = vld [vmem:[%s2063_s30 + $0x86] sm:$0xff] }
  0xf2   : > { %v822_v21 = vadd.f32 %v792_v15, %v672_v18  ;;  %1681 = vperm.xlu1 %1993, %v1623_v46   ;;  %v1309_v15 = vld [vmem:[%s2063_s30 + $0x85] sm:$0xff] }
  0xf3   : > { %1943 = vmatmul.msk.bf16.gmra.mxu1 %vm287_vm1, %v1166_v43  ;;  %v945_v24 = vpop.f32.mrf.mxu0  ;;  %1686 = vperm.xlu2 %1994, %v1624_v42  }
  0xf4   : > { %1952 = vmatmul.msk.bf16.gmra.mxu2 %vm287_vm1, %v1167_v19  ;;  %v2302_v25 = vadd.f32 %v942_v6, %v822_v21  ;;  %v1169_v21 = vpack.c.bf16 %v1160_v14, %v1159_v10 }
  0xf5   : > { %1961 = vmatmul.msk.bf16.gmra.mxu3 %vm287_vm1, %v1317_v4 }
  0xf6   : > { %1970 = vmatmul.msk.bf16.gmra.mxu0 %vm287_vm1, %v1467_v23  ;;  %v1319_v23 = vpack.c.bf16 %v1310_v16, %v1309_v15 }
  0xf7   : > { %v645_v26 = vpop.f32.mrf.mxu2 }
  0xf8   : > { %v795_v27 = vpop.f32.mrf.mxu3  ;;  %v673_v28 = vadd.f32 %v645_v26, %v523_v20  ;;  %v497_v29 = vpop.f32.mrf.mxu1 }
  0xf9   : > { %v524_v30 = vadd.f32 %v497_v29, %v2189_v54  ;;  %v1168_v54 = vpack.c.bf16 %v1158_v38, %v1157_v36  ;;  %v1161_v38 = vld [vmem:[%s2063_s30 + $0x94] sm:$0xff] }
  0xfa   : > { %v823_v33 = vadd.f32 %v795_v27, %v673_v28  ;;  %1696 = vperm.xlu1 %1993, %v1626_v41   ;;  %v1311_v41 = vld [vmem:[%s2063_s30 + $0x95] sm:$0xff] }
  0xfb   : > { %v947_v35 = vpop.f32.mrf.mxu0 }
  0xfc   : > { %v2309_v37 = vadd.f32 %v945_v24, %v823_v33  ;;  %v1627_v33 = vld [vmem:[%s2211_s18 + $0x70] sm:$0xff] }
  0xfd   : > { %1701 = vperm.xlu2 %1994, %v1627_v33  }
  0xff   : > { %v647_v43 = vpop.f32.mrf.mxu2 }
 0x100   : > { %v797_v48 = vpop.f32.mrf.mxu3  ;;  %v674_v49 = vadd.f32 %v647_v43, %v524_v30  ;;  %v500_v50 = vpop.f32.mrf.mxu1  ;;  %v1312_v43 = vld [vmem:[%s2063_s30 + $0x9d] sm:$0xff] }
 0x101   : > { %v525_v52 = vadd.f32 %v500_v50, %v2202_v63 }
 0x102   : > { %v824_v59 = vadd.f32 %v797_v48, %v674_v49  ;;  %v1462_v49 = vld [vmem:[%s2063_s30 + $0x9e] sm:$0xff] }
 0x103   : > { %1944 = vmatmul.msk.bf16.gmra.mxu1 %vm287_vm1, %v1167_v19  ;;  %v950_v60 = vpop.f32.mrf.mxu0  ;;  %v1460_v19 = vld [vmem:[%s2063_s30 + $0x8e] sm:$0xff] }
 0x104   : > { %1953 = vmatmul.msk.bf16.gmra.mxu2 %vm287_vm1, %v1168_v54  ;;  %v2322_v61 = vadd.f32 %v947_v35, %v824_v59  ;;  %v1469_v46 = vpack.c.bf16 %v1460_v19, %v1459_v1 }
 0x105   : > { %1962 = vmatmul.msk.bf16.gmra.mxu3 %vm287_vm1, %v1318_v51  ;;  %v1170_v51 = vpack.c.bf16 %v1162_v40, %v1161_v38 }
 0x106   : > { %1971 = vmatmul.msk.bf16.gmra.mxu0 %vm287_vm1, %v1468_v57  ;;  %v1470_v57 = vpack.c.bf16 %v1462_v49, %v1461_v45  ;;  %v1642_v49 = vpop.permute.xlu1 %1641 }
 0x107   : > { %v650_v63 = vpop.f32.mrf.mxu2 }
 0x108   : > { %v800_v62 = vpop.f32.mrf.mxu3  ;;  %v675_v2 = vadd.f32 %v650_v63, %v525_v52  ;;  %v502_v3 = vpop.f32.mrf.mxu1  ;;  %v1320_v52 = vpack.c.bf16 %v1312_v43, %v1311_v41 }
 0x109   : > { %v526_v6 = vadd.f32 %v502_v3, %v2224_v11 }
 0x10a   : > { %v825_v7 = vadd.f32 %v800_v62, %v675_v2 }
 0x10b   : > { %v952_v9 = vpop.f32.mrf.mxu0 }
 0x10c   : > { %v2327_v12 = vadd.f32 %v950_v60, %v825_v7 }
 0x10f   : > { %v652_v17 = vpop.f32.mrf.mxu2 }
 0x110   : > { %v802_v18 = vpop.f32.mrf.mxu3  ;;  %v676_v4 = vadd.f32 %v652_v17, %v526_v6  ;;  %v505_v20 = vpop.f32.mrf.mxu1 }
 0x111   : > { %v527_v11 = vadd.f32 %v505_v20, %v2181_v47 }
 0x112   : > { %v826_v24 = vadd.f32 %v802_v18, %v676_v4 }
 0x113   : > { %1945 = vmatmul.msk.bf16.gmra.mxu1 %vm287_vm1, %v1168_v54  ;;  %v955_v26 = vpop.f32.mrf.mxu0 }
 0x114   : > { %1954 = vmatmul.msk.bf16.gmra.mxu2 %vm287_vm1, %v1169_v21  ;;  %v2339_v27 = vadd.f32 %v952_v9, %v826_v24 }
 0x115   : > { %1963 = vmatmul.msk.bf16.gmra.mxu3 %vm287_vm1, %v1319_v23 }
 0x116   : > { %1972 = vmatmul.msk.bf16.gmra.mxu0 %vm287_vm1, %v1469_v46 }
 0x117   : > { %v655_v28 = vpop.f32.mrf.mxu2 }
 0x118   : > { %v805_v47 = vpop.f32.mrf.mxu3  ;;  %v677_v29 = vadd.f32 %v655_v28, %v527_v11  ;;  %v507_v30 = vpop.f32.mrf.mxu1 }
 0x119   : > { %v528_v34 = vadd.f32 %v507_v30, %v2191_v56 }
 0x11a   : > { %v827_v35 = vadd.f32 %v805_v47, %v677_v29 }
 0x11b   : > { %v957_v36 = vpop.f32.mrf.mxu0 }
 0x11c   : > { %v2345_v39 = vadd.f32 %v955_v26, %v827_v35 }
 0x11f   : > { %v657_v48 = vpop.f32.mrf.mxu2 }
 0x120   : > { %v807_v44 = vpop.f32.mrf.mxu3  ;;  %v678_v50 = vadd.f32 %v657_v48, %v528_v34  ;;  %v510_v54 = vpop.f32.mrf.mxu1 }
 0x121   : > { %v529_v59 = vadd.f32 %v510_v54, %v2204_v0 }
 0x122   : > { %v828_v56 = vadd.f32 %v807_v44, %v678_v50 }
 0x123   : > { %1946 = vmatmul.msk.bf16.gmra.mxu1 %vm287_vm1, %v1169_v21  ;;  %v960_v58 = vpop.f32.mrf.mxu0 }
 0x124   : > { %1955 = vmatmul.msk.bf16.gmra.mxu2 %vm287_vm1, %v1170_v51  ;;  %v2356_v60 = vadd.f32 %v957_v36, %v828_v56 }
 0x125   : > { %1964 = vmatmul.msk.bf16.gmra.mxu3 %vm287_vm1, %v1320_v52 }
 0x126   : > { %1973 = vmatmul.msk.bf16.gmra.mxu0 %vm287_vm1, %v1470_v57 }
 0x127   : > { %v660_v63 = vpop.f32.mrf.mxu2 }
 0x128   : > { %v810_v62 = vpop.f32.mrf.mxu3  ;;  %v679_v2 = vadd.f32 %v660_v63, %v529_v59  ;;  %v512_v3 = vpop.f32.mrf.mxu1 }
 0x129   : > { %v530_v6 = vadd.f32 %v512_v3, %v2226_v13  ;;  %v1632_v13 = vpop.permute.xlu0 %1631 }
 0x12a   : > { %v829_v0 = vadd.f32 %v810_v62, %v679_v2 }
 0x12b   : > { %v962_v7 = vpop.f32.mrf.mxu0 }
 0x12c   : > { %v2360_v9 = vadd.f32 %v960_v58, %v829_v0 }
 0x12f   : > { %v662_v10 = vpop.f32.mrf.mxu2 }
 0x130   : > { %v812_v14 = vpop.f32.mrf.mxu3  ;;  %v680_v15 = vadd.f32 %v662_v10, %v530_v6  ;;  %v1075_v16 = vpop.f32.mrf.mxu1 }
 0x131   : > { %v1115_v19 = vadd.f32 %v1075_v16, %v2237_v32  ;;  %v1637_v33 = vpop.permute.xlu0 %1636 }
 0x132   : > { %v830_v17 = vadd.f32 %v812_v14, %v680_v15 }
 0x133   : > { %v1525_v18 = vpop.f32.mrf.mxu0 }
 0x134   : > { %v2362_v1 = vadd.f32 %v962_v7, %v830_v17  ;;  %v1647_v7 = vpop.permute.xlu1 %1646 }
 0x137   : > { %v1225_v4 = vpop.f32.mrf.mxu2 }
 0x138   : > { %v1375_v20 = vpop.f32.mrf.mxu3  ;;  %v1265_v21 = vadd.f32 %v1225_v4, %v1115_v19  ;;  %v1077_v23 = vpop.f32.mrf.mxu1 }
 0x139   : > { %v1116_v46 = vadd.f32 %v1077_v23, %v2248_v53 }
 0x13a   : > { %v1415_v42 = vadd.f32 %v1375_v20, %v1265_v21  ;;  %v1652_v20 = vpop.permute.xlu2 %1651 }
 0x13b   : > { %v1527_v11 = vpop.f32.mrf.mxu0 }
 0x13c   : > { %v1565_v24 = vadd.f32 %v1525_v18, %v1415_v42 }
 0x13e   : > { %1581 = vst [vmem:[%s2370_s21] sm:$0xff] %v1565_v24  ;;  %v1709_v35 = vmul.f32 %v1632_v13, %v1565_v24 }
 0x13f   : > { %v1227_v32 = vpop.f32.mrf.mxu2 }
 0x140   : > { %v1377_v26 = vpop.f32.mrf.mxu3  ;;  %v1266_v28 = vadd.f32 %v1227_v32, %v1116_v46  ;;  %v1080_v47 = vpop.f32.mrf.mxu1  ;;  %v1747_v53 = vmul.f32 %v1709_v35, %v1709_v35 }
 0x141   : > { %v1117_v36 = vadd.f32 %v1080_v47, %v2253_v5 }
 0x142   : > { %v1416_v29 = vadd.f32 %v1377_v26, %v1266_v28 }
 0x143   : > { %v1530_v30 = vpop.f32.mrf.mxu0 }
 0x144   : > { %v1566_v34 = vadd.f32 %v1527_v11, %v1416_v29 }
 0x146   : > { %1582 = vst [vmem:[%s2370_s21 + $0x8] sm:$0xff] %v1566_v34  ;;  %v1710_v38 = vmul.f32 %v1637_v33, %v1566_v34  ;;  %v1657_v34 = vpop.permute.xlu2 %1656 }
 0x147   : > { %v1230_v40 = vpop.f32.mrf.mxu2 }
 0x148   : > { %v1380_v41 = vpop.f32.mrf.mxu3  ;;  %v1267_v43 = vadd.f32 %v1230_v40, %v1117_v36  ;;  %v1082_v48 = vpop.f32.mrf.mxu1  ;;  %v1725_v44 = vadd.f32 %v1710_v38, %v1709_v35  ;;  %v1748_v45 = vmul.f32 %v1710_v38, %v1710_v38 }
 0x149   : > { %v1118_v59 = vadd.f32 %v1082_v48, %v2264_v22 }
 0x14a   : > { %v1417_v50 = vadd.f32 %v1380_v41, %v1267_v43  ;;  %v1763_v54 = vadd.f32 %v1748_v45, %v1747_v53 }
 0x14b   : > { %v1532_v51 = vpop.f32.mrf.mxu0 }
 0x14c   : > { %v1567_v52 = vadd.f32 %v1530_v30, %v1417_v50  ;;  %v1662_v50 = vpop.permute.xlu0 %1661 }
 0x14e   : > { %1583 = vst [vmem:[%s2370_s21 + $0x10] sm:$0xff] %v1567_v52  ;;  %v1711_v5 = vmul.f32 %v1642_v49, %v1567_v52 }
 0x14f   : > { %v1232_v56 = vpop.f32.mrf.mxu2 }
 0x150   : > { %v1382_v57 = vpop.f32.mrf.mxu3  ;;  %v1268_v58 = vadd.f32 %v1232_v56, %v1118_v59  ;;  %v1085_v63 = vpop.f32.mrf.mxu1  ;;  %v1726_v62 = vadd.f32 %v1725_v44, %v1711_v5  ;;  %v1749_v2 = vmul.f32 %v1711_v5, %v1711_v5 }
 0x151   : > { %v1119_v14 = vadd.f32 %v1085_v63, %v2270_v31 }
 0x152   : > { %v1418_v3 = vadd.f32 %v1382_v57, %v1268_v58  ;;  %v1764_v6 = vadd.f32 %v1763_v54, %v1749_v2 }
 0x153   : > { %v1535_v0 = vpop.f32.mrf.mxu0 }
 0x154   : > { %v1568_v10 = vadd.f32 %v1532_v51, %v1418_v3  ;;  %v1667_v3 = vpop.permute.xlu1 %1666 }
 0x156   : > { %1584 = vst [vmem:[%s2370_s21 + $0x18] sm:$0xff] %v1568_v10  ;;  %v1712_v15 = vmul.f32 %v1647_v7, %v1568_v10 }
 0x157   : > { %v1235_v16 = vpop.f32.mrf.mxu2 }
 0x158   : > { %v1385_v22 = vpop.f32.mrf.mxu3  ;;  %v1269_v17 = vadd.f32 %v1235_v16, %v1119_v14  ;;  %v1087_v18 = vpop.f32.mrf.mxu1  ;;  %v1727_v19 = vadd.f32 %v1726_v62, %v1712_v15  ;;  %v1750_v4 = vmul.f32 %v1712_v15, %v1712_v15 }
 0x159   : > { %v1120_v11 = vadd.f32 %v1087_v18, %v2283_v55 }
 0x15a   : > { %v1419_v21 = vadd.f32 %v1385_v22, %v1269_v17  ;;  %v1765_v23 = vadd.f32 %v1764_v6, %v1750_v4  ;;  %v1672_v4 = vpop.permute.xlu2 %1671 }
 0x15b   : > { %v1537_v13 = vpop.f32.mrf.mxu0 }
 0x15c   : > { %v1569_v42 = vadd.f32 %v1535_v0, %v1419_v21 }
 0x15e   : > { %1585 = vst [vmem:[%s2370_s21 + $0x20] sm:$0xff] %v1569_v42  ;;  %v1713_v24 = vmul.f32 %v1652_v20, %v1569_v42 }
 0x15f   : > { %v1237_v46 = vpop.f32.mrf.mxu2 }
 0x160   : > { %v1387_v31 = vpop.f32.mrf.mxu3  ;;  %v1270_v32 = vadd.f32 %v1237_v46, %v1120_v11  ;;  %v1090_v26 = vpop.f32.mrf.mxu1  ;;  %v1728_v28 = vadd.f32 %v1727_v19, %v1713_v24  ;;  %v1751_v47 = vmul.f32 %v1713_v24, %v1713_v24 }
 0x161   : > { %v1121_v36 = vadd.f32 %v1090_v26, %v2290_v8 }
 0x162   : > { %v1420_v29 = vadd.f32 %v1387_v31, %v1270_v32  ;;  %v1766_v30 = vadd.f32 %v1765_v23, %v1751_v47  ;;  %v1677_v47 = vpop.permute.xlu0 %1676 }
 0x163   : > { %v1540_v33 = vpop.f32.mrf.mxu0 }
 0x164   : > { %v1570_v35 = vadd.f32 %v1537_v13, %v1420_v29 }
 0x166   : > { %1586 = vst [vmem:[%s2370_s21 + $0x28] sm:$0xff] %v1570_v35  ;;  %v1714_v38 = vmul.f32 %v1657_v34, %v1570_v35 }
 0x167   : > { %v1240_v40 = vpop.f32.mrf.mxu2 }
 0x168   : > { %v1390_v55 = vpop.f32.mrf.mxu3  ;;  %v1271_v41 = vadd.f32 %v1240_v40, %v1121_v36  ;;  %v1092_v43 = vpop.f32.mrf.mxu1  ;;  %v1729_v48 = vadd.f32 %v1728_v28, %v1714_v38  ;;  %v1752_v53 = vmul.f32 %v1714_v38, %v1714_v38 }
 0x169   : > { %v1122_v51 = vadd.f32 %v1092_v43, %v2302_v25 }
 0x16a   : > { %v1421_v44 = vadd.f32 %v1390_v55, %v1271_v41  ;;  %v1767_v45 = vadd.f32 %v1766_v30, %v1752_v53 }
 0x16b   : > { %v1542_v49 = vpop.f32.mrf.mxu0 }
 0x16c   : > { %v1571_v54 = vadd.f32 %v1540_v33, %v1421_v44 }
 0x16e   : > { %1587 = vst [vmem:[%s2370_s21 + $0x30] sm:$0xff] %v1571_v54  ;;  %v1715_v52 = vmul.f32 %v1662_v50, %v1571_v54 }
 0x16f   : > { %v1242_v59 = vpop.f32.mrf.mxu2 }
 0x170   : > { %v1392_v8 = vpop.f32.mrf.mxu3  ;;  %v1272_v5 = vadd.f32 %v1242_v59, %v1122_v51  ;;  %v1095_v56 = vpop.f32.mrf.mxu1  ;;  %v1730_v57 = vadd.f32 %v1729_v48, %v1715_v52  ;;  %v1753_v58 = vmul.f32 %v1715_v52, %v1715_v52 }
 0x171   : > { %v1123_v0 = vadd.f32 %v1095_v56, %v2309_v37  ;;  %v1682_v48 = vpop.permute.xlu1 %1681  ;;  %v1687_v56 = vpop.permute.xlu2 %1686 }
 0x172   : > { %v1422_v63 = vadd.f32 %v1392_v8, %v1272_v5  ;;  %v1768_v62 = vadd.f32 %v1767_v45, %v1753_v58 }
 0x173   : > { %v1545_v2 = vpop.f32.mrf.mxu0 }
 0x174   : > { %v1572_v6 = vadd.f32 %v1542_v49, %v1422_v63 }
 0x176   : > { %1588 = vst [vmem:[%s2370_s21 + $0x38] sm:$0xff] %v1572_v6  ;;  %v1716_v7 = vmul.f32 %v1667_v3, %v1572_v6 }
 0x177   : > { %v1245_v10 = vpop.f32.mrf.mxu2 }
 0x178   : > { %v1395_v25 = vpop.f32.mrf.mxu3  ;;  %v1273_v14 = vadd.f32 %v1245_v10, %v1123_v0  ;;  %v1097_v15 = vpop.f32.mrf.mxu1  ;;  %v1731_v16 = vadd.f32 %v1730_v57, %v1716_v7  ;;  %v1754_v22 = vmul.f32 %v1716_v7, %v1716_v7 }
 0x179   : > { %v1124_v21 = vadd.f32 %v1097_v15, %v2322_v61 }
 0x17a   : > { %v1423_v17 = vadd.f32 %v1395_v25, %v1273_v14  ;;  %v1769_v18 = vadd.f32 %v1768_v62, %v1754_v22  ;;  %v1692_v25 = vpop.permute.xlu0 %1691 }
 0x17b   : > { %v1547_v19 = vpop.f32.mrf.mxu0 }
 0x17c   : > { %v1573_v20 = vadd.f32 %v1545_v2, %v1423_v17 }
 0x17e   : > { %1589 = vst [vmem:[%s2370_s21 + $0x40] sm:$0xff] %v1573_v20  ;;  %v1717_v23 = vmul.f32 %v1672_v4, %v1573_v20 }
 0x17f   : > { %v1247_v13 = vpop.f32.mrf.mxu2 }
 0x180   : > { %v1397_v37 = vpop.f32.mrf.mxu3  ;;  %v1274_v42 = vadd.f32 %v1247_v13, %v1124_v21  ;;  %v1100_v11 = vpop.f32.mrf.mxu1  ;;  %v1732_v24 = vadd.f32 %v1731_v16, %v1717_v23  ;;  %v1755_v46 = vmul.f32 %v1717_v23, %v1717_v23 }
 0x181   : > { %v1125_v29 = vadd.f32 %v1100_v11, %v2327_v12  ;;  %v1697_v13 = vpop.permute.xlu1 %1696 }
 0x182   : > { %v1424_v31 = vadd.f32 %v1397_v37, %v1274_v42  ;;  %v1770_v32 = vadd.f32 %v1769_v18, %v1755_v46 }
 0x183   : > { %v1550_v26 = vpop.f32.mrf.mxu0 }
 0x184   : > { %v1574_v28 = vadd.f32 %v1547_v19, %v1424_v31 }
 0x186   : > { %1590 = vst [vmem:[%s2370_s21 + $0x48] sm:$0xff] %v1574_v28  ;;  %v1718_v30 = vmul.f32 %v1677_v47, %v1574_v28 }
 0x187   : > { %v1250_v33 = vpop.f32.mrf.mxu2 }
 0x188   : > { %v1400_v61 = vpop.f32.mrf.mxu3  ;;  %v1275_v34 = vadd.f32 %v1250_v33, %v1125_v29  ;;  %v1102_v35 = vpop.f32.mrf.mxu1  ;;  %v1733_v36 = vadd.f32 %v1732_v24, %v1718_v30  ;;  %v1756_v38 = vmul.f32 %v1718_v30, %v1718_v30 }
 0x189   : > { %v1126_v53 = vadd.f32 %v1102_v35, %v2339_v27  ;;  %v1702_v30 = vpop.permute.xlu2 %1701 }
 0x18a   : > { %v1425_v40 = vadd.f32 %v1400_v61, %v1275_v34  ;;  %v1771_v55 = vadd.f32 %v1770_v32, %v1756_v38 }
 0x18b   : > { %v1552_v41 = vpop.f32.mrf.mxu0 }
 0x18c   : > { %v1575_v43 = vadd.f32 %v1550_v26, %v1425_v40 }
 0x18e   : > { %1591 = vst [vmem:[%s2370_s21 + $0x50] sm:$0xff] %v1575_v43  ;;  %v1719_v44 = vmul.f32 %v1682_v48, %v1575_v43  ;;  %v1707_v48 = vpop.permute.xlu0 %1706 }
 0x18f   : > { %v1252_v45 = vpop.f32.mrf.mxu2 }
 0x190   : > { %v1402_v12 = vpop.f32.mrf.mxu3  ;;  %v1276_v49 = vadd.f32 %v1252_v45, %v1126_v53  ;;  %v1105_v50 = vpop.f32.mrf.mxu1  ;;  %v1734_v54 = vadd.f32 %v1733_v36, %v1719_v44  ;;  %v1757_v51 = vmul.f32 %v1719_v44, %v1719_v44 }
 0x191   : > { %v1127_v57 = vadd.f32 %v1105_v50, %v2345_v39 }
 0x192   : > { %v1426_v52 = vadd.f32 %v1402_v12, %v1276_v49  ;;  %v1772_v59 = vadd.f32 %v1771_v55, %v1757_v51 }
 0x193   : > { %v1555_v5 = vpop.f32.mrf.mxu0 }
 0x194   : > { %v1576_v8 = vadd.f32 %v1552_v41, %v1426_v52 }
 0x196   : > { %1592 = vst [vmem:[%s2370_s21 + $0x58] sm:$0xff] %v1576_v8  ;;  %v1720_v58 = vmul.f32 %v1687_v56, %v1576_v8 }
 0x197   : > { %v1255_v63 = vpop.f32.mrf.mxu2 }
 0x198   : > { %v1405_v27 = vpop.f32.mrf.mxu3  ;;  %v1277_v62 = vadd.f32 %v1255_v63, %v1127_v57  ;;  %v1107_v2 = vpop.f32.mrf.mxu1  ;;  %v1735_v3 = vadd.f32 %v1734_v54, %v1720_v58  ;;  %v1758_v6 = vmul.f32 %v1720_v58, %v1720_v58 }
 0x199   : > { %v1128_v14 = vadd.f32 %v1107_v2, %v2356_v60 }
 0x19a   : > { %v1427_v0 = vadd.f32 %v1405_v27, %v1277_v62  ;;  %v1773_v7 = vadd.f32 %v1772_v59, %v1758_v6 }
 0x19b   : > { %v1557_v16 = vpop.f32.mrf.mxu0 }
 0x19c   : > { %v1577_v10 = vadd.f32 %v1555_v5, %v1427_v0 }
 0x19e   : > { %1593 = vst [vmem:[%s2370_s21 + $0x60] sm:$0xff] %v1577_v10  ;;  %v1721_v15 = vmul.f32 %v1692_v25, %v1577_v10 }
 0x19f   : > { %v1257_v22 = vpop.f32.mrf.mxu2 }
 0x1a0   : > { %v1407_v39 = vpop.f32.mrf.mxu3  ;;  %v1278_v17 = vadd.f32 %v1257_v22, %v1128_v14  ;;  %v1736_v18 = vadd.f32 %v1735_v3, %v1721_v15  ;;  %v1759_v19 = vmul.f32 %v1721_v15, %v1721_v15  ;;  %v1110_v4 = vpop.f32.mrf.mxu1 }
 0x1a1   : > { %v1129_v37 = vadd.f32 %v1110_v4, %v2360_v9 }
 0x1a2   : > { %v1428_v20 = vadd.f32 %v1407_v39, %v1278_v17  ;;  %v1774_v21 = vadd.f32 %v1773_v7, %v1759_v19 }
 0x1a3   : > { %v1560_v32 = vpop.f32.mrf.mxu0 }
 0x1a4   : > { %v1578_v23 = vadd.f32 %v1557_v16, %v1428_v20 }
 0x1a6   : > { %1594 = vst [vmem:[%s2370_s21 + $0x68] sm:$0xff] %v1578_v23  ;;  %v1722_v42 = vmul.f32 %v1697_v13, %v1578_v23 }
 0x1a7   : > { %v1260_v11 = vpop.f32.mrf.mxu2 }
 0x1a8   : > { %v1410_v60 = vpop.f32.mrf.mxu3  ;;  %v1279_v24 = vadd.f32 %v1260_v11, %v1129_v37  ;;  %v1737_v46 = vadd.f32 %v1736_v18, %v1722_v42  ;;  %v1760_v31 = vmul.f32 %v1722_v42, %v1722_v42  ;;  %v1112_v47 = vpop.f32.mrf.mxu1 }
 0x1a9   : > { %v1130_v33 = vadd.f32 %v1112_v47, %v2362_v1 }
 0x1aa   : > { %v1429_v26 = vadd.f32 %v1410_v60, %v1279_v24  ;;  %v1775_v28 = vadd.f32 %v1774_v21, %v1760_v31 }
 0x1ab   : > { %v1562_v41 = vpop.f32.mrf.mxu0 }
 0x1ac   : > { %v1579_v29 = vadd.f32 %v1560_v32, %v1429_v26 }
 0x1ae   : > { %1595 = vst [vmem:[%s2370_s21 + $0x70] sm:$0xff] %v1579_v29  ;;  %v1723_v61 = vmul.f32 %v1702_v30, %v1579_v29 }
 0x1af   : > { %v1262_v34 = vpop.f32.mrf.mxu2 }
 0x1b0   : > { %v1280_v9 = vadd.f32 %v1262_v34, %v1130_v33  ;;  %v1738_v35 = vadd.f32 %v1737_v46, %v1723_v61  ;;  %v1761_v36 = vmul.f32 %v1723_v61, %v1723_v61  ;;  %v1412_v38 = vpop.f32.mrf.mxu3 }
 0x1b2   : > { %v1430_v40 = vadd.f32 %v1412_v38, %v1280_v9  ;;  %v1776_v55 = vadd.f32 %v1775_v28, %v1761_v36 }
 0x1b4   : > { %v1580_v43 = vadd.f32 %v1562_v41, %v1430_v40 }
 0x1b6   : > { %1596 = vst [vmem:[%s2370_s21 + $0x78] sm:$0xff] %v1580_v43  ;;  %v1724_v53 = vmul.f32 %v1707_v48, %v1580_v43 }
 0x1b8   : > { %v1739_v44 = vadd.f32 %v1738_v35, %v1724_v53  ;;  %v1762_v45 = vmul.f32 %v1724_v53, %v1724_v53 }
 0x1ba   : > { %v1740_v12 = vrot.slane %v1739_v44, 4  ;;  %v1777_v49 = vadd.f32 %v1776_v55, %v1762_v45 }
 0x1bc   : > { %v1741_v1 = vadd.f32 %v1740_v12, %v1739_v44  ;;  %v1778_v50 = vrot.slane %v1777_v49, 4 }
 0x1be   : > { %v1742_v54 = vrot.slane %v1741_v1, 2  ;;  %v1779_v51 = vadd.f32 %v1778_v50, %v1777_v49 }
 0x1c0   : > { %v1743_v52 = vadd.f32 %v1742_v54, %v1741_v1  ;;  %v1780_v59 = vrot.slane %v1779_v51, 2 }
 0x1c2   : > { %v1744_v8 = vrot.slane %v1743_v52, 1  ;;  %v1781_v5 = vadd.f32 %v1780_v59, %v1779_v51 }
 0x1c4   : > { %v1745_v56 = vadd.f32 %v1744_v8, %v1743_v52  ;;  %v1782_v57 = vrot.slane %v1781_v5, 1 }
 0x1c6   : > { %1746 = vst [vmem:[%s228_s25] sm:$0x1] %v1745_v56  ;;  %v1783_v58 = vadd.f32 %v1782_v57, %v1781_v5 }
 0x1c8   : > { %1784 = vst [vmem:[%s228_s25 + $0x1] sm:$0x1] %v1783_v58 }
 0x1c9 PF: > { %s15_s15 = sadd.s32 1, %s2001_s15  }
 0x1ca   : > { %p12_p4 = scmp.ge.s32.totalorder %s15_s15, 8  }
 0x1cc   :  { %14 = sbr.rel (!%p12_p4) target bundleno = 1 (0x1), region = 85 }

</bundles_post_ra>
